<compile_context>
chip_gen: v5e
topology: v5e:2x2
jax: 0.10.0
libtpu: 0.0.40
codegen_flags: <defaults>
</compile_context>

<pallas_src>
import math

import jax
import jax.numpy as jnp
from jax.experimental import pallas as pl
from jax.experimental.pallas import tpu as pltpu

_LOG_EPS = 1e-6
_LANES = 128


def si_frame_kernel(cur_ref, nxt_ref, a0_ref, a1_ref, w_ref, o_ref):
    """One tile of TF frames (two-stage: FIR matmul -> windowed energy matmul).

    cur_ref: (RPB, 128)     raw signal rows starting at this tile's first sample
    nxt_ref: (RPB, 128)     the following RPB signal rows (conv / window tail)
    a0_ref : (128, K*128)   banded-Toeplitz FIR matrix (taps within a row)
    a1_ref : (128, K*128)   banded-Toeplitz FIR matrix (taps spilling to next row)
    w_ref  : (NQ*128, TF)   window-integration matrix (conv position -> frame)
    o_ref  : (K, TF)        log band energies, frames on the lane axis
    """
    lanes = cur_ref.shape[1]
    k_bands, tf = o_ref.shape
    nq = w_ref.shape[0] // lanes

    # contiguous signal chunk for this tile (2*RPB rows of 128 samples)
    chunk = jnp.concatenate([cur_ref[...], nxt_ref[...]], axis=0)
    lo = chunk[0:nq, :]          # rows q     of the chunk
    hi = chunk[1:nq + 1, :]      # rows q + 1 of the chunk

    # Stage 1: FIR-filter every conv position exactly once.
    #   y[q, kk*128 + c] = sum_l chunk[q*128 + c + l] * h[l, kk]
    y = (jnp.dot(lo, a0_ref[...], preferred_element_type=jnp.float32)
         + jnp.dot(hi, a1_ref[...], preferred_element_type=jnp.float32))

    # Stage 2: pointwise energy + short integration, as one (K,128)x(128,TF)
    # MXU matmul per 128-position block, accumulating a lane-dense (K, TF) tile.
    s = jnp.zeros((k_bands, tf), jnp.float32)
    for q in range(nq):
        yq = jnp.concatenate(
            [y[q:q + 1, kk * lanes:(kk + 1) * lanes] for kk in range(k_bands)],
            axis=0)                                        # (K, 128)
        eq = yq * yq                                       # energy nonlinearity
        wq = w_ref[q * lanes:(q + 1) * lanes, :]           # (128, TF)
        s = s + jnp.dot(eq, wq, preferred_element_type=jnp.float32)

    # log compression
    o_ref[...] = jnp.log(s + _LOG_EPS).astype(o_ref.dtype)


def _make_fir_toeplitz(filters):
    """Banded-Toeplitz matrices: a 128-sample signal row times (A0, A1) yields
    the FIR outputs of its 128 conv positions for all K bands.
    Column layout is band-major: col = k*128 + c."""
    L, K = filters.shape
    B = _LANES
    j = jnp.arange(B)[:, None]
    c = jnp.arange(B)[None, :]

    def banded(lag):
        valid = (lag >= 0) & (lag < L)
        taps = filters[jnp.clip(lag, 0, L - 1), :]          # (B, B, K)
        taps = jnp.where(valid[:, :, None], taps, 0.0)
        return jnp.transpose(taps, (0, 2, 1)).reshape(B, K * B)

    a0 = banded(j - c).astype(jnp.float32)
    a1 = banded(j + B - c).astype(jnp.float32)
    return a0, a1


def _make_integration_matrix(window, frame_shift, nq, tf):
    """W[p, f] = window[p - f*frame_shift] if inside the window else 0."""
    W = window.shape[0]
    B = _LANES
    p = jnp.arange(nq * B)[:, None]
    f = jnp.arange(tf)[None, :]
    w_idx = p - f * frame_shift
    valid = (w_idx >= 0) & (w_idx < W)
    return jnp.where(valid, window[jnp.clip(w_idx, 0, W - 1)], 0.0).astype(
        jnp.float32)


def si_frame_computer(sig, filters, window, frame_shift, *, tf=256):
    """Compute short-integration frames of `sig`.

    sig:     (N,) float signal
    filters: (L, K) FIR filter bank (taps x bands), L <= 128
    window:  (W,) integration window
    returns: (F, K) features, F = (N - L - W + 1) // frame_shift + 1
    """
    N = sig.shape[0]
    L, K = filters.shape
    W = int(window.shape[0])
    shift = int(frame_shift)
    B = _LANES
    assert L <= B, "filter length must fit within one 128-sample row"

    F = (N - L - W + 1) // shift + 1
    assert F > 0

    # TF frames per grid step, with TF*shift a multiple of the 128-lane row.
    step = B // math.gcd(B, shift)
    TF = max(step, -(-tf // step) * step)
    RPB = TF * shift // B                        # signal rows consumed per step
    NQ = -(-((TF - 1) * shift + W) // B)         # conv-position blocks per step
    assert NQ + 1 <= 2 * RPB, "frame tile too small for window/filter tail"

    n_tiles = -(-F // TF)
    Fp = n_tiles * TF

    # Raw signal, zero-padded and reshaped into lane-dense rows (no im2col).
    n_rows = (n_tiles + 1) * RPB
    pad = n_rows * B - N
    assert pad >= 0
    sig_rows = jnp.pad(sig, (0, pad)).reshape(n_rows, B)

    a0, a1 = _make_fir_toeplitz(filters)
    wmat = _make_integration_matrix(window, shift, NQ, TF)

    cost = pl.CostEstimate(
        flops=n_tiles * (2 * 2 * NQ * B * K * B + 2 * NQ * K * B * TF),
        transcendentals=n_tiles * K * TF,
        bytes_accessed=4 * (2 * n_rows * B + 2 * B * K * B + NQ * B * TF
                            + K * Fp),
    )

    out = pl.pallas_call(
        si_frame_kernel,
        out_shape=jax.ShapeDtypeStruct((K, Fp), sig.dtype),
        grid_spec=pltpu.PrefetchScalarGridSpec(
            num_scalar_prefetch=0,
            grid=(n_tiles,),
            in_specs=[
                pl.BlockSpec((RPB, B), lambda i: (i, 0)),       # current rows
                pl.BlockSpec((RPB, B), lambda i: (i + 1, 0)),   # tail rows
                pl.BlockSpec((B, K * B), lambda i: (0, 0)),     # A0 (resident)
                pl.BlockSpec((B, K * B), lambda i: (0, 0)),     # A1 (resident)
                pl.BlockSpec((NQ * B, TF), lambda i: (0, 0)),   # window matrix
            ],
            out_specs=pl.BlockSpec((K, TF), lambda i: (0, i)),
        ),
        compiler_params=pltpu.CompilerParams(
            dimension_semantics=("parallel",)),
        cost_estimate=cost,
    )(sig_rows, sig_rows, a0, a1, wmat)

    # lane-dense (K, Fp) kernel output -> (F, K) features
    return out[:, :F].T


# --- deterministic parameter construction (synthetic filter bank) ---
def make_filterbank(num_filts=8, filt_len=32):
    """Cosine-modulated Hann FIR bank, unit-energy per band. Shape (L, K)."""
    l = jnp.arange(filt_len, dtype=jnp.float32)
    hann = 0.5 - 0.5 * jnp.cos(2.0 * math.pi * l / (filt_len - 1))
    centre = (jnp.arange(num_filts, dtype=jnp.float32) + 1.0) / (2.0 * num_filts)
    h = hann[None, :] * jnp.cos(2.0 * math.pi * centre[:, None] * l[None, :])
    h = h / jnp.sqrt(jnp.sum(h * h, axis=1, keepdims=True))
    return h.T.astype(jnp.float32)  # (L, K)


def make_integration_window(W=16):
    n = jnp.arange(W, dtype=jnp.float32)
    w = 0.5 - 0.5 * jnp.cos(2.0 * math.pi * n / (W - 1))
    return (w / jnp.sum(w)).astype(jnp.float32)


def _reference(sig, filters, window, frame_shift):
    """Pure-JAX reference for correctness checking."""
    N = sig.shape[0]
    L, K = filters.shape
    W = window.shape[0]
    F = (N - L - W + 1) // frame_shift + 1
    idx = (
        jnp.arange(F)[:, None, None] * frame_shift
        + jnp.arange(W)[None, :, None]
        + jnp.arange(L)[None, None, :]
    )
    X = sig[idx]                                           # (F, W, L)
    y = jnp.einsum("fwl,lk->fwk", X, filters,
                   precision=jax.lax.Precision.HIGHEST)    # (F, W, K)
    e = y * y
    s = jnp.einsum("fwk,w->fk", e, window,
                   precision=jax.lax.Precision.HIGHEST)
    return jnp.log(s + _LOG_EPS)


if __name__ == "__main__":
    key = jax.random.PRNGKey(0)

    num_filts = 8      # num_coeffs
    filt_len = 32      # FIR taps per band
    win_len = 16       # short-integration window length
    frame_shift = 8    # hop
    n_samples = 512

    sig = jax.random.normal(key, (n_samples,), dtype=jnp.float32)
    filters = make_filterbank(num_filts, filt_len)     # (L, K)
    window = make_integration_window(win_len)          # (W,)

    feats = si_frame_computer(sig, filters, window, frame_shift)
    feats = jax.block_until_ready(feats)

    ref = _reference(sig, filters, window, frame_shift)
    assert feats.shape == ref.shape, (feats.shape, ref.shape)
    assert feats.dtype == sig.dtype
    err = float(jnp.max(jnp.abs(feats - ref)))
    assert err < 1e-3, f"max abs err {err}"

    print("KERNEL_OK")
</pallas_src>

<mosaic_0001>
module attributes {stable_mosaic.version = 11 : i64} {
  func.func @si_frame_kernel(%arg0: i32, %arg1: memref<16x128xf32, #tpu.memory_space<vmem>>, %arg2: memref<16x128xf32, #tpu.memory_space<vmem>>, %arg3: memref<128x1024xf32, #tpu.memory_space<vmem>>, %arg4: memref<128x1024xf32, #tpu.memory_space<vmem>>, %arg5: memref<2176x256xf32, #tpu.memory_space<vmem>>, %arg6: memref<8x256xf32, #tpu.memory_space<vmem>>) attributes {dimension_semantics = [#tpu.dimension_semantics<parallel>], iteration_bounds = array<i64: 1>, scalar_prefetch = 0 : i64, scratch_operands = 0 : i64, tpu.core_type = #tpu.core_type<tc>, window_params = [{transform_indices = @transform_0, window_bounds = array<i64: 16, 128>}, {transform_indices = @transform_1, window_bounds = array<i64: 16, 128>}, {pipeline_mode = #tpu.pipeline_mode<synchronous>, transform_indices = @transform_2, window_bounds = array<i64: 128, 1024>}, {pipeline_mode = #tpu.pipeline_mode<synchronous>, transform_indices = @transform_3, window_bounds = array<i64: 128, 1024>}, {pipeline_mode = #tpu.pipeline_mode<synchronous>, transform_indices = @transform_4, window_bounds = array<i64: 2176, 256>}, {transform_indices = @transform_5, window_bounds = array<i64: 8, 256>}]} {
    %c0 = arith.constant 0 : index
    %c0_0 = arith.constant 0 : index
    %0 = vector.load %arg1[%c0, %c0_0] : memref<16x128xf32, #tpu.memory_space<vmem>>, vector<16x128xf32>
    %c0_1 = arith.constant 0 : index
    %c0_2 = arith.constant 0 : index
    %1 = vector.load %arg2[%c0_1, %c0_2] : memref<16x128xf32, #tpu.memory_space<vmem>>, vector<16x128xf32>
    %2 = tpu.concatenate %0, %1 in 0 : vector<16x128xf32>, vector<16x128xf32> -> vector<32x128xf32>
    %3 = vector.extract_strided_slice %2 {offsets = [0, 0], sizes = [17, 128], strides = [1, 1]} : vector<32x128xf32> to vector<17x128xf32>
    %4 = vector.extract_strided_slice %2 {offsets = [1, 0], sizes = [17, 128], strides = [1, 1]} : vector<32x128xf32> to vector<17x128xf32>
    %c0_3 = arith.constant 0 : index
    %c0_4 = arith.constant 0 : index
    %5 = vector.load %arg3[%c0_3, %c0_4] : memref<128x1024xf32, #tpu.memory_space<vmem>>, vector<128x1024xf32>
    %cst = arith.constant dense<0.000000e+00> : vector<17x1024xf32>
    %6 = tpu.matmul %3, %5, %cst {dimension_numbers = #tpu.dot_dimension_numbers<[1], [0], [0], [1], [0, 0, 1, 1], [], []>} : vector<17x128xf32>, vector<128x1024xf32>, vector<17x1024xf32> -> vector<17x1024xf32>
    %c0_5 = arith.constant 0 : index
    %c0_6 = arith.constant 0 : index
    %7 = vector.load %arg4[%c0_5, %c0_6] : memref<128x1024xf32, #tpu.memory_space<vmem>>, vector<128x1024xf32>
    %cst_7 = arith.constant dense<0.000000e+00> : vector<17x1024xf32>
    %8 = tpu.matmul %4, %7, %cst_7 {dimension_numbers = #tpu.dot_dimension_numbers<[1], [0], [0], [1], [0, 0, 1, 1], [], []>} : vector<17x128xf32>, vector<128x1024xf32>, vector<17x1024xf32> -> vector<17x1024xf32>
    %9 = arith.addf %6, %8 : vector<17x1024xf32>
    %cst_8 = arith.constant 0.000000e+00 : f32
    %10 = vector.broadcast %cst_8 : f32 to vector<8x256xf32>
    %11 = vector.extract_strided_slice %9 {offsets = [0, 0], sizes = [1, 128], strides = [1, 1]} : vector<17x1024xf32> to vector<1x128xf32>
    %12 = vector.extract_strided_slice %9 {offsets = [0, 128], sizes = [1, 128], strides = [1, 1]} : vector<17x1024xf32> to vector<1x128xf32>
    %13 = vector.extract_strided_slice %9 {offsets = [0, 256], sizes = [1, 128], strides = [1, 1]} : vector<17x1024xf32> to vector<1x128xf32>
    %14 = vector.extract_strided_slice %9 {offsets = [0, 384], sizes = [1, 128], strides = [1, 1]} : vector<17x1024xf32> to vector<1x128xf32>
    %15 = vector.extract_strided_slice %9 {offsets = [0, 512], sizes = [1, 128], strides = [1, 1]} : vector<17x1024xf32> to vector<1x128xf32>
    %16 = vector.extract_strided_slice %9 {offsets = [0, 640], sizes = [1, 128], strides = [1, 1]} : vector<17x1024xf32> to vector<1x128xf32>
    %17 = vector.extract_strided_slice %9 {offsets = [0, 768], sizes = [1, 128], strides = [1, 1]} : vector<17x1024xf32> to vector<1x128xf32>
    %18 = vector.extract_strided_slice %9 {offsets = [0, 896], sizes = [1, 128], strides = [1, 1]} : vector<17x1024xf32> to vector<1x128xf32>
    %19 = tpu.concatenate %11, %12, %13, %14, %15, %16, %17, %18 in 0 : vector<1x128xf32>, vector<1x128xf32>, vector<1x128xf32>, vector<1x128xf32>, vector<1x128xf32>, vector<1x128xf32>, vector<1x128xf32>, vector<1x128xf32> -> vector<8x128xf32>
    %20 = arith.mulf %19, %19 : vector<8x128xf32>
    %c0_9 = arith.constant 0 : index
    %c0_10 = arith.constant 0 : index
    %21 = vector.load %arg5[%c0_9, %c0_10] : memref<2176x256xf32, #tpu.memory_space<vmem>>, vector<128x256xf32>
    %cst_11 = arith.constant dense<0.000000e+00> : vector<8x256xf32>
    %22 = tpu.matmul %20, %21, %cst_11 {dimension_numbers = #tpu.dot_dimension_numbers<[1], [0], [0], [1], [0, 0, 1, 1], [], []>} : vector<8x128xf32>, vector<128x256xf32>, vector<8x256xf32> -> vector<8x256xf32>
    %23 = arith.addf %10, %22 : vector<8x256xf32>
    %24 = vector.extract_strided_slice %9 {offsets = [1, 0], sizes = [1, 128], strides = [1, 1]} : vector<17x1024xf32> to vector<1x128xf32>
    %25 = vector.extract_strided_slice %9 {offsets = [1, 128], sizes = [1, 128], strides = [1, 1]} : vector<17x1024xf32> to vector<1x128xf32>
    %26 = vector.extract_strided_slice %9 {offsets = [1, 256], sizes = [1, 128], strides = [1, 1]} : vector<17x1024xf32> to vector<1x128xf32>
    %27 = vector.extract_strided_slice %9 {offsets = [1, 384], sizes = [1, 128], strides = [1, 1]} : vector<17x1024xf32> to vector<1x128xf32>
    %28 = vector.extract_strided_slice %9 {offsets = [1, 512], sizes = [1, 128], strides = [1, 1]} : vector<17x1024xf32> to vector<1x128xf32>
    %29 = vector.extract_strided_slice %9 {offsets = [1, 640], sizes = [1, 128], strides = [1, 1]} : vector<17x1024xf32> to vector<1x128xf32>
    %30 = vector.extract_strided_slice %9 {offsets = [1, 768], sizes = [1, 128], strides = [1, 1]} : vector<17x1024xf32> to vector<1x128xf32>
    %31 = vector.extract_strided_slice %9 {offsets = [1, 896], sizes = [1, 128], strides = [1, 1]} : vector<17x1024xf32> to vector<1x128xf32>
    %32 = tpu.concatenate %24, %25, %26, %27, %28, %29, %30, %31 in 0 : vector<1x128xf32>, vector<1x128xf32>, vector<1x128xf32>, vector<1x128xf32>, vector<1x128xf32>, vector<1x128xf32>, vector<1x128xf32>, vector<1x128xf32> -> vector<8x128xf32>
    %33 = arith.mulf %32, %32 : vector<8x128xf32>
    %c128 = arith.constant 128 : index
    %c0_12 = arith.constant 0 : index
    %34 = vector.load %arg5[%c128, %c0_12] : memref<2176x256xf32, #tpu.memory_space<vmem>>, vector<128x256xf32>
    %cst_13 = arith.constant dense<0.000000e+00> : vector<8x256xf32>
    %35 = tpu.matmul %33, %34, %cst_13 {dimension_numbers = #tpu.dot_dimension_numbers<[1], [0], [0], [1], [0, 0, 1, 1], [], []>} : vector<8x128xf32>, vector<128x256xf32>, vector<8x256xf32> -> vector<8x256xf32>
    %36 = arith.addf %23, %35 : vector<8x256xf32>
    %37 = vector.extract_strided_slice %9 {offsets = [2, 0], sizes = [1, 128], strides = [1, 1]} : vector<17x1024xf32> to vector<1x128xf32>
    %38 = vector.extract_strided_slice %9 {offsets = [2, 128], sizes = [1, 128], strides = [1, 1]} : vector<17x1024xf32> to vector<1x128xf32>
    %39 = vector.extract_strided_slice %9 {offsets = [2, 256], sizes = [1, 128], strides = [1, 1]} : vector<17x1024xf32> to vector<1x128xf32>
    %40 = vector.extract_strided_slice %9 {offsets = [2, 384], sizes = [1, 128], strides = [1, 1]} : vector<17x1024xf32> to vector<1x128xf32>
    %41 = vector.extract_strided_slice %9 {offsets = [2, 512], sizes = [1, 128], strides = [1, 1]} : vector<17x1024xf32> to vector<1x128xf32>
    %42 = vector.extract_strided_slice %9 {offsets = [2, 640], sizes = [1, 128], strides = [1, 1]} : vector<17x1024xf32> to vector<1x128xf32>
    %43 = vector.extract_strided_slice %9 {offsets = [2, 768], sizes = [1, 128], strides = [1, 1]} : vector<17x1024xf32> to vector<1x128xf32>
    %44 = vector.extract_strided_slice %9 {offsets = [2, 896], sizes = [1, 128], strides = [1, 1]} : vector<17x1024xf32> to vector<1x128xf32>
    %45 = tpu.concatenate %37, %38, %39, %40, %41, %42, %43, %44 in 0 : vector<1x128xf32>, vector<1x128xf32>, vector<1x128xf32>, vector<1x128xf32>, vector<1x128xf32>, vector<1x128xf32>, vector<1x128xf32>, vector<1x128xf32> -> vector<8x128xf32>
    %46 = arith.mulf %45, %45 : vector<8x128xf32>
    %c256 = arith.constant 256 : index
    %c0_14 = arith.constant 0 : index
    %47 = vector.load %arg5[%c256, %c0_14] : memref<2176x256xf32, #tpu.memory_space<vmem>>, vector<128x256xf32>
    %cst_15 = arith.constant dense<0.000000e+00> : vector<8x256xf32>
    %48 = tpu.matmul %46, %47, %cst_15 {dimension_numbers = #tpu.dot_dimension_numbers<[1], [0], [0], [1], [0, 0, 1, 1], [], []>} : vector<8x128xf32>, vector<128x256xf32>, vector<8x256xf32> -> vector<8x256xf32>
    %49 = arith.addf %36, %48 : vector<8x256xf32>
    %50 = vector.extract_strided_slice %9 {offsets = [3, 0], sizes = [1, 128], strides = [1, 1]} : vector<17x1024xf32> to vector<1x128xf32>
    %51 = vector.extract_strided_slice %9 {offsets = [3, 128], sizes = [1, 128], strides = [1, 1]} : vector<17x1024xf32> to vector<1x128xf32>
    %52 = vector.extract_strided_slice %9 {offsets = [3, 256], sizes = [1, 128], strides = [1, 1]} : vector<17x1024xf32> to vector<1x128xf32>
    %53 = vector.extract_strided_slice %9 {offsets = [3, 384], sizes = [1, 128], strides = [1, 1]} : vector<17x1024xf32> to vector<1x128xf32>
    %54 = vector.extract_strided_slice %9 {offsets = [3, 512], sizes = [1, 128], strides = [1, 1]} : vector<17x1024xf32> to vector<1x128xf32>
    %55 = vector.extract_strided_slice %9 {offsets = [3, 640], sizes = [1, 128], strides = [1, 1]} : vector<17x1024xf32> to vector<1x128xf32>
    %56 = vector.extract_strided_slice %9 {offsets = [3, 768], sizes = [1, 128], strides = [1, 1]} : vector<17x1024xf32> to vector<1x128xf32>
    %57 = vector.extract_strided_slice %9 {offsets = [3, 896], sizes = [1, 128], strides = [1, 1]} : vector<17x1024xf32> to vector<1x128xf32>
    %58 = tpu.concatenate %50, %51, %52, %53, %54, %55, %56, %57 in 0 : vector<1x128xf32>, vector<1x128xf32>, vector<1x128xf32>, vector<1x128xf32>, vector<1x128xf32>, vector<1x128xf32>, vector<1x128xf32>, vector<1x128xf32> -> vector<8x128xf32>
    %59 = arith.mulf %58, %58 : vector<8x128xf32>
    %c384 = arith.constant 384 : index
    %c0_16 = arith.constant 0 : index
    %60 = vector.load %arg5[%c384, %c0_16] : memref<2176x256xf32, #tpu.memory_space<vmem>>, vector<128x256xf32>
    %cst_17 = arith.constant dense<0.000000e+00> : vector<8x256xf32>
    %61 = tpu.matmul %59, %60, %cst_17 {dimension_numbers = #tpu.dot_dimension_numbers<[1], [0], [0], [1], [0, 0, 1, 1], [], []>} : vector<8x128xf32>, vector<128x256xf32>, vector<8x256xf32> -> vector<8x256xf32>
    %62 = arith.addf %49, %61 : vector<8x256xf32>
    %63 = vector.extract_strided_slice %9 {offsets = [4, 0], sizes = [1, 128], strides = [1, 1]} : vector<17x1024xf32> to vector<1x128xf32>
    %64 = vector.extract_strided_slice %9 {offsets = [4, 128], sizes = [1, 128], strides = [1, 1]} : vector<17x1024xf32> to vector<1x128xf32>
    %65 = vector.extract_strided_slice %9 {offsets = [4, 256], sizes = [1, 128], strides = [1, 1]} : vector<17x1024xf32> to vector<1x128xf32>
    %66 = vector.extract_strided_slice %9 {offsets = [4, 384], sizes = [1, 128], strides = [1, 1]} : vector<17x1024xf32> to vector<1x128xf32>
    %67 = vector.extract_strided_slice %9 {offsets = [4, 512], sizes = [1, 128], strides = [1, 1]} : vector<17x1024xf32> to vector<1x128xf32>
    %68 = vector.extract_strided_slice %9 {offsets = [4, 640], sizes = [1, 128], strides = [1, 1]} : vector<17x1024xf32> to vector<1x128xf32>
    %69 = vector.extract_strided_slice %9 {offsets = [4, 768], sizes = [1, 128], strides = [1, 1]} : vector<17x1024xf32> to vector<1x128xf32>
    %70 = vector.extract_strided_slice %9 {offsets = [4, 896], sizes = [1, 128], strides = [1, 1]} : vector<17x1024xf32> to vector<1x128xf32>
    %71 = tpu.concatenate %63, %64, %65, %66, %67, %68, %69, %70 in 0 : vector<1x128xf32>, vector<1x128xf32>, vector<1x128xf32>, vector<1x128xf32>, vector<1x128xf32>, vector<1x128xf32>, vector<1x128xf32>, vector<1x128xf32> -> vector<8x128xf32>
    %72 = arith.mulf %71, %71 : vector<8x128xf32>
    %c512 = arith.constant 512 : index
    %c0_18 = arith.constant 0 : index
    %73 = vector.load %arg5[%c512, %c0_18] : memref<2176x256xf32, #tpu.memory_space<vmem>>, vector<128x256xf32>
    %cst_19 = arith.constant dense<0.000000e+00> : vector<8x256xf32>
    %74 = tpu.matmul %72, %73, %cst_19 {dimension_numbers = #tpu.dot_dimension_numbers<[1], [0], [0], [1], [0, 0, 1, 1], [], []>} : vector<8x128xf32>, vector<128x256xf32>, vector<8x256xf32> -> vector<8x256xf32>
    %75 = arith.addf %62, %74 : vector<8x256xf32>
    %76 = vector.extract_strided_slice %9 {offsets = [5, 0], sizes = [1, 128], strides = [1, 1]} : vector<17x1024xf32> to vector<1x128xf32>
    %77 = vector.extract_strided_slice %9 {offsets = [5, 128], sizes = [1, 128], strides = [1, 1]} : vector<17x1024xf32> to vector<1x128xf32>
    %78 = vector.extract_strided_slice %9 {offsets = [5, 256], sizes = [1, 128], strides = [1, 1]} : vector<17x1024xf32> to vector<1x128xf32>
    %79 = vector.extract_strided_slice %9 {offsets = [5, 384], sizes = [1, 128], strides = [1, 1]} : vector<17x1024xf32> to vector<1x128xf32>
    %80 = vector.extract_strided_slice %9 {offsets = [5, 512], sizes = [1, 128], strides = [1, 1]} : vector<17x1024xf32> to vector<1x128xf32>
    %81 = vector.extract_strided_slice %9 {offsets = [5, 640], sizes = [1, 128], strides = [1, 1]} : vector<17x1024xf32> to vector<1x128xf32>
    %82 = vector.extract_strided_slice %9 {offsets = [5, 768], sizes = [1, 128], strides = [1, 1]} : vector<17x1024xf32> to vector<1x128xf32>
    %83 = vector.extract_strided_slice %9 {offsets = [5, 896], sizes = [1, 128], strides = [1, 1]} : vector<17x1024xf32> to vector<1x128xf32>
    %84 = tpu.concatenate %76, %77, %78, %79, %80, %81, %82, %83 in 0 : vector<1x128xf32>, vector<1x128xf32>, vector<1x128xf32>, vector<1x128xf32>, vector<1x128xf32>, vector<1x128xf32>, vector<1x128xf32>, vector<1x128xf32> -> vector<8x128xf32>
    %85 = arith.mulf %84, %84 : vector<8x128xf32>
    %c640 = arith.constant 640 : index
    %c0_20 = arith.constant 0 : index
    %86 = vector.load %arg5[%c640, %c0_20] : memref<2176x256xf32, #tpu.memory_space<vmem>>, vector<128x256xf32>
    %cst_21 = arith.constant dense<0.000000e+00> : vector<8x256xf32>
    %87 = tpu.matmul %85, %86, %cst_21 {dimension_numbers = #tpu.dot_dimension_numbers<[1], [0], [0], [1], [0, 0, 1, 1], [], []>} : vector<8x128xf32>, vector<128x256xf32>, vector<8x256xf32> -> vector<8x256xf32>
    %88 = arith.addf %75, %87 : vector<8x256xf32>
    %89 = vector.extract_strided_slice %9 {offsets = [6, 0], sizes = [1, 128], strides = [1, 1]} : vector<17x1024xf32> to vector<1x128xf32>
    %90 = vector.extract_strided_slice %9 {offsets = [6, 128], sizes = [1, 128], strides = [1, 1]} : vector<17x1024xf32> to vector<1x128xf32>
    %91 = vector.extract_strided_slice %9 {offsets = [6, 256], sizes = [1, 128], strides = [1, 1]} : vector<17x1024xf32> to vector<1x128xf32>
    %92 = vector.extract_strided_slice %9 {offsets = [6, 384], sizes = [1, 128], strides = [1, 1]} : vector<17x1024xf32> to vector<1x128xf32>
    %93 = vector.extract_strided_slice %9 {offsets = [6, 512], sizes = [1, 128], strides = [1, 1]} : vector<17x1024xf32> to vector<1x128xf32>
    %94 = vector.extract_strided_slice %9 {offsets = [6, 640], sizes = [1, 128], strides = [1, 1]} : vector<17x1024xf32> to vector<1x128xf32>
    %95 = vector.extract_strided_slice %9 {offsets = [6, 768], sizes = [1, 128], strides = [1, 1]} : vector<17x1024xf32> to vector<1x128xf32>
    %96 = vector.extract_strided_slice %9 {offsets = [6, 896], sizes = [1, 128], strides = [1, 1]} : vector<17x1024xf32> to vector<1x128xf32>
    %97 = tpu.concatenate %89, %90, %91, %92, %93, %94, %95, %96 in 0 : vector<1x128xf32>, vector<1x128xf32>, vector<1x128xf32>, vector<1x128xf32>, vector<1x128xf32>, vector<1x128xf32>, vector<1x128xf32>, vector<1x128xf32> -> vector<8x128xf32>
    %98 = arith.mulf %97, %97 : vector<8x128xf32>
    %c768 = arith.constant 768 : index
    %c0_22 = arith.constant 0 : index
    %99 = vector.load %arg5[%c768, %c0_22] : memref<2176x256xf32, #tpu.memory_space<vmem>>, vector<128x256xf32>
    %cst_23 = arith.constant dense<0.000000e+00> : vector<8x256xf32>
    %100 = tpu.matmul %98, %99, %cst_23 {dimension_numbers = #tpu.dot_dimension_numbers<[1], [0], [0], [1], [0, 0, 1, 1], [], []>} : vector<8x128xf32>, vector<128x256xf32>, vector<8x256xf32> -> vector<8x256xf32>
    %101 = arith.addf %88, %100 : vector<8x256xf32>
    %102 = vector.extract_strided_slice %9 {offsets = [7, 0], sizes = [1, 128], strides = [1, 1]} : vector<17x1024xf32> to vector<1x128xf32>
    %103 = vector.extract_strided_slice %9 {offsets = [7, 128], sizes = [1, 128], strides = [1, 1]} : vector<17x1024xf32> to vector<1x128xf32>
    %104 = vector.extract_strided_slice %9 {offsets = [7, 256], sizes = [1, 128], strides = [1, 1]} : vector<17x1024xf32> to vector<1x128xf32>
    %105 = vector.extract_strided_slice %9 {offsets = [7, 384], sizes = [1, 128], strides = [1, 1]} : vector<17x1024xf32> to vector<1x128xf32>
    %106 = vector.extract_strided_slice %9 {offsets = [7, 512], sizes = [1, 128], strides = [1, 1]} : vector<17x1024xf32> to vector<1x128xf32>
    %107 = vector.extract_strided_slice %9 {offsets = [7, 640], sizes = [1, 128], strides = [1, 1]} : vector<17x1024xf32> to vector<1x128xf32>
    %108 = vector.extract_strided_slice %9 {offsets = [7, 768], sizes = [1, 128], strides = [1, 1]} : vector<17x1024xf32> to vector<1x128xf32>
    %109 = vector.extract_strided_slice %9 {offsets = [7, 896], sizes = [1, 128], strides = [1, 1]} : vector<17x1024xf32> to vector<1x128xf32>
    %110 = tpu.concatenate %102, %103, %104, %105, %106, %107, %108, %109 in 0 : vector<1x128xf32>, vector<1x128xf32>, vector<1x128xf32>, vector<1x128xf32>, vector<1x128xf32>, vector<1x128xf32>, vector<1x128xf32>, vector<1x128xf32> -> vector<8x128xf32>
    %111 = arith.mulf %110, %110 : vector<8x128xf32>
    %c896 = arith.constant 896 : index
    %c0_24 = arith.constant 0 : index
    %112 = vector.load %arg5[%c896, %c0_24] : memref<2176x256xf32, #tpu.memory_space<vmem>>, vector<128x256xf32>
    %cst_25 = arith.constant dense<0.000000e+00> : vector<8x256xf32>
    %113 = tpu.matmul %111, %112, %cst_25 {dimension_numbers = #tpu.dot_dimension_numbers<[1], [0], [0], [1], [0, 0, 1, 1], [], []>} : vector<8x128xf32>, vector<128x256xf32>, vector<8x256xf32> -> vector<8x256xf32>
    %114 = arith.addf %101, %113 : vector<8x256xf32>
    %115 = vector.extract_strided_slice %9 {offsets = [8, 0], sizes = [1, 128], strides = [1, 1]} : vector<17x1024xf32> to vector<1x128xf32>
    %116 = vector.extract_strided_slice %9 {offsets = [8, 128], sizes = [1, 128], strides = [1, 1]} : vector<17x1024xf32> to vector<1x128xf32>
    %117 = vector.extract_strided_slice %9 {offsets = [8, 256], sizes = [1, 128], strides = [1, 1]} : vector<17x1024xf32> to vector<1x128xf32>
    %118 = vector.extract_strided_slice %9 {offsets = [8, 384], sizes = [1, 128], strides = [1, 1]} : vector<17x1024xf32> to vector<1x128xf32>
    %119 = vector.extract_strided_slice %9 {offsets = [8, 512], sizes = [1, 128], strides = [1, 1]} : vector<17x1024xf32> to vector<1x128xf32>
    %120 = vector.extract_strided_slice %9 {offsets = [8, 640], sizes = [1, 128], strides = [1, 1]} : vector<17x1024xf32> to vector<1x128xf32>
    %121 = vector.extract_strided_slice %9 {offsets = [8, 768], sizes = [1, 128], strides = [1, 1]} : vector<17x1024xf32> to vector<1x128xf32>
    %122 = vector.extract_strided_slice %9 {offsets = [8, 896], sizes = [1, 128], strides = [1, 1]} : vector<17x1024xf32> to vector<1x128xf32>
    %123 = tpu.concatenate %115, %116, %117, %118, %119, %120, %121, %122 in 0 : vector<1x128xf32>, vector<1x128xf32>, vector<1x128xf32>, vector<1x128xf32>, vector<1x128xf32>, vector<1x128xf32>, vector<1x128xf32>, vector<1x128xf32> -> vector<8x128xf32>
    %124 = arith.mulf %123, %123 : vector<8x128xf32>
    %c1024 = arith.constant 1024 : index
    %c0_26 = arith.constant 0 : index
    %125 = vector.load %arg5[%c1024, %c0_26] : memref<2176x256xf32, #tpu.memory_space<vmem>>, vector<128x256xf32>
    %cst_27 = arith.constant dense<0.000000e+00> : vector<8x256xf32>
    %126 = tpu.matmul %124, %125, %cst_27 {dimension_numbers = #tpu.dot_dimension_numbers<[1], [0], [0], [1], [0, 0, 1, 1], [], []>} : vector<8x128xf32>, vector<128x256xf32>, vector<8x256xf32> -> vector<8x256xf32>
    %127 = arith.addf %114, %126 : vector<8x256xf32>
    %128 = vector.extract_strided_slice %9 {offsets = [9, 0], sizes = [1, 128], strides = [1, 1]} : vector<17x1024xf32> to vector<1x128xf32>
    %129 = vector.extract_strided_slice %9 {offsets = [9, 128], sizes = [1, 128], strides = [1, 1]} : vector<17x1024xf32> to vector<1x128xf32>
    %130 = vector.extract_strided_slice %9 {offsets = [9, 256], sizes = [1, 128], strides = [1, 1]} : vector<17x1024xf32> to vector<1x128xf32>
    %131 = vector.extract_strided_slice %9 {offsets = [9, 384], sizes = [1, 128], strides = [1, 1]} : vector<17x1024xf32> to vector<1x128xf32>
    %132 = vector.extract_strided_slice %9 {offsets = [9, 512], sizes = [1, 128], strides = [1, 1]} : vector<17x1024xf32> to vector<1x128xf32>
    %133 = vector.extract_strided_slice %9 {offsets = [9, 640], sizes = [1, 128], strides = [1, 1]} : vector<17x1024xf32> to vector<1x128xf32>
    %134 = vector.extract_strided_slice %9 {offsets = [9, 768], sizes = [1, 128], strides = [1, 1]} : vector<17x1024xf32> to vector<1x128xf32>
    %135 = vector.extract_strided_slice %9 {offsets = [9, 896], sizes = [1, 128], strides = [1, 1]} : vector<17x1024xf32> to vector<1x128xf32>
    %136 = tpu.concatenate %128, %129, %130, %131, %132, %133, %134, %135 in 0 : vector<1x128xf32>, vector<1x128xf32>, vector<1x128xf32>, vector<1x128xf32>, vector<1x128xf32>, vector<1x128xf32>, vector<1x128xf32>, vector<1x128xf32> -> vector<8x128xf32>
    %137 = arith.mulf %136, %136 : vector<8x128xf32>
    %c1152 = arith.constant 1152 : index
    %c0_28 = arith.constant 0 : index
    %138 = vector.load %arg5[%c1152, %c0_28] : memref<2176x256xf32, #tpu.memory_space<vmem>>, vector<128x256xf32>
    %cst_29 = arith.constant dense<0.000000e+00> : vector<8x256xf32>
    %139 = tpu.matmul %137, %138, %cst_29 {dimension_numbers = #tpu.dot_dimension_numbers<[1], [0], [0], [1], [0, 0, 1, 1], [], []>} : vector<8x128xf32>, vector<128x256xf32>, vector<8x256xf32> -> vector<8x256xf32>
    %140 = arith.addf %127, %139 : vector<8x256xf32>
    %141 = vector.extract_strided_slice %9 {offsets = [10, 0], sizes = [1, 128], strides = [1, 1]} : vector<17x1024xf32> to vector<1x128xf32>
    %142 = vector.extract_strided_slice %9 {offsets = [10, 128], sizes = [1, 128], strides = [1, 1]} : vector<17x1024xf32> to vector<1x128xf32>
    %143 = vector.extract_strided_slice %9 {offsets = [10, 256], sizes = [1, 128], strides = [1, 1]} : vector<17x1024xf32> to vector<1x128xf32>
    %144 = vector.extract_strided_slice %9 {offsets = [10, 384], sizes = [1, 128], strides = [1, 1]} : vector<17x1024xf32> to vector<1x128xf32>
    %145 = vector.extract_strided_slice %9 {offsets = [10, 512], sizes = [1, 128], strides = [1, 1]} : vector<17x1024xf32> to vector<1x128xf32>
    %146 = vector.extract_strided_slice %9 {offsets = [10, 640], sizes = [1, 128], strides = [1, 1]} : vector<17x1024xf32> to vector<1x128xf32>
    %147 = vector.extract_strided_slice %9 {offsets = [10, 768], sizes = [1, 128], strides = [1, 1]} : vector<17x1024xf32> to vector<1x128xf32>
    %148 = vector.extract_strided_slice %9 {offsets = [10, 896], sizes = [1, 128], strides = [1, 1]} : vector<17x1024xf32> to vector<1x128xf32>
    %149 = tpu.concatenate %141, %142, %143, %144, %145, %146, %147, %148 in 0 : vector<1x128xf32>, vector<1x128xf32>, vector<1x128xf32>, vector<1x128xf32>, vector<1x128xf32>, vector<1x128xf32>, vector<1x128xf32>, vector<1x128xf32> -> vector<8x128xf32>
    %150 = arith.mulf %149, %149 : vector<8x128xf32>
    %c1280 = arith.constant 1280 : index
    %c0_30 = arith.constant 0 : index
    %151 = vector.load %arg5[%c1280, %c0_30] : memref<2176x256xf32, #tpu.memory_space<vmem>>, vector<128x256xf32>
    %cst_31 = arith.constant dense<0.000000e+00> : vector<8x256xf32>
    %152 = tpu.matmul %150, %151, %cst_31 {dimension_numbers = #tpu.dot_dimension_numbers<[1], [0], [0], [1], [0, 0, 1, 1], [], []>} : vector<8x128xf32>, vector<128x256xf32>, vector<8x256xf32> -> vector<8x256xf32>
    %153 = arith.addf %140, %152 : vector<8x256xf32>
    %154 = vector.extract_strided_slice %9 {offsets = [11, 0], sizes = [1, 128], strides = [1, 1]} : vector<17x1024xf32> to vector<1x128xf32>
    %155 = vector.extract_strided_slice %9 {offsets = [11, 128], sizes = [1, 128], strides = [1, 1]} : vector<17x1024xf32> to vector<1x128xf32>
    %156 = vector.extract_strided_slice %9 {offsets = [11, 256], sizes = [1, 128], strides = [1, 1]} : vector<17x1024xf32> to vector<1x128xf32>
    %157 = vector.extract_strided_slice %9 {offsets = [11, 384], sizes = [1, 128], strides = [1, 1]} : vector<17x1024xf32> to vector<1x128xf32>
    %158 = vector.extract_strided_slice %9 {offsets = [11, 512], sizes = [1, 128], strides = [1, 1]} : vector<17x1024xf32> to vector<1x128xf32>
    %159 = vector.extract_strided_slice %9 {offsets = [11, 640], sizes = [1, 128], strides = [1, 1]} : vector<17x1024xf32> to vector<1x128xf32>
    %160 = vector.extract_strided_slice %9 {offsets = [11, 768], sizes = [1, 128], strides = [1, 1]} : vector<17x1024xf32> to vector<1x128xf32>
    %161 = vector.extract_strided_slice %9 {offsets = [11, 896], sizes = [1, 128], strides = [1, 1]} : vector<17x1024xf32> to vector<1x128xf32>
    %162 = tpu.concatenate %154, %155, %156, %157, %158, %159, %160, %161 in 0 : vector<1x128xf32>, vector<1x128xf32>, vector<1x128xf32>, vector<1x128xf32>, vector<1x128xf32>, vector<1x128xf32>, vector<1x128xf32>, vector<1x128xf32> -> vector<8x128xf32>
    %163 = arith.mulf %162, %162 : vector<8x128xf32>
    %c1408 = arith.constant 1408 : index
    %c0_32 = arith.constant 0 : index
    %164 = vector.load %arg5[%c1408, %c0_32] : memref<2176x256xf32, #tpu.memory_space<vmem>>, vector<128x256xf32>
    %cst_33 = arith.constant dense<0.000000e+00> : vector<8x256xf32>
    %165 = tpu.matmul %163, %164, %cst_33 {dimension_numbers = #tpu.dot_dimension_numbers<[1], [0], [0], [1], [0, 0, 1, 1], [], []>} : vector<8x128xf32>, vector<128x256xf32>, vector<8x256xf32> -> vector<8x256xf32>
    %166 = arith.addf %153, %165 : vector<8x256xf32>
    %167 = vector.extract_strided_slice %9 {offsets = [12, 0], sizes = [1, 128], strides = [1, 1]} : vector<17x1024xf32> to vector<1x128xf32>
    %168 = vector.extract_strided_slice %9 {offsets = [12, 128], sizes = [1, 128], strides = [1, 1]} : vector<17x1024xf32> to vector<1x128xf32>
    %169 = vector.extract_strided_slice %9 {offsets = [12, 256], sizes = [1, 128], strides = [1, 1]} : vector<17x1024xf32> to vector<1x128xf32>
    %170 = vector.extract_strided_slice %9 {offsets = [12, 384], sizes = [1, 128], strides = [1, 1]} : vector<17x1024xf32> to vector<1x128xf32>
    %171 = vector.extract_strided_slice %9 {offsets = [12, 512], sizes = [1, 128], strides = [1, 1]} : vector<17x1024xf32> to vector<1x128xf32>
    %172 = vector.extract_strided_slice %9 {offsets = [12, 640], sizes = [1, 128], strides = [1, 1]} : vector<17x1024xf32> to vector<1x128xf32>
    %173 = vector.extract_strided_slice %9 {offsets = [12, 768], sizes = [1, 128], strides = [1, 1]} : vector<17x1024xf32> to vector<1x128xf32>
    %174 = vector.extract_strided_slice %9 {offsets = [12, 896], sizes = [1, 128], strides = [1, 1]} : vector<17x1024xf32> to vector<1x128xf32>
    %175 = tpu.concatenate %167, %168, %169, %170, %171, %172, %173, %174 in 0 : vector<1x128xf32>, vector<1x128xf32>, vector<1x128xf32>, vector<1x128xf32>, vector<1x128xf32>, vector<1x128xf32>, vector<1x128xf32>, vector<1x128xf32> -> vector<8x128xf32>
    %176 = arith.mulf %175, %175 : vector<8x128xf32>
    %c1536 = arith.constant 1536 : index
    %c0_34 = arith.constant 0 : index
    %177 = vector.load %arg5[%c1536, %c0_34] : memref<2176x256xf32, #tpu.memory_space<vmem>>, vector<128x256xf32>
    %cst_35 = arith.constant dense<0.000000e+00> : vector<8x256xf32>
    %178 = tpu.matmul %176, %177, %cst_35 {dimension_numbers = #tpu.dot_dimension_numbers<[1], [0], [0], [1], [0, 0, 1, 1], [], []>} : vector<8x128xf32>, vector<128x256xf32>, vector<8x256xf32> -> vector<8x256xf32>
    %179 = arith.addf %166, %178 : vector<8x256xf32>
    %180 = vector.extract_strided_slice %9 {offsets = [13, 0], sizes = [1, 128], strides = [1, 1]} : vector<17x1024xf32> to vector<1x128xf32>
    %181 = vector.extract_strided_slice %9 {offsets = [13, 128], sizes = [1, 128], strides = [1, 1]} : vector<17x1024xf32> to vector<1x128xf32>
    %182 = vector.extract_strided_slice %9 {offsets = [13, 256], sizes = [1, 128], strides = [1, 1]} : vector<17x1024xf32> to vector<1x128xf32>
    %183 = vector.extract_strided_slice %9 {offsets = [13, 384], sizes = [1, 128], strides = [1, 1]} : vector<17x1024xf32> to vector<1x128xf32>
    %184 = vector.extract_strided_slice %9 {offsets = [13, 512], sizes = [1, 128], strides = [1, 1]} : vector<17x1024xf32> to vector<1x128xf32>
    %185 = vector.extract_strided_slice %9 {offsets = [13, 640], sizes = [1, 128], strides = [1, 1]} : vector<17x1024xf32> to vector<1x128xf32>
    %186 = vector.extract_strided_slice %9 {offsets = [13, 768], sizes = [1, 128], strides = [1, 1]} : vector<17x1024xf32> to vector<1x128xf32>
    %187 = vector.extract_strided_slice %9 {offsets = [13, 896], sizes = [1, 128], strides = [1, 1]} : vector<17x1024xf32> to vector<1x128xf32>
    %188 = tpu.concatenate %180, %181, %182, %183, %184, %185, %186, %187 in 0 : vector<1x128xf32>, vector<1x128xf32>, vector<1x128xf32>, vector<1x128xf32>, vector<1x128xf32>, vector<1x128xf32>, vector<1x128xf32>, vector<1x128xf32> -> vector<8x128xf32>
    %189 = arith.mulf %188, %188 : vector<8x128xf32>
    %c1664 = arith.constant 1664 : index
    %c0_36 = arith.constant 0 : index
    %190 = vector.load %arg5[%c1664, %c0_36] : memref<2176x256xf32, #tpu.memory_space<vmem>>, vector<128x256xf32>
    %cst_37 = arith.constant dense<0.000000e+00> : vector<8x256xf32>
    %191 = tpu.matmul %189, %190, %cst_37 {dimension_numbers = #tpu.dot_dimension_numbers<[1], [0], [0], [1], [0, 0, 1, 1], [], []>} : vector<8x128xf32>, vector<128x256xf32>, vector<8x256xf32> -> vector<8x256xf32>
    %192 = arith.addf %179, %191 : vector<8x256xf32>
    %193 = vector.extract_strided_slice %9 {offsets = [14, 0], sizes = [1, 128], strides = [1, 1]} : vector<17x1024xf32> to vector<1x128xf32>
    %194 = vector.extract_strided_slice %9 {offsets = [14, 128], sizes = [1, 128], strides = [1, 1]} : vector<17x1024xf32> to vector<1x128xf32>
    %195 = vector.extract_strided_slice %9 {offsets = [14, 256], sizes = [1, 128], strides = [1, 1]} : vector<17x1024xf32> to vector<1x128xf32>
    %196 = vector.extract_strided_slice %9 {offsets = [14, 384], sizes = [1, 128], strides = [1, 1]} : vector<17x1024xf32> to vector<1x128xf32>
    %197 = vector.extract_strided_slice %9 {offsets = [14, 512], sizes = [1, 128], strides = [1, 1]} : vector<17x1024xf32> to vector<1x128xf32>
    %198 = vector.extract_strided_slice %9 {offsets = [14, 640], sizes = [1, 128], strides = [1, 1]} : vector<17x1024xf32> to vector<1x128xf32>
    %199 = vector.extract_strided_slice %9 {offsets = [14, 768], sizes = [1, 128], strides = [1, 1]} : vector<17x1024xf32> to vector<1x128xf32>
    %200 = vector.extract_strided_slice %9 {offsets = [14, 896], sizes = [1, 128], strides = [1, 1]} : vector<17x1024xf32> to vector<1x128xf32>
    %201 = tpu.concatenate %193, %194, %195, %196, %197, %198, %199, %200 in 0 : vector<1x128xf32>, vector<1x128xf32>, vector<1x128xf32>, vector<1x128xf32>, vector<1x128xf32>, vector<1x128xf32>, vector<1x128xf32>, vector<1x128xf32> -> vector<8x128xf32>
    %202 = arith.mulf %201, %201 : vector<8x128xf32>
    %c1792 = arith.constant 1792 : index
    %c0_38 = arith.constant 0 : index
    %203 = vector.load %arg5[%c1792, %c0_38] : memref<2176x256xf32, #tpu.memory_space<vmem>>, vector<128x256xf32>
    %cst_39 = arith.constant dense<0.000000e+00> : vector<8x256xf32>
    %204 = tpu.matmul %202, %203, %cst_39 {dimension_numbers = #tpu.dot_dimension_numbers<[1], [0], [0], [1], [0, 0, 1, 1], [], []>} : vector<8x128xf32>, vector<128x256xf32>, vector<8x256xf32> -> vector<8x256xf32>
    %205 = arith.addf %192, %204 : vector<8x256xf32>
    %206 = vector.extract_strided_slice %9 {offsets = [15, 0], sizes = [1, 128], strides = [1, 1]} : vector<17x1024xf32> to vector<1x128xf32>
    %207 = vector.extract_strided_slice %9 {offsets = [15, 128], sizes = [1, 128], strides = [1, 1]} : vector<17x1024xf32> to vector<1x128xf32>
    %208 = vector.extract_strided_slice %9 {offsets = [15, 256], sizes = [1, 128], strides = [1, 1]} : vector<17x1024xf32> to vector<1x128xf32>
    %209 = vector.extract_strided_slice %9 {offsets = [15, 384], sizes = [1, 128], strides = [1, 1]} : vector<17x1024xf32> to vector<1x128xf32>
    %210 = vector.extract_strided_slice %9 {offsets = [15, 512], sizes = [1, 128], strides = [1, 1]} : vector<17x1024xf32> to vector<1x128xf32>
    %211 = vector.extract_strided_slice %9 {offsets = [15, 640], sizes = [1, 128], strides = [1, 1]} : vector<17x1024xf32> to vector<1x128xf32>
    %212 = vector.extract_strided_slice %9 {offsets = [15, 768], sizes = [1, 128], strides = [1, 1]} : vector<17x1024xf32> to vector<1x128xf32>
    %213 = vector.extract_strided_slice %9 {offsets = [15, 896], sizes = [1, 128], strides = [1, 1]} : vector<17x1024xf32> to vector<1x128xf32>
    %214 = tpu.concatenate %206, %207, %208, %209, %210, %211, %212, %213 in 0 : vector<1x128xf32>, vector<1x128xf32>, vector<1x128xf32>, vector<1x128xf32>, vector<1x128xf32>, vector<1x128xf32>, vector<1x128xf32>, vector<1x128xf32> -> vector<8x128xf32>
    %215 = arith.mulf %214, %214 : vector<8x128xf32>
    %c1920 = arith.constant 1920 : index
    %c0_40 = arith.constant 0 : index
    %216 = vector.load %arg5[%c1920, %c0_40] : memref<2176x256xf32, #tpu.memory_space<vmem>>, vector<128x256xf32>
    %cst_41 = arith.constant dense<0.000000e+00> : vector<8x256xf32>
    %217 = tpu.matmul %215, %216, %cst_41 {dimension_numbers = #tpu.dot_dimension_numbers<[1], [0], [0], [1], [0, 0, 1, 1], [], []>} : vector<8x128xf32>, vector<128x256xf32>, vector<8x256xf32> -> vector<8x256xf32>
    %218 = arith.addf %205, %217 : vector<8x256xf32>
    %219 = vector.extract_strided_slice %9 {offsets = [16, 0], sizes = [1, 128], strides = [1, 1]} : vector<17x1024xf32> to vector<1x128xf32>
    %220 = vector.extract_strided_slice %9 {offsets = [16, 128], sizes = [1, 128], strides = [1, 1]} : vector<17x1024xf32> to vector<1x128xf32>
    %221 = vector.extract_strided_slice %9 {offsets = [16, 256], sizes = [1, 128], strides = [1, 1]} : vector<17x1024xf32> to vector<1x128xf32>
    %222 = vector.extract_strided_slice %9 {offsets = [16, 384], sizes = [1, 128], strides = [1, 1]} : vector<17x1024xf32> to vector<1x128xf32>
    %223 = vector.extract_strided_slice %9 {offsets = [16, 512], sizes = [1, 128], strides = [1, 1]} : vector<17x1024xf32> to vector<1x128xf32>
    %224 = vector.extract_strided_slice %9 {offsets = [16, 640], sizes = [1, 128], strides = [1, 1]} : vector<17x1024xf32> to vector<1x128xf32>
    %225 = vector.extract_strided_slice %9 {offsets = [16, 768], sizes = [1, 128], strides = [1, 1]} : vector<17x1024xf32> to vector<1x128xf32>
    %226 = vector.extract_strided_slice %9 {offsets = [16, 896], sizes = [1, 128], strides = [1, 1]} : vector<17x1024xf32> to vector<1x128xf32>
    %227 = tpu.concatenate %219, %220, %221, %222, %223, %224, %225, %226 in 0 : vector<1x128xf32>, vector<1x128xf32>, vector<1x128xf32>, vector<1x128xf32>, vector<1x128xf32>, vector<1x128xf32>, vector<1x128xf32>, vector<1x128xf32> -> vector<8x128xf32>
    %228 = arith.mulf %227, %227 : vector<8x128xf32>
    %c2048 = arith.constant 2048 : index
    %c0_42 = arith.constant 0 : index
    %229 = vector.load %arg5[%c2048, %c0_42] : memref<2176x256xf32, #tpu.memory_space<vmem>>, vector<128x256xf32>
    %cst_43 = arith.constant dense<0.000000e+00> : vector<8x256xf32>
    %230 = tpu.matmul %228, %229, %cst_43 {dimension_numbers = #tpu.dot_dimension_numbers<[1], [0], [0], [1], [0, 0, 1, 1], [], []>} : vector<8x128xf32>, vector<128x256xf32>, vector<8x256xf32> -> vector<8x256xf32>
    %231 = arith.addf %218, %230 : vector<8x256xf32>
    %cst_44 = arith.constant 9.99999997E-7 : f32
    %232 = vector.broadcast %cst_44 : f32 to vector<8x256xf32>
    %233 = arith.addf %231, %232 : vector<8x256xf32>
    %234 = math.log %233 : vector<8x256xf32>
    %c0_45 = arith.constant 0 : index
    %c0_46 = arith.constant 0 : index
    %235 = vector.load %arg6[%c0_45, %c0_46] : memref<8x256xf32, #tpu.memory_space<vmem>>, vector<8x256xf32>
    tpu.vector_store %arg6[%c0_45, %c0_46], %234 {strides = array<i32>} : memref<8x256xf32, #tpu.memory_space<vmem>>, vector<8x256xf32>,
    return
  }
  func.func @transform_0(%arg0: i32) -> (i32, i32) {
    %c0_i32 = arith.constant 0 : i32
    %c0_i32_0 = arith.constant 0 : i32
    return %arg0, %c0_i32 : i32, i32
  }
  func.func @transform_1(%arg0: i32) -> (i32, i32) {
    %c1_i32 = arith.constant 1 : i32
    %0 = arith.addi %arg0, %c1_i32 : i32
    %c0_i32 = arith.constant 0 : i32
    %c0_i32_0 = arith.constant 0 : i32
    return %0, %c0_i32 : i32, i32
  }
  func.func @transform_2(%arg0: i32) -> (i32, i32) {
    %c0_i32 = arith.constant 0 : i32
    %c0_i32_0 = arith.constant 0 : i32
    %c0_i32_1 = arith.constant 0 : i32
    return %c0_i32, %c0_i32_0 : i32, i32
  }
  func.func @transform_3(%arg0: i32) -> (i32, i32) {
    %c0_i32 = arith.constant 0 : i32
    %c0_i32_0 = arith.constant 0 : i32
    %c0_i32_1 = arith.constant 0 : i32
    return %c0_i32, %c0_i32_0 : i32, i32
  }
  func.func @transform_4(%arg0: i32) -> (i32, i32) {
    %c0_i32 = arith.constant 0 : i32
    %c0_i32_0 = arith.constant 0 : i32
    %c0_i32_1 = arith.constant 0 : i32
    return %c0_i32, %c0_i32_0 : i32, i32
  }
  func.func @transform_5(%arg0: i32) -> (i32, i32) {
    %c0_i32 = arith.constant 0 : i32
    %c0_i32_0 = arith.constant 0 : i32
    return %c0_i32, %arg0 : i32, i32
  }
}

</mosaic_0001>

<bundles_post_ra>
// kernel: tpu_custom_call.1
= control target key start
LH: loop header
LB: loop body
LE: loop exit
PB: predicated region body
PF: predicated region fallthrough
CT: control target
= control target key end

     0   :  { %10 = vsyncpa [#allocation3], 0  ;;  %s3232_s0 = inlined_call_operand.hbm [shape: f32[32,128], index: 0, kind: input, shape index: {}]   ;;  %s3233_s1 = inlined_call_operand.hbm [shape: f32[32,128], index: 1, kind: input, shape index: {}]   ;;  %s3234_s2 = inlined_call_operand.hbm [shape: f32[128,1024], index: 2, kind: input, shape index: {}]   ;;  %s3235_s3 = inlined_call_operand.hbm [shape: f32[128,1024], index: 3, kind: input, shape index: {}]   ;;  %s3236_s4 = inlined_call_operand.hbm [shape: f32[2176,256], index: 4, kind: input, shape index: {}]   ;;  %s3237_s5 = inlined_call_operand.hbm [shape: f32[8,256], index: 5, kind: output, shape index: {}]  }
   0x1   :  { %11 = vsyncpa [#allocation6], 0 }
   0x2   :  { %12 = vsyncpa [#allocation9], 0 }
   0x3   :  { %13 = vsyncpa [#allocation4], 0  ;;  %s2476_s20 = scalar_lea.hbm %s3233_s1, 16  ;;  %s2645_s22 = smov [#allocation5]  }
   0x4   :  { %s35_s21 = sshll.u32 %s2476_s20, 4  ;;  %s37_s23 = sshll.u32 %s2645_s22, 4  ;;  %s36_s21 = int_to_ptr.hbm [resolvable:$true] %s35_s21  ;;  %s38_s23 = int_to_ptr.vmem [resolvable:$true] %s37_s23 }
   0x5   :  { %s2646_s24 = smov 128   ;;  %s2647_s25 = smov 8  }
   0x6   :  { %43 = dma.hbm_to_vmem [thread:$0]  %s36_s21, 256, %s38_s23, [#allocation6], %s2646_s24, %s2646_s24, %s2647_s25  }
   0x7   :  { %s61_s28 = sshll.u32 %s3235_s3, 4  ;;  %s2648_s29 = smov [#allocation8]   ;;  %s62_s28 = int_to_ptr.hbm [resolvable:$true] %s61_s28 }
   0x8   :  { %s63_s30 = sshll.u32 %s2648_s29, 4  ;;  %s18_s1 = sshll.u32 %s3232_s0, 4  ;;  %s64_s30 = int_to_ptr.vmem [resolvable:$true] %s63_s30  ;;  %s19_s1 = int_to_ptr.hbm [resolvable:$true] %s18_s1 }
   0x9   :  { %s2649_s8 = smov 1024   ;;  %s2650_s9 = smov 64  }
   0xa   :  { %69 = dma.hbm_to_vmem [thread:$0]  %s62_s28, 16384, %s64_s30, [#allocation9], %s2649_s8, %s2649_s8, %s2650_s9  }
   0xb   :  { %s2651_s10 = smov [#allocation2]   ;;  %s48_s14 = sshll.u32 %s3234_s2, 4  ;;  %s49_s14 = int_to_ptr.hbm [resolvable:$true] %s48_s14 }
   0xc   :  { %s20_s11 = sshll.u32 %s2651_s10, 4  ;;  %s74_s16 = sshll.u32 %s3236_s4, 4  ;;  %s21_s11 = int_to_ptr.vmem [resolvable:$true] %s20_s11  ;;  %s75_s16 = int_to_ptr.hbm [resolvable:$true] %s74_s16 }
   0xd   :  { %26 = dma.hbm_to_vmem [thread:$0]  %s19_s1, 256, %s21_s11, [#allocation3], %s2646_s24, %s2646_s24, %s2647_s25  }
   0xe   :  { %s2652_s17 = smov [#allocation7]   ;;  %s2653_s0 = smov [#allocation10]  }
   0xf   :  { %s50_s18 = sshll.u32 %s2652_s17, 4  ;;  %s76_s19 = sshll.u32 %s2653_s0, 4  ;;  %s51_s18 = int_to_ptr.vmem [resolvable:$true] %s50_s18  ;;  %s77_s19 = int_to_ptr.vmem [resolvable:$true] %s76_s19 }
  0x10   :  { %56 = dma.hbm_to_vmem [thread:$0]  %s49_s14, 16384, %s51_s18, [#allocation6], %s2649_s8, %s2649_s8, %s2650_s9  }
  0x11   :  { %s2654_s20 = smov 256   ;;  %s2655_s21 = smov 16  }
  0x12   :  { %82 = dma.hbm_to_vmem [thread:$0]  %s75_s16, 69632, %s77_s19, [#allocation9], %s2654_s20, %s2654_s20, %s2655_s21  }
  0x13   :  { %2637 = dma.done.wait [#allocation3], 256  }
  0x14   :  { %2638 = vsyncadd [#allocation3], 4294967040 }
  0x15   :  { %2639 = dma.done.wait [#allocation6], 16640  }
  0x16   :  { %2640 = vsyncadd [#allocation6], 4294950656 }
  0x17   :  { %2641 = dma.done.wait [#allocation9], 86016  }
  0x18   :  { %2642 = vsyncadd [#allocation9], 4294881280  ;;  %v356_v0 = vld [vmem:[#allocation8 + $0x3c0] sm:$0xff]  ;;  %v357_v1 = vld [vmem:[#allocation8 + $0x3c8] sm:$0xff]  ;;  %vm367_vm0 = vcmask 1046528   ;;  %vm813_vm1 = vcmask 1040384  }
  0x19   :  { %v358_v2 = vld [vmem:[#allocation8 + $0x3d0] sm:$0xff]  ;;  %376 = vmatpush.msra.mxu0 %v356_v0  ;;  %402 = vmatpush.msra.mxu1 %v357_v1  ;;  %v359_v3 = vld [vmem:[#allocation8 + $0x3d8] sm:$0xff]  ;;  %v348_v4 = vld [vmem:[#allocation8 + $0x380] sm:$0xff]  ;;  %vm815_vm2 = vcmask 1041408   ;;  %vm817_vm3 = vcmask 1042432   ;;  %vm819_vm4 = vcmask 1043456  }
  0x1a   :  { %v349_v5 = vld [vmem:[#allocation8 + $0x388] sm:$0xff]  ;;  %428 = vmatpush.msra.mxu2 %v358_v2  ;;  %454 = vmatpush.msra.mxu3 %v359_v3  ;;  %v350_v6 = vld [vmem:[#allocation8 + $0x390] sm:$0xff]  ;;  %v351_v7 = vld [vmem:[#allocation8 + $0x398] sm:$0xff]  ;;  %vm821_vm5 = vcmask 1044480   ;;  %vm823_vm6 = vcmask 1045504   ;;  %s2656_s2 = smov [#allocation11]  }
  0x1b   :  { %v340_v8 = vld [vmem:[#allocation8 + $0x340] sm:$0xff]  ;;  %377 = vmatpush.msra.mxu0 %v348_v4  ;;  %403 = vmatpush.msra.mxu1 %v349_v5  ;;  %v341_v9 = vld [vmem:[#allocation8 + $0x348] sm:$0xff]  ;;  %v342_v10 = vld [vmem:[#allocation8 + $0x350] sm:$0xff]  ;;  %s2462_s4 = sshll.u32 %s2656_s2, 4  ;;  %s2464_s24 = sshll.u32 %s3237_s5, 4  ;;  %s2463_s4 = int_to_ptr.vmem [resolvable:$true] %s2462_s4  ;;  %s2465_s24 = int_to_ptr.hbm [resolvable:$true] %s2464_s24 }
  0x1c   :  { %v343_v11 = vld [vmem:[#allocation8 + $0x358] sm:$0xff]  ;;  %429 = vmatpush.msra.mxu2 %v350_v6  ;;  %455 = vmatpush.msra.mxu3 %v351_v7  ;;  %v332_v12 = vld [vmem:[#allocation8 + $0x300] sm:$0xff]  ;;  %v333_v13 = vld [vmem:[#allocation8 + $0x308] sm:$0xff] }
  0x1d   :  { %378 = vmatpush.msra.mxu0 %v340_v8  ;;  %404 = vmatpush.msra.mxu1 %v341_v9  ;;  %v334_v14 = vld [vmem:[#allocation8 + $0x310] sm:$0xff]  ;;  %v335_v15 = vld [vmem:[#allocation8 + $0x318] sm:$0xff]  ;;  %v324_v16 = vld [vmem:[#allocation8 + $0x2c0] sm:$0xff] }
  0x1e   :  { %430 = vmatpush.msra.mxu2 %v342_v10  ;;  %456 = vmatpush.msra.mxu3 %v343_v11  ;;  %v325_v17 = vld [vmem:[#allocation8 + $0x2c8] sm:$0xff]  ;;  %v326_v18 = vld [vmem:[#allocation8 + $0x2d0] sm:$0xff]  ;;  %v327_v19 = vld [vmem:[#allocation8 + $0x2d8] sm:$0xff] }
  0x1f   :  { %379 = vmatpush.msra.mxu0 %v332_v12  ;;  %405 = vmatpush.msra.mxu1 %v333_v13  ;;  %v316_v20 = vld [vmem:[#allocation8 + $0x280] sm:$0xff]  ;;  %v317_v21 = vld [vmem:[#allocation8 + $0x288] sm:$0xff]  ;;  %v318_v22 = vld [vmem:[#allocation8 + $0x290] sm:$0xff] }
  0x20   :  { %431 = vmatpush.msra.mxu2 %v334_v14  ;;  %457 = vmatpush.msra.mxu3 %v335_v15  ;;  %v319_v23 = vld [vmem:[#allocation8 + $0x298] sm:$0xff]  ;;  %v308_v24 = vld [vmem:[#allocation8 + $0x240] sm:$0xff]  ;;  %v309_v25 = vld [vmem:[#allocation8 + $0x248] sm:$0xff] }
  0x21   :  { %380 = vmatpush.msra.mxu0 %v324_v16  ;;  %406 = vmatpush.msra.mxu1 %v325_v17  ;;  %v310_v26 = vld [vmem:[#allocation8 + $0x250] sm:$0xff]  ;;  %v311_v27 = vld [vmem:[#allocation8 + $0x258] sm:$0xff]  ;;  %v300_v28 = vld [vmem:[#allocation8 + $0x200] sm:$0xff] }
  0x22   :  { %432 = vmatpush.msra.mxu2 %v326_v18  ;;  %458 = vmatpush.msra.mxu3 %v327_v19  ;;  %v301_v29 = vld [vmem:[#allocation8 + $0x208] sm:$0xff]  ;;  %v302_v30 = vld [vmem:[#allocation8 + $0x210] sm:$0xff]  ;;  %v303_v31 = vld [vmem:[#allocation8 + $0x218] sm:$0xff] }
  0x23   :  { %381 = vmatpush.msra.mxu0 %v316_v20  ;;  %407 = vmatpush.msra.mxu1 %v317_v21  ;;  %v292_v32 = vld [vmem:[#allocation8 + $0x1c0] sm:$0xff]  ;;  %v293_v33 = vld [vmem:[#allocation8 + $0x1c8] sm:$0xff]  ;;  %v294_v34 = vld [vmem:[#allocation8 + $0x1d0] sm:$0xff] }
  0x24   :  { %433 = vmatpush.msra.mxu2 %v318_v22  ;;  %459 = vmatpush.msra.mxu3 %v319_v23  ;;  %v295_v35 = vld [vmem:[#allocation8 + $0x1d8] sm:$0xff]  ;;  %v284_v36 = vld [vmem:[#allocation8 + $0x180] sm:$0xff]  ;;  %v285_v37 = vld [vmem:[#allocation8 + $0x188] sm:$0xff] }
  0x25   :  { %382 = vmatpush.msra.mxu0 %v308_v24  ;;  %408 = vmatpush.msra.mxu1 %v309_v25  ;;  %v286_v38 = vld [vmem:[#allocation8 + $0x190] sm:$0xff]  ;;  %v287_v39 = vld [vmem:[#allocation8 + $0x198] sm:$0xff]  ;;  %v276_v40 = vld [vmem:[#allocation8 + $0x140] sm:$0xff] }
  0x26   :  { %434 = vmatpush.msra.mxu2 %v310_v26  ;;  %460 = vmatpush.msra.mxu3 %v311_v27  ;;  %v277_v41 = vld [vmem:[#allocation8 + $0x148] sm:$0xff]  ;;  %v278_v42 = vld [vmem:[#allocation8 + $0x150] sm:$0xff]  ;;  %v279_v43 = vld [vmem:[#allocation8 + $0x158] sm:$0xff] }
  0x27   :  { %383 = vmatpush.msra.mxu0 %v300_v28  ;;  %409 = vmatpush.msra.mxu1 %v301_v29  ;;  %v268_v44 = vld [vmem:[#allocation8 + $0x100] sm:$0xff]  ;;  %v269_v45 = vld [vmem:[#allocation8 + $0x108] sm:$0xff]  ;;  %v270_v46 = vld [vmem:[#allocation8 + $0x110] sm:$0xff] }
  0x28   :  { %435 = vmatpush.msra.mxu2 %v302_v30  ;;  %461 = vmatpush.msra.mxu3 %v303_v31  ;;  %v271_v47 = vld [vmem:[#allocation8 + $0x118] sm:$0xff]  ;;  %v260_v48 = vld [vmem:[#allocation8 + $0xc0] sm:$0xff]  ;;  %v261_v49 = vld [vmem:[#allocation8 + $0xc8] sm:$0xff] }
  0x29   :  { %384 = vmatpush.msra.mxu0 %v292_v32  ;;  %410 = vmatpush.msra.mxu1 %v293_v33  ;;  %v262_v50 = vld [vmem:[#allocation8 + $0xd0] sm:$0xff]  ;;  %v263_v51 = vld [vmem:[#allocation8 + $0xd8] sm:$0xff]  ;;  %v252_v52 = vld [vmem:[#allocation8 + $0x80] sm:$0xff] }
  0x2a   :  { %436 = vmatpush.msra.mxu2 %v294_v34  ;;  %462 = vmatpush.msra.mxu3 %v295_v35  ;;  %v253_v53 = vld [vmem:[#allocation8 + $0x88] sm:$0xff]  ;;  %v254_v54 = vld [vmem:[#allocation8 + $0x90] sm:$0xff]  ;;  %v255_v55 = vld [vmem:[#allocation8 + $0x98] sm:$0xff] }
  0x2b   :  { %385 = vmatpush.msra.mxu0 %v284_v36  ;;  %411 = vmatpush.msra.mxu1 %v285_v37  ;;  %v244_v56 = vld [vmem:[#allocation8 + $0x40] sm:$0xff]  ;;  %v245_v57 = vld [vmem:[#allocation8 + $0x48] sm:$0xff]  ;;  %v246_v58 = vld [vmem:[#allocation8 + $0x50] sm:$0xff] }
  0x2c   :  { %437 = vmatpush.msra.mxu2 %v286_v38  ;;  %463 = vmatpush.msra.mxu3 %v287_v39  ;;  %v247_v59 = vld [vmem:[#allocation8 + $0x58] sm:$0xff]  ;;  %v236_v60 = vld [vmem:[#allocation8] sm:$0xff]  ;;  %v237_v61 = vld [vmem:[#allocation8 + $0x8] sm:$0xff] }
  0x2d   :  { %386 = vmatpush.msra.mxu0 %v276_v40  ;;  %412 = vmatpush.msra.mxu1 %v277_v41  ;;  %v238_v62 = vld [vmem:[#allocation8 + $0x10] sm:$0xff]  ;;  %v239_v63 = vld [vmem:[#allocation8 + $0x18] sm:$0xff]  ;;  %v360_v0 = vld [vmem:[#allocation8 + $0x3e0] sm:$0xff] }
  0x2e   :  { %438 = vmatpush.msra.mxu2 %v278_v42  ;;  %464 = vmatpush.msra.mxu3 %v279_v43  ;;  %v361_v1 = vld [vmem:[#allocation8 + $0x3e8] sm:$0xff]  ;;  %v362_v2 = vld [vmem:[#allocation8 + $0x3f0] sm:$0xff]  ;;  %v363_v3 = vld [vmem:[#allocation8 + $0x3f8] sm:$0xff] }
  0x2f   :  { %387 = vmatpush.msra.mxu0 %v268_v44  ;;  %413 = vmatpush.msra.mxu1 %v269_v45  ;;  %v352_v4 = vld [vmem:[#allocation8 + $0x3a0] sm:$0xff]  ;;  %v353_v5 = vld [vmem:[#allocation8 + $0x3a8] sm:$0xff]  ;;  %v354_v6 = vld [vmem:[#allocation8 + $0x3b0] sm:$0xff] }
  0x30   :  { %439 = vmatpush.msra.mxu2 %v270_v46  ;;  %465 = vmatpush.msra.mxu3 %v271_v47  ;;  %v355_v7 = vld [vmem:[#allocation8 + $0x3b8] sm:$0xff]  ;;  %v344_v8 = vld [vmem:[#allocation8 + $0x360] sm:$0xff]  ;;  %v345_v9 = vld [vmem:[#allocation8 + $0x368] sm:$0xff] }
  0x31   :  { %388 = vmatpush.msra.mxu0 %v260_v48  ;;  %414 = vmatpush.msra.mxu1 %v261_v49  ;;  %v346_v10 = vld [vmem:[#allocation8 + $0x370] sm:$0xff]  ;;  %v347_v11 = vld [vmem:[#allocation8 + $0x378] sm:$0xff]  ;;  %v336_v12 = vld [vmem:[#allocation8 + $0x320] sm:$0xff] }
  0x32   :  { %440 = vmatpush.msra.mxu2 %v262_v50  ;;  %466 = vmatpush.msra.mxu3 %v263_v51  ;;  %v337_v13 = vld [vmem:[#allocation8 + $0x328] sm:$0xff]  ;;  %v338_v14 = vld [vmem:[#allocation8 + $0x330] sm:$0xff]  ;;  %v339_v15 = vld [vmem:[#allocation8 + $0x338] sm:$0xff] }
  0x33   :  { %389 = vmatpush.msra.mxu0 %v252_v52  ;;  %415 = vmatpush.msra.mxu1 %v253_v53  ;;  %v2702_v16 = vld [vmem:[#allocation2] sm:$0xff]  ;;  %v2704_v17 = vld [vmem:[#allocation2 + $0x8] sm:$0xff]  ;;  %v330_v20 = vld [vmem:[#allocation8 + $0x2f0] sm:$0xff] }
  0x34   :  { %441 = vmatpush.msra.mxu2 %v254_v54  ;;  %467 = vmatpush.msra.mxu3 %v255_v55  ;;  %v328_v18 = vld [vmem:[#allocation8 + $0x2e0] sm:$0xff]  ;;  %v329_v19 = vld [vmem:[#allocation8 + $0x2e8] sm:$0xff]  ;;  %v331_v21 = vld [vmem:[#allocation8 + $0x2f8] sm:$0xff]  ;;  %v368_v24 = vrot.slane %v2702_v16, 1  ;;  %v369_v25 = vrot.slane %v2704_v17, 1 }
  0x35   :  { %390 = vmatpush.msra.mxu0 %v244_v56  ;;  %416 = vmatpush.msra.mxu1 %v245_v57  ;;  %v320_v22 = vld [vmem:[#allocation8 + $0x2a0] sm:$0xff]  ;;  %v321_v23 = vld [vmem:[#allocation8 + $0x2a8] sm:$0xff]  ;;  %v322_v26 = vld [vmem:[#allocation8 + $0x2b0] sm:$0xff] }
  0x36   :  { %442 = vmatpush.msra.mxu2 %v246_v58  ;;  %468 = vmatpush.msra.mxu3 %v247_v59  ;;  %v323_v27 = vld [vmem:[#allocation8 + $0x2b8] sm:$0xff]  ;;  %v312_v28 = vld [vmem:[#allocation8 + $0x260] sm:$0xff]  ;;  %v313_v29 = vld [vmem:[#allocation8 + $0x268] sm:$0xff]  ;;  %v2709_v32 = vsel %vm367_vm0, %v368_v24, %v369_v25 }
  0x37   :  { %391 = vmatpush.msra.mxu0 %v236_v60  ;;  %417 = vmatpush.msra.mxu1 %v237_v61  ;;  %v314_v30 = vld [vmem:[#allocation8 + $0x270] sm:$0xff]  ;;  %v315_v31 = vld [vmem:[#allocation8 + $0x278] sm:$0xff]  ;;  %v304_v33 = vld [vmem:[#allocation8 + $0x220] sm:$0xff] }
  0x38   :  { %443 = vmatpush.msra.mxu2 %v238_v62  ;;  %469 = vmatpush.msra.mxu3 %v239_v63  ;;  %v305_v34 = vld [vmem:[#allocation8 + $0x228] sm:$0xff]  ;;  %v306_v35 = vld [vmem:[#allocation8 + $0x230] sm:$0xff]  ;;  %v307_v36 = vld [vmem:[#allocation8 + $0x238] sm:$0xff] }
  0x39   :  { %480 = vmatpush.msrb.mxu0 %v360_v0  ;;  %506 = vmatpush.msrb.mxu1 %v361_v1  ;;  %v2713_v37 = vld [vmem:[#allocation5] sm:$0xff]  ;;  %v296_v38 = vld [vmem:[#allocation8 + $0x1e0] sm:$0xff]  ;;  %v297_v39 = vld [vmem:[#allocation8 + $0x1e8] sm:$0xff] }
  0x3a   :  { %532 = vmatpush.msrb.mxu2 %v362_v2  ;;  %558 = vmatpush.msrb.mxu3 %v363_v3  ;;  %v298_v40 = vld [vmem:[#allocation8 + $0x1f0] sm:$0xff]  ;;  %v299_v41 = vld [vmem:[#allocation8 + $0x1f8] sm:$0xff]  ;;  %v288_v42 = vld [vmem:[#allocation8 + $0x1a0] sm:$0xff]  ;;  %v2718_v44 = vrot.slane %v2713_v37, 1 }
  0x3b   :  { %481 = vmatpush.msrb.mxu0 %v352_v4  ;;  %507 = vmatpush.msrb.mxu1 %v353_v5  ;;  %v289_v43 = vld [vmem:[#allocation8 + $0x1a8] sm:$0xff]  ;;  %v290_v45 = vld [vmem:[#allocation8 + $0x1b0] sm:$0xff]  ;;  %v291_v46 = vld [vmem:[#allocation8 + $0x1b8] sm:$0xff] }
  0x3c   :  { %533 = vmatpush.msrb.mxu2 %v354_v6  ;;  %559 = vmatpush.msrb.mxu3 %v355_v7  ;;  %v280_v47 = vld [vmem:[#allocation8 + $0x160] sm:$0xff]  ;;  %v281_v48 = vld [vmem:[#allocation8 + $0x168] sm:$0xff]  ;;  %v282_v49 = vld [vmem:[#allocation8 + $0x170] sm:$0xff]  ;;  %v2722_v51 = vsel %vm367_vm0, %v369_v25, %v2718_v44 }
  0x3d   :  { %482 = vmatpush.msrb.mxu0 %v344_v8  ;;  %508 = vmatpush.msrb.mxu1 %v345_v9  ;;  %v283_v50 = vld [vmem:[#allocation8 + $0x178] sm:$0xff]  ;;  %v272_v52 = vld [vmem:[#allocation8 + $0x120] sm:$0xff]  ;;  %v273_v53 = vld [vmem:[#allocation8 + $0x128] sm:$0xff] }
  0x3e   :  { %534 = vmatpush.msrb.mxu2 %v346_v10  ;;  %560 = vmatpush.msrb.mxu3 %v347_v11  ;;  %v274_v54 = vld [vmem:[#allocation8 + $0x130] sm:$0xff]  ;;  %v275_v55 = vld [vmem:[#allocation8 + $0x138] sm:$0xff]  ;;  %v264_v56 = vld [vmem:[#allocation8 + $0xe0] sm:$0xff] }
  0x3f   :  { %483 = vmatpush.msrb.mxu0 %v336_v12  ;;  %509 = vmatpush.msrb.mxu1 %v337_v13  ;;  %v265_v57 = vld [vmem:[#allocation8 + $0xe8] sm:$0xff]  ;;  %v266_v58 = vld [vmem:[#allocation8 + $0xf0] sm:$0xff]  ;;  %v267_v59 = vld [vmem:[#allocation8 + $0xf8] sm:$0xff] }
  0x40   :  { %535 = vmatpush.msrb.mxu2 %v338_v14  ;;  %561 = vmatpush.msrb.mxu3 %v339_v15  ;;  %v256_v60 = vld [vmem:[#allocation8 + $0xa0] sm:$0xff]  ;;  %v257_v61 = vld [vmem:[#allocation8 + $0xa8] sm:$0xff]  ;;  %v258_v62 = vld [vmem:[#allocation8 + $0xb0] sm:$0xff] }
  0x41   :  { %484 = vmatpush.msrb.mxu0 %v328_v18  ;;  %510 = vmatpush.msrb.mxu1 %v329_v19  ;;  %v259_v63 = vld [vmem:[#allocation8 + $0xb8] sm:$0xff]  ;;  %v248_v0 = vld [vmem:[#allocation8 + $0x60] sm:$0xff]  ;;  %v249_v1 = vld [vmem:[#allocation8 + $0x68] sm:$0xff] }
  0x42   :  { %536 = vmatpush.msrb.mxu2 %v330_v20  ;;  %562 = vmatpush.msrb.mxu3 %v331_v21  ;;  %v250_v2 = vld [vmem:[#allocation8 + $0x70] sm:$0xff]  ;;  %v251_v3 = vld [vmem:[#allocation8 + $0x78] sm:$0xff]  ;;  %v240_v4 = vld [vmem:[#allocation8 + $0x20] sm:$0xff] }
  0x43   :  { %485 = vmatpush.msrb.mxu0 %v320_v22  ;;  %511 = vmatpush.msrb.mxu1 %v321_v23  ;;  %v241_v5 = vld [vmem:[#allocation8 + $0x28] sm:$0xff]  ;;  %v242_v6 = vld [vmem:[#allocation8 + $0x30] sm:$0xff]  ;;  %v243_v7 = vld [vmem:[#allocation8 + $0x38] sm:$0xff] }
  0x44   :  { %537 = vmatpush.msrb.mxu2 %v322_v26  ;;  %563 = vmatpush.msrb.mxu3 %v323_v27  ;;  %v228_v8 = vld [vmem:[#allocation7 + $0x3c0] sm:$0xff]  ;;  %v229_v9 = vld [vmem:[#allocation7 + $0x3c8] sm:$0xff]  ;;  %v230_v10 = vld [vmem:[#allocation7 + $0x3d0] sm:$0xff] }
  0x45   :  { %486 = vmatpush.msrb.mxu0 %v312_v28  ;;  %512 = vmatpush.msrb.mxu1 %v313_v29  ;;  %v231_v11 = vld [vmem:[#allocation7 + $0x3d8] sm:$0xff]  ;;  %v220_v12 = vld [vmem:[#allocation7 + $0x380] sm:$0xff]  ;;  %v221_v13 = vld [vmem:[#allocation7 + $0x388] sm:$0xff] }
  0x46   :  { %538 = vmatpush.msrb.mxu2 %v314_v30  ;;  %564 = vmatpush.msrb.mxu3 %v315_v31  ;;  %v222_v14 = vld [vmem:[#allocation7 + $0x390] sm:$0xff]  ;;  %v223_v15 = vld [vmem:[#allocation7 + $0x398] sm:$0xff]  ;;  %v212_v18 = vld [vmem:[#allocation7 + $0x340] sm:$0xff] }
  0x47   :  { %392 = vmatmul.f32.vlgmr.msra.gmra.mxu0 %v2709_v32  ;;  %418 = vmatmul.f32.vlgmr.msra.gmra.mxu1 %v2709_v32  ;;  %v213_v19 = vld [vmem:[#allocation7 + $0x348] sm:$0xff]  ;;  %v214_v20 = vld [vmem:[#allocation7 + $0x350] sm:$0xff]  ;;  %v215_v21 = vld [vmem:[#allocation7 + $0x358] sm:$0xff] }
  0x48   :  { %444 = vmatmul.f32.vlgmr.msra.gmra.mxu2 %v2709_v32  ;;  %470 = vmatmul.f32.vlgmr.msra.gmra.mxu3 %v2709_v32  ;;  %v204_v22 = vld [vmem:[#allocation7 + $0x300] sm:$0xff]  ;;  %v205_v23 = vld [vmem:[#allocation7 + $0x308] sm:$0xff]  ;;  %v206_v24 = vld [vmem:[#allocation7 + $0x310] sm:$0xff] }
  0x49   :  { %487 = vmatpush.msrb.mxu0 %v304_v33  ;;  %513 = vmatpush.msrb.mxu1 %v305_v34  ;;  %v207_v25 = vld [vmem:[#allocation7 + $0x318] sm:$0xff]  ;;  %v196_v26 = vld [vmem:[#allocation7 + $0x2c0] sm:$0xff]  ;;  %v197_v27 = vld [vmem:[#allocation7 + $0x2c8] sm:$0xff] }
  0x4a   :  { %539 = vmatpush.msrb.mxu2 %v306_v35  ;;  %565 = vmatpush.msrb.mxu3 %v307_v36  ;;  %v198_v28 = vld [vmem:[#allocation7 + $0x2d0] sm:$0xff]  ;;  %v199_v29 = vld [vmem:[#allocation7 + $0x2d8] sm:$0xff]  ;;  %v188_v30 = vld [vmem:[#allocation7 + $0x280] sm:$0xff] }
  0x4b   :  { %488 = vmatpush.msrb.mxu0 %v296_v38  ;;  %514 = vmatpush.msrb.mxu1 %v297_v39  ;;  %v189_v31 = vld [vmem:[#allocation7 + $0x288] sm:$0xff]  ;;  %v190_v33 = vld [vmem:[#allocation7 + $0x290] sm:$0xff]  ;;  %v191_v34 = vld [vmem:[#allocation7 + $0x298] sm:$0xff] }
  0x4c   :  { %540 = vmatpush.msrb.mxu2 %v298_v40  ;;  %566 = vmatpush.msrb.mxu3 %v299_v41  ;;  %v180_v35 = vld [vmem:[#allocation7 + $0x240] sm:$0xff]  ;;  %v181_v36 = vld [vmem:[#allocation7 + $0x248] sm:$0xff]  ;;  %v182_v38 = vld [vmem:[#allocation7 + $0x250] sm:$0xff] }
  0x4d   :  { %489 = vmatpush.msrb.mxu0 %v288_v42  ;;  %515 = vmatpush.msrb.mxu1 %v289_v43  ;;  %v183_v39 = vld [vmem:[#allocation7 + $0x258] sm:$0xff]  ;;  %v172_v40 = vld [vmem:[#allocation7 + $0x200] sm:$0xff]  ;;  %v173_v41 = vld [vmem:[#allocation7 + $0x208] sm:$0xff] }
  0x4e   :  { %541 = vmatpush.msrb.mxu2 %v290_v45  ;;  %567 = vmatpush.msrb.mxu3 %v291_v46  ;;  %v175_v42 = vld [vmem:[#allocation7 + $0x218] sm:$0xff]  ;;  %v164_v43 = vld [vmem:[#allocation7 + $0x1c0] sm:$0xff]  ;;  %v165_v45 = vld [vmem:[#allocation7 + $0x1c8] sm:$0xff] }
  0x4f   :  { %490 = vmatpush.msrb.mxu0 %v280_v47  ;;  %516 = vmatpush.msrb.mxu1 %v281_v48  ;;  %v166_v46 = vld [vmem:[#allocation7 + $0x1d0] sm:$0xff]  ;;  %v167_v47 = vld [vmem:[#allocation7 + $0x1d8] sm:$0xff]  ;;  %v156_v48 = vld [vmem:[#allocation7 + $0x180] sm:$0xff] }
  0x50   :  { %542 = vmatpush.msrb.mxu2 %v282_v49  ;;  %568 = vmatpush.msrb.mxu3 %v283_v50  ;;  %v157_v49 = vld [vmem:[#allocation7 + $0x188] sm:$0xff]  ;;  %v158_v50 = vld [vmem:[#allocation7 + $0x190] sm:$0xff] }
  0x51   :  { %395 = vmatmul.f32.gmra.mxu0 %v2722_v51  ;;  %421 = vmatmul.f32.gmra.mxu1 %v2722_v51 }
  0x52   :  { %447 = vmatmul.f32.gmra.mxu2 %v2722_v51  ;;  %473 = vmatmul.f32.gmra.mxu3 %v2722_v51 }
  0x53   :  { %491 = vmatpush.msrb.mxu0 %v272_v52  ;;  %517 = vmatpush.msrb.mxu1 %v273_v53  ;;  %v159_v52 = vld [vmem:[#allocation7 + $0x198] sm:$0xff]  ;;  %v148_v53 = vld [vmem:[#allocation7 + $0x140] sm:$0xff] }
  0x54   :  { %543 = vmatpush.msrb.mxu2 %v274_v54  ;;  %569 = vmatpush.msrb.mxu3 %v275_v55  ;;  %v149_v54 = vld [vmem:[#allocation7 + $0x148] sm:$0xff]  ;;  %v150_v55 = vld [vmem:[#allocation7 + $0x150] sm:$0xff] }
  0x55   :  { %492 = vmatpush.msrb.mxu0 %v264_v56  ;;  %518 = vmatpush.msrb.mxu1 %v265_v57  ;;  %v151_v56 = vld [vmem:[#allocation7 + $0x158] sm:$0xff]  ;;  %v140_v57 = vld [vmem:[#allocation7 + $0x100] sm:$0xff] }
  0x56   :  { %544 = vmatpush.msrb.mxu2 %v266_v58  ;;  %570 = vmatpush.msrb.mxu3 %v267_v59  ;;  %v141_v58 = vld [vmem:[#allocation7 + $0x108] sm:$0xff]  ;;  %v143_v59 = vld [vmem:[#allocation7 + $0x118] sm:$0xff] }
  0x57   :  { %493 = vmatpush.msrb.mxu0 %v256_v60  ;;  %519 = vmatpush.msrb.mxu1 %v257_v61  ;;  %v132_v60 = vld [vmem:[#allocation7 + $0xc0] sm:$0xff]  ;;  %v133_v61 = vld [vmem:[#allocation7 + $0xc8] sm:$0xff] }
  0x58   :  { %545 = vmatpush.msrb.mxu2 %v258_v62  ;;  %571 = vmatpush.msrb.mxu3 %v259_v63  ;;  %v134_v62 = vld [vmem:[#allocation7 + $0xd0] sm:$0xff]  ;;  %v135_v63 = vld [vmem:[#allocation7 + $0xd8] sm:$0xff] }
  0x59   :  { %494 = vmatpush.msrb.mxu0 %v248_v0  ;;  %520 = vmatpush.msrb.mxu1 %v249_v1  ;;  %v124_v0 = vld [vmem:[#allocation7 + $0x80] sm:$0xff]  ;;  %v125_v1 = vld [vmem:[#allocation7 + $0x88] sm:$0xff] }
  0x5a   :  { %546 = vmatpush.msrb.mxu2 %v250_v2  ;;  %572 = vmatpush.msrb.mxu3 %v251_v3  ;;  %v126_v2 = vld [vmem:[#allocation7 + $0x90] sm:$0xff]  ;;  %v127_v3 = vld [vmem:[#allocation7 + $0x98] sm:$0xff] }
  0x5b   :  { %398 = vmatmul.f32.gmra.mxu0 %v2718_v44  ;;  %424 = vmatmul.f32.gmra.mxu1 %v2718_v44 }
  0x5c   :  { %450 = vmatmul.f32.gmra.mxu2 %v2718_v44  ;;  %476 = vmatmul.f32.gmra.mxu3 %v2718_v44 }
  0x5d   :  { %495 = vmatpush.msrb.mxu0 %v240_v4  ;;  %521 = vmatpush.msrb.mxu1 %v241_v5  ;;  %v116_v4 = vld [vmem:[#allocation7 + $0x40] sm:$0xff]  ;;  %v117_v5 = vld [vmem:[#allocation7 + $0x48] sm:$0xff] }
  0x5e   :  { %547 = vmatpush.msrb.mxu2 %v242_v6  ;;  %573 = vmatpush.msrb.mxu3 %v243_v7  ;;  %v118_v6 = vld [vmem:[#allocation7 + $0x50] sm:$0xff]  ;;  %v119_v7 = vld [vmem:[#allocation7 + $0x58] sm:$0xff] }
  0x5f   :  { %584 = vmatpush.msra.mxu0 %v228_v8  ;;  %610 = vmatpush.msra.mxu1 %v229_v9  ;;  %v108_v8 = vld [vmem:[#allocation7] sm:$0xff]  ;;  %v109_v9 = vld [vmem:[#allocation7 + $0x8] sm:$0xff] }
  0x60   :  { %636 = vmatpush.msra.mxu2 %v230_v10  ;;  %662 = vmatpush.msra.mxu3 %v231_v11  ;;  %v111_v10 = vld [vmem:[#allocation7 + $0x18] sm:$0xff]  ;;  %v232_v11 = vld [vmem:[#allocation7 + $0x3e0] sm:$0xff] }
  0x61   :  { %585 = vmatpush.msra.mxu0 %v220_v12  ;;  %611 = vmatpush.msra.mxu1 %v221_v13  ;;  %v233_v12 = vld [vmem:[#allocation7 + $0x3e8] sm:$0xff]  ;;  %v234_v13 = vld [vmem:[#allocation7 + $0x3f0] sm:$0xff] }
  0x62   :  { %637 = vmatpush.msra.mxu2 %v222_v14  ;;  %663 = vmatpush.msra.mxu3 %v223_v15  ;;  %v235_v14 = vld [vmem:[#allocation7 + $0x3f8] sm:$0xff]  ;;  %v224_v15 = vld [vmem:[#allocation7 + $0x3a0] sm:$0xff] }
  0x63   :  { %586 = vmatpush.msra.mxu0 %v212_v18  ;;  %612 = vmatpush.msra.mxu1 %v213_v19  ;;  %v225_v18 = vld [vmem:[#allocation7 + $0x3a8] sm:$0xff]  ;;  %v226_v19 = vld [vmem:[#allocation7 + $0x3b0] sm:$0xff] }
  0x64   :  { %638 = vmatpush.msra.mxu2 %v214_v20  ;;  %664 = vmatpush.msra.mxu3 %v215_v21  ;;  %v227_v20 = vld [vmem:[#allocation7 + $0x3b8] sm:$0xff]  ;;  %v216_v21 = vld [vmem:[#allocation7 + $0x360] sm:$0xff] }
  0x65   :  { %587 = vmatpush.msra.mxu0 %v204_v22  ;;  %613 = vmatpush.msra.mxu1 %v205_v23  ;;  %v217_v22 = vld [vmem:[#allocation7 + $0x368] sm:$0xff]  ;;  %v218_v23 = vld [vmem:[#allocation7 + $0x370] sm:$0xff] }
  0x66   :  { %639 = vmatpush.msra.mxu2 %v206_v24  ;;  %665 = vmatpush.msra.mxu3 %v207_v25  ;;  %v219_v24 = vld [vmem:[#allocation7 + $0x378] sm:$0xff]  ;;  %v208_v25 = vld [vmem:[#allocation7 + $0x320] sm:$0xff] }
  0x67   :  { %496 = vmatmul.f32.vlgmr.msrb.gmra.mxu0 %v2709_v32  ;;  %522 = vmatmul.f32.vlgmr.msrb.gmra.mxu1 %v2709_v32 }
  0x68   :  { %548 = vmatmul.f32.vlgmr.msrb.gmra.mxu2 %v2709_v32  ;;  %574 = vmatmul.f32.vlgmr.msrb.gmra.mxu3 %v2709_v32  ;;  %v174_v32 = vld [vmem:[#allocation7 + $0x210] sm:$0xff] }
  0x69   :  { %588 = vmatpush.msra.mxu0 %v196_v26  ;;  %614 = vmatpush.msra.mxu1 %v197_v27  ;;  %v209_v26 = vld [vmem:[#allocation7 + $0x328] sm:$0xff]  ;;  %v210_v27 = vld [vmem:[#allocation7 + $0x330] sm:$0xff] }
  0x6a   :  { %640 = vmatpush.msra.mxu2 %v198_v28  ;;  %666 = vmatpush.msra.mxu3 %v199_v29  ;;  %v211_v28 = vld [vmem:[#allocation7 + $0x338] sm:$0xff]  ;;  %v200_v29 = vld [vmem:[#allocation7 + $0x2e0] sm:$0xff] }
  0x6b   :  { %589 = vmatpush.msra.mxu0 %v188_v30  ;;  %615 = vmatpush.msra.mxu1 %v189_v31  ;;  %v201_v30 = vld [vmem:[#allocation7 + $0x2e8] sm:$0xff]  ;;  %v202_v31 = vld [vmem:[#allocation7 + $0x2f0] sm:$0xff] }
  0x6c   :  { %641 = vmatpush.msra.mxu2 %v190_v33  ;;  %667 = vmatpush.msra.mxu3 %v191_v34  ;;  %v203_v33 = vld [vmem:[#allocation7 + $0x2f8] sm:$0xff]  ;;  %v192_v34 = vld [vmem:[#allocation7 + $0x2a0] sm:$0xff] }
  0x6d   :  { %590 = vmatpush.msra.mxu0 %v180_v35  ;;  %616 = vmatpush.msra.mxu1 %v181_v36  ;;  %v193_v35 = vld [vmem:[#allocation7 + $0x2a8] sm:$0xff]  ;;  %v194_v36 = vld [vmem:[#allocation7 + $0x2b0] sm:$0xff] }
  0x6e   :  { %642 = vmatpush.msra.mxu2 %v182_v38  ;;  %668 = vmatpush.msra.mxu3 %v183_v39  ;;  %v195_v38 = vld [vmem:[#allocation7 + $0x2b8] sm:$0xff]  ;;  %v184_v39 = vld [vmem:[#allocation7 + $0x260] sm:$0xff] }
  0x6f   :  { %591 = vmatpush.msra.mxu0 %v172_v40  ;;  %617 = vmatpush.msra.mxu1 %v173_v41  ;;  %v185_v40 = vld [vmem:[#allocation7 + $0x268] sm:$0xff]  ;;  %v186_v41 = vld [vmem:[#allocation7 + $0x270] sm:$0xff] }
  0x70   :  { %643 = vmatpush.msra.mxu2 %v174_v32  ;;  %669 = vmatpush.msra.mxu3 %v175_v42  ;;  %v187_v32 = vld [vmem:[#allocation7 + $0x278] sm:$0xff]  ;;  %v176_v42 = vld [vmem:[#allocation7 + $0x220] sm:$0xff] }
  0x71   :  { %499 = vmatmul.f32.gmra.mxu0 %v2722_v51  ;;  %525 = vmatmul.f32.gmra.mxu1 %v2722_v51 }
  0x72   :  { %551 = vmatmul.f32.gmra.mxu2 %v2722_v51  ;;  %577 = vmatmul.f32.gmra.mxu3 %v2722_v51  ;;  %v142_v51 = vld [vmem:[#allocation7 + $0x110] sm:$0xff] }
  0x73   :  { %592 = vmatpush.msra.mxu0 %v164_v43  ;;  %618 = vmatpush.msra.mxu1 %v165_v45  ;;  %v177_v43 = vld [vmem:[#allocation7 + $0x228] sm:$0xff]  ;;  %v178_v45 = vld [vmem:[#allocation7 + $0x230] sm:$0xff] }
  0x74   :  { %644 = vmatpush.msra.mxu2 %v166_v46  ;;  %670 = vmatpush.msra.mxu3 %v167_v47  ;;  %v179_v46 = vld [vmem:[#allocation7 + $0x238] sm:$0xff]  ;;  %v168_v47 = vld [vmem:[#allocation7 + $0x1e0] sm:$0xff] }
  0x75   :  { %593 = vmatpush.msra.mxu0 %v156_v48  ;;  %619 = vmatpush.msra.mxu1 %v157_v49  ;;  %v169_v48 = vld [vmem:[#allocation7 + $0x1e8] sm:$0xff]  ;;  %v170_v49 = vld [vmem:[#allocation7 + $0x1f0] sm:$0xff] }
  0x76   :  { %645 = vmatpush.msra.mxu2 %v158_v50  ;;  %671 = vmatpush.msra.mxu3 %v159_v52  ;;  %v171_v50 = vld [vmem:[#allocation7 + $0x1f8] sm:$0xff]  ;;  %v160_v52 = vld [vmem:[#allocation7 + $0x1a0] sm:$0xff] }
  0x77   :  { %594 = vmatpush.msra.mxu0 %v148_v53  ;;  %620 = vmatpush.msra.mxu1 %v149_v54  ;;  %v161_v53 = vld [vmem:[#allocation7 + $0x1a8] sm:$0xff]  ;;  %v162_v54 = vld [vmem:[#allocation7 + $0x1b0] sm:$0xff] }
  0x78   :  { %646 = vmatpush.msra.mxu2 %v150_v55  ;;  %672 = vmatpush.msra.mxu3 %v151_v56  ;;  %v163_v55 = vld [vmem:[#allocation7 + $0x1b8] sm:$0xff]  ;;  %v152_v56 = vld [vmem:[#allocation7 + $0x160] sm:$0xff] }
  0x79   :  { %595 = vmatpush.msra.mxu0 %v140_v57  ;;  %621 = vmatpush.msra.mxu1 %v141_v58  ;;  %v153_v57 = vld [vmem:[#allocation7 + $0x168] sm:$0xff]  ;;  %v154_v58 = vld [vmem:[#allocation7 + $0x170] sm:$0xff] }
  0x7a   :  { %647 = vmatpush.msra.mxu2 %v142_v51  ;;  %673 = vmatpush.msra.mxu3 %v143_v59  ;;  %v155_v51 = vld [vmem:[#allocation7 + $0x178] sm:$0xff]  ;;  %v144_v59 = vld [vmem:[#allocation7 + $0x120] sm:$0xff] }
  0x7b   :  { %502 = vmatmul.f32.gmra.mxu0 %v2718_v44  ;;  %528 = vmatmul.f32.gmra.mxu1 %v2718_v44 }
  0x7c   :  { %554 = vmatmul.f32.gmra.mxu2 %v2718_v44  ;;  %580 = vmatmul.f32.gmra.mxu3 %v2718_v44  ;;  %v110_v44 = vld [vmem:[#allocation7 + $0x10] sm:$0xff] }
  0x7d   :  { %596 = vmatpush.msra.mxu0 %v132_v60  ;;  %622 = vmatpush.msra.mxu1 %v133_v61  ;;  %v145_v60 = vld [vmem:[#allocation7 + $0x128] sm:$0xff]  ;;  %v146_v61 = vld [vmem:[#allocation7 + $0x130] sm:$0xff] }
  0x7e   :  { %648 = vmatpush.msra.mxu2 %v134_v62  ;;  %674 = vmatpush.msra.mxu3 %v135_v63  ;;  %v147_v62 = vld [vmem:[#allocation7 + $0x138] sm:$0xff]  ;;  %v136_v63 = vld [vmem:[#allocation7 + $0xe0] sm:$0xff] }
  0x7f   :  { %597 = vmatpush.msra.mxu0 %v124_v0  ;;  %623 = vmatpush.msra.mxu1 %v125_v1  ;;  %v137_v0 = vld [vmem:[#allocation7 + $0xe8] sm:$0xff]  ;;  %v138_v1 = vld [vmem:[#allocation7 + $0xf0] sm:$0xff] }
  0x80   :  { %649 = vmatpush.msra.mxu2 %v126_v2  ;;  %675 = vmatpush.msra.mxu3 %v127_v3  ;;  %v139_v2 = vld [vmem:[#allocation7 + $0xf8] sm:$0xff]  ;;  %v128_v3 = vld [vmem:[#allocation7 + $0xa0] sm:$0xff] }
  0x81   :  { %598 = vmatpush.msra.mxu0 %v116_v4  ;;  %624 = vmatpush.msra.mxu1 %v117_v5  ;;  %v129_v4 = vld [vmem:[#allocation7 + $0xa8] sm:$0xff]  ;;  %v130_v5 = vld [vmem:[#allocation7 + $0xb0] sm:$0xff] }
  0x82   :  { %650 = vmatpush.msra.mxu2 %v118_v6  ;;  %676 = vmatpush.msra.mxu3 %v119_v7  ;;  %v131_v6 = vld [vmem:[#allocation7 + $0xb8] sm:$0xff]  ;;  %v120_v7 = vld [vmem:[#allocation7 + $0x60] sm:$0xff] }
  0x83   :  { %599 = vmatpush.msra.mxu0 %v108_v8  ;;  %625 = vmatpush.msra.mxu1 %v109_v9  ;;  %v121_v8 = vld [vmem:[#allocation7 + $0x68] sm:$0xff]  ;;  %v122_v9 = vld [vmem:[#allocation7 + $0x70] sm:$0xff] }
  0x84   :  { %651 = vmatpush.msra.mxu2 %v110_v44  ;;  %677 = vmatpush.msra.mxu3 %v111_v10  ;;  %v123_v44 = vld [vmem:[#allocation7 + $0x78] sm:$0xff]  ;;  %v112_v10 = vld [vmem:[#allocation7 + $0x20] sm:$0xff] }
  0x85   :  { %600 = vmatmul.f32.vlgmr.msra.gmra.mxu0 %v2702_v16  ;;  %626 = vmatmul.f32.vlgmr.msra.gmra.mxu1 %v2702_v16 }
  0x86   :  { %652 = vmatmul.f32.vlgmr.msra.gmra.mxu2 %v2702_v16  ;;  %678 = vmatmul.f32.vlgmr.msra.gmra.mxu3 %v2702_v16 }
  0x87   :  { %688 = vmatpush.msrb.mxu0 %v232_v11  ;;  %714 = vmatpush.msrb.mxu1 %v233_v12  ;;  %v113_v11 = vld [vmem:[#allocation7 + $0x28] sm:$0xff]  ;;  %v114_v12 = vld [vmem:[#allocation7 + $0x30] sm:$0xff] }
  0x88   :  { %740 = vmatpush.msrb.mxu2 %v234_v13  ;;  %766 = vmatpush.msrb.mxu3 %v235_v14  ;;  %v115_v13 = vld [vmem:[#allocation7 + $0x38] sm:$0xff] }
  0x89   :  { %689 = vmatpush.msrb.mxu0 %v224_v15  ;;  %715 = vmatpush.msrb.mxu1 %v225_v18 }
  0x8a   :  { %741 = vmatpush.msrb.mxu2 %v226_v19  ;;  %767 = vmatpush.msrb.mxu3 %v227_v20  ;;  %v912_v19 = vld [vmem:[#allocation10 + $0x1f0] sm:$0xff]  ;;  %v913_v20 = vld [vmem:[#allocation10 + $0x1f8] sm:$0xff] }
  0x8b   :  { %690 = vmatpush.msrb.mxu0 %v216_v21  ;;  %716 = vmatpush.msrb.mxu1 %v217_v22  ;;  %v857_v21 = vld [vmem:[#allocation10 + $0xf0] sm:$0xff]  ;;  %v910_v22 = vld [vmem:[#allocation10 + $0x1e0] sm:$0xff] }
  0x8c   :  { %742 = vmatpush.msrb.mxu2 %v218_v23  ;;  %768 = vmatpush.msrb.mxu3 %v219_v24  ;;  %v911_v23 = vld [vmem:[#allocation10 + $0x1e8] sm:$0xff] }
  0x8d   :  { %691 = vmatpush.msrb.mxu0 %v208_v25  ;;  %717 = vmatpush.msrb.mxu1 %v209_v26  ;;  %v856_v26 = vld [vmem:[#allocation10 + $0xe8] sm:$0xff] }
  0x8e   :  { %743 = vmatpush.msrb.mxu2 %v210_v27  ;;  %769 = vmatpush.msrb.mxu3 %v211_v28  ;;  %v908_v27 = vld [vmem:[#allocation10 + $0x1d0] sm:$0xff]  ;;  %v909_v28 = vld [vmem:[#allocation10 + $0x1d8] sm:$0xff] }
  0x8f   :  { %603 = vmatmul.f32.gmra.mxu0 %v2704_v17  ;;  %629 = vmatmul.f32.gmra.mxu1 %v2704_v17 }
  0x90   :  { %655 = vmatmul.f32.gmra.mxu2 %v2704_v17  ;;  %681 = vmatmul.f32.gmra.mxu3 %v2704_v17 }
  0x91   :  { %692 = vmatpush.msrb.mxu0 %v200_v29  ;;  %718 = vmatpush.msrb.mxu1 %v201_v30  ;;  %v853_v29 = vld [vmem:[#allocation10 + $0xd0] sm:$0xff]  ;;  %v854_v30 = vld [vmem:[#allocation10 + $0xd8] sm:$0xff] }
  0x92   :  { %744 = vmatpush.msrb.mxu2 %v202_v31  ;;  %770 = vmatpush.msrb.mxu3 %v203_v33  ;;  %v906_v31 = vld [vmem:[#allocation10 + $0x1c0] sm:$0xff]  ;;  %v907_v33 = vld [vmem:[#allocation10 + $0x1c8] sm:$0xff] }
  0x93   :  { %693 = vmatpush.msrb.mxu0 %v192_v34  ;;  %719 = vmatpush.msrb.mxu1 %v193_v35  ;;  %v851_v34 = vld [vmem:[#allocation10 + $0xc0] sm:$0xff]  ;;  %v852_v35 = vld [vmem:[#allocation10 + $0xc8] sm:$0xff] }
  0x94   :  { %745 = vmatpush.msrb.mxu2 %v194_v36  ;;  %771 = vmatpush.msrb.mxu3 %v195_v38 }
  0x95   :  { %694 = vmatpush.msrb.mxu0 %v184_v39  ;;  %720 = vmatpush.msrb.mxu1 %v185_v40  ;;  %v904_v39 = vld [vmem:[#allocation10 + $0x1b0] sm:$0xff]  ;;  %v905_v40 = vld [vmem:[#allocation10 + $0x1b8] sm:$0xff] }
  0x96   :  { %746 = vmatpush.msrb.mxu2 %v186_v41  ;;  %772 = vmatpush.msrb.mxu3 %v187_v32  ;;  %v849_v41 = vld [vmem:[#allocation10 + $0xb0] sm:$0xff]  ;;  %v850_v32 = vld [vmem:[#allocation10 + $0xb8] sm:$0xff] }
  0x97   :  { %695 = vmatpush.msrb.mxu0 %v176_v42  ;;  %721 = vmatpush.msrb.mxu1 %v177_v43  ;;  %v902_v42 = vld [vmem:[#allocation10 + $0x1a0] sm:$0xff]  ;;  %v903_v43 = vld [vmem:[#allocation10 + $0x1a8] sm:$0xff] }
  0x98   :  { %747 = vmatpush.msrb.mxu2 %v178_v45  ;;  %773 = vmatpush.msrb.mxu3 %v179_v46 }
  0x99   :  { %606 = vmatmul.f32.gmra.mxu0 %v2713_v37  ;;  %632 = vmatmul.f32.gmra.mxu1 %v2713_v37 }
  0x9a   :  { %658 = vmatmul.f32.gmra.mxu2 %v2713_v37  ;;  %684 = vmatmul.f32.gmra.mxu3 %v2713_v37 }
  0x9b   :  { %696 = vmatpush.msrb.mxu0 %v168_v47  ;;  %722 = vmatpush.msrb.mxu1 %v169_v48  ;;  %v847_v47 = vld [vmem:[#allocation10 + $0xa0] sm:$0xff]  ;;  %v848_v48 = vld [vmem:[#allocation10 + $0xa8] sm:$0xff] }
  0x9c   :  { %748 = vmatpush.msrb.mxu2 %v170_v49  ;;  %774 = vmatpush.msrb.mxu3 %v171_v50  ;;  %v900_v49 = vld [vmem:[#allocation10 + $0x190] sm:$0xff]  ;;  %v901_v50 = vld [vmem:[#allocation10 + $0x198] sm:$0xff] }
  0x9d   :  { %697 = vmatpush.msrb.mxu0 %v160_v52  ;;  %723 = vmatpush.msrb.mxu1 %v161_v53  ;;  %v845_v52 = vld [vmem:[#allocation10 + $0x90] sm:$0xff]  ;;  %v846_v53 = vld [vmem:[#allocation10 + $0x98] sm:$0xff] }
  0x9e   :  { %749 = vmatpush.msrb.mxu2 %v162_v54  ;;  %775 = vmatpush.msrb.mxu3 %v163_v55  ;;  %v898_v54 = vld [vmem:[#allocation10 + $0x180] sm:$0xff]  ;;  %v899_v55 = vld [vmem:[#allocation10 + $0x188] sm:$0xff] }
  0x9f   :  { %698 = vmatpush.msrb.mxu0 %v152_v56  ;;  %724 = vmatpush.msrb.mxu1 %v153_v57  ;;  %v843_v56 = vld [vmem:[#allocation10 + $0x80] sm:$0xff]  ;;  %v844_v57 = vld [vmem:[#allocation10 + $0x88] sm:$0xff] }
  0xa0   :  { %750 = vmatpush.msrb.mxu2 %v154_v58  ;;  %776 = vmatpush.msrb.mxu3 %v155_v51 }
  0xa1   :  { %699 = vmatpush.msrb.mxu0 %v144_v59  ;;  %725 = vmatpush.msrb.mxu1 %v145_v60  ;;  %v896_v59 = vld [vmem:[#allocation10 + $0x170] sm:$0xff]  ;;  %v897_v60 = vld [vmem:[#allocation10 + $0x178] sm:$0xff] }
  0xa2   :  { %751 = vmatpush.msrb.mxu2 %v146_v61  ;;  %777 = vmatpush.msrb.mxu3 %v147_v62  ;;  %v841_v61 = vld [vmem:[#allocation10 + $0x70] sm:$0xff] }
  0xa3   :  { %700 = vmatpush.msrb.mxu0 %v136_v63  ;;  %726 = vmatpush.msrb.mxu1 %v137_v0  ;;  %v842_v0 = vld [vmem:[#allocation10 + $0x78] sm:$0xff] }
  0xa4   :  { %752 = vmatpush.msrb.mxu2 %v138_v1  ;;  %778 = vmatpush.msrb.mxu3 %v139_v2  ;;  %v894_v1 = vld [vmem:[#allocation10 + $0x160] sm:$0xff]  ;;  %v895_v2 = vld [vmem:[#allocation10 + $0x168] sm:$0xff] }
  0xa5   :  { %701 = vmatpush.msrb.mxu0 %v128_v3  ;;  %727 = vmatpush.msrb.mxu1 %v129_v4  ;;  %v839_v3 = vld [vmem:[#allocation10 + $0x60] sm:$0xff]  ;;  %v840_v4 = vld [vmem:[#allocation10 + $0x68] sm:$0xff] }
  0xa6   :  { %753 = vmatpush.msrb.mxu2 %v130_v5  ;;  %779 = vmatpush.msrb.mxu3 %v131_v6  ;;  %v892_v5 = vld [vmem:[#allocation10 + $0x150] sm:$0xff]  ;;  %v893_v6 = vld [vmem:[#allocation10 + $0x158] sm:$0xff] }
  0xa7   :  { %702 = vmatpush.msrb.mxu0 %v120_v7  ;;  %728 = vmatpush.msrb.mxu1 %v121_v8  ;;  %v837_v7 = vld [vmem:[#allocation10 + $0x50] sm:$0xff]  ;;  %v838_v8 = vld [vmem:[#allocation10 + $0x58] sm:$0xff] }
  0xa8   :  { %754 = vmatpush.msrb.mxu2 %v122_v9  ;;  %780 = vmatpush.msrb.mxu3 %v123_v44  ;;  %v890_v9 = vld [vmem:[#allocation10 + $0x140] sm:$0xff]  ;;  %v891_v44 = vld [vmem:[#allocation10 + $0x148] sm:$0xff] }
  0xa9   :  { %703 = vmatpush.msrb.mxu0 %v112_v10  ;;  %729 = vmatpush.msrb.mxu1 %v113_v11  ;;  %v835_v10 = vld [vmem:[#allocation10 + $0x40] sm:$0xff] }
  0xaa   :  { %755 = vmatpush.msrb.mxu2 %v114_v12  ;;  %781 = vmatpush.msrb.mxu3 %v115_v13  ;;  %v836_v13 = vld [vmem:[#allocation10 + $0x48] sm:$0xff] }
  0xab   :  { %704 = vmatmul.f32.vlgmr.msrb.gmra.mxu0 %v2702_v16  ;;  %730 = vmatmul.f32.vlgmr.msrb.gmra.mxu1 %v2702_v16 }
  0xac   :  { %756 = vmatmul.f32.vlgmr.msrb.gmra.mxu2 %v2702_v16  ;;  %782 = vmatmul.f32.vlgmr.msrb.gmra.mxu3 %v2702_v16 }
  0xad   :  { %914 = vmatpush.msra.mxu0 %v912_v19  ;;  %934 = vmatpush.msra.mxu1 %v913_v20  ;;  %v888_v19 = vld [vmem:[#allocation10 + $0x130] sm:$0xff]  ;;  %v889_v20 = vld [vmem:[#allocation10 + $0x138] sm:$0xff] }
  0xae   :  { %954 = vmatpush.msra.mxu2 %v857_v21  ;;  %v833_v21 = vld [vmem:[#allocation10 + $0x30] sm:$0xff] }
  0xaf   :  { %915 = vmatpush.msra.mxu0 %v910_v22  ;;  %935 = vmatpush.msra.mxu1 %v911_v23  ;;  %v834_v23 = vld [vmem:[#allocation10 + $0x38] sm:$0xff] }
  0xb1   :  { %916 = vmatpush.msra.mxu0 %v908_v27  ;;  %936 = vmatpush.msra.mxu1 %v909_v28  ;;  %v831_v27 = vld [vmem:[#allocation10 + $0x20] sm:$0xff]  ;;  %v832_v28 = vld [vmem:[#allocation10 + $0x28] sm:$0xff] }
  0xb3   :  { %707 = vmatmul.f32.gmra.mxu0 %v2704_v17  ;;  %733 = vmatmul.f32.gmra.mxu1 %v2704_v17 }
  0xb4   :  { %759 = vmatmul.f32.gmra.mxu2 %v2704_v17  ;;  %785 = vmatmul.f32.gmra.mxu3 %v2704_v17  ;;  %v858_v17 = vld [vmem:[#allocation10 + $0xf8] sm:$0xff] }
  0xb5   :  { %974 = vmatpush.msra.mxu3 %v858_v17  ;;  %917 = vmatpush.msra.mxu0 %v906_v31  ;;  %v829_v31 = vld [vmem:[#allocation10 + $0x10] sm:$0xff] }
  0xb6   :  { %937 = vmatpush.msra.mxu1 %v907_v33  ;;  %v830_v33 = vld [vmem:[#allocation10 + $0x18] sm:$0xff] }
  0xb7   :  { %975 = vmatpush.msra.mxu3 %v856_v26  ;;  %918 = vmatpush.msra.mxu0 %v904_v39  ;;  %v887_v26 = vld [vmem:[#allocation10 + $0x128] sm:$0xff]  ;;  %v827_v39 = vld [vmem:[#allocation10] sm:$0xff] }
  0xb8   :  { %938 = vmatpush.msra.mxu1 %v905_v40 }
  0xb9   :  { %976 = vmatpush.msra.mxu3 %v854_v30  ;;  %919 = vmatpush.msra.mxu0 %v902_v42  ;;  %v885_v30 = vld [vmem:[#allocation10 + $0x118] sm:$0xff]  ;;  %v1046_v42 = vld [vmem:[#allocation10 + $0x2f0] sm:$0xff] }
  0xba   :  { %939 = vmatpush.msra.mxu1 %v903_v43  ;;  %v1047_v43 = vld [vmem:[#allocation10 + $0x2f8] sm:$0xff] }
  0xbb   :  { %710 = vmatmul.f32.gmra.mxu0 %v2713_v37  ;;  %736 = vmatmul.f32.gmra.mxu1 %v2713_v37 }
  0xbc   :  { %762 = vmatmul.f32.gmra.mxu2 %v2713_v37  ;;  %788 = vmatmul.f32.gmra.mxu3 %v2713_v37  ;;  %v855_v37 = vld [vmem:[#allocation10 + $0xe0] sm:$0xff] }
  0xbd   :  { %955 = vmatpush.msra.mxu2 %v855_v37  ;;  %977 = vmatpush.msra.mxu3 %v852_v35  ;;  %v886_v37 = vld [vmem:[#allocation10 + $0x120] sm:$0xff]  ;;  %v883_v35 = vld [vmem:[#allocation10 + $0x108] sm:$0xff] }
  0xbe   :  { %920 = vmatpush.msra.mxu0 %v900_v49  ;;  %940 = vmatpush.msra.mxu1 %v901_v50 }
  0xbf   :  { %956 = vmatpush.msra.mxu2 %v853_v29  ;;  %978 = vmatpush.msra.mxu3 %v850_v32  ;;  %v884_v29 = vld [vmem:[#allocation10 + $0x110] sm:$0xff]  ;;  %v828_v32 = vld [vmem:[#allocation10 + $0x8] sm:$0xff] }
  0xc0   :  { %921 = vmatpush.msra.mxu0 %v898_v54  ;;  %941 = vmatpush.msra.mxu1 %v899_v55  ;;  %v1140_v54 = vld [vmem:[#allocation10 + $0x3e0] sm:$0xff]  ;;  %v1141_v55 = vld [vmem:[#allocation10 + $0x3e8] sm:$0xff] }
  0xc1   :  { %957 = vmatpush.msra.mxu2 %v851_v34  ;;  %979 = vmatpush.msra.mxu3 %v848_v48  ;;  %v882_v34 = vld [vmem:[#allocation10 + $0x100] sm:$0xff]  ;;  %v1143_v48 = vld [vmem:[#allocation10 + $0x3f8] sm:$0xff] }
  0xc2   :  { %922 = vmatpush.msra.mxu0 %v896_v59  ;;  %942 = vmatpush.msra.mxu1 %v897_v60  ;;  %v1138_v59 = vld [vmem:[#allocation10 + $0x3d0] sm:$0xff]  ;;  %v1139_v60 = vld [vmem:[#allocation10 + $0x3d8] sm:$0xff] }
  0xc3   :  { %958 = vmatpush.msra.mxu2 %v849_v41  ;;  %980 = vmatpush.msra.mxu3 %v846_v53  ;;  %v1045_v53 = vld [vmem:[#allocation10 + $0x2e8] sm:$0xff] }
  0xc4   :  { %v2768_v14 = vpop.f32.mrf.mxu0  ;;  %v2770_v15 = vpop.f32.mrf.mxu1  ;;  %923 = vmatpush.msra.mxu0 %v894_v1  ;;  %943 = vmatpush.msra.mxu1 %v895_v2  ;;  %v1136_v1 = vld [vmem:[#allocation10 + $0x3c0] sm:$0xff]  ;;  %v1137_v2 = vld [vmem:[#allocation10 + $0x3c8] sm:$0xff] }
  0xc5   :  { %959 = vmatpush.msra.mxu2 %v847_v47  ;;  %981 = vmatpush.msra.mxu3 %v844_v57  ;;  %v1142_v47 = vld [vmem:[#allocation10 + $0x3f0] sm:$0xff]  ;;  %v1043_v57 = vld [vmem:[#allocation10 + $0x2d8] sm:$0xff] }
  0xc6   :  { %924 = vmatpush.msra.mxu0 %v892_v5  ;;  %944 = vmatpush.msra.mxu1 %v893_v6  ;;  %v1038_v5 = vld [vmem:[#allocation10 + $0x2b0] sm:$0xff]  ;;  %v1039_v6 = vld [vmem:[#allocation10 + $0x2b8] sm:$0xff] }
  0xc7   :  { %960 = vmatpush.msra.mxu2 %v845_v52  ;;  %982 = vmatpush.msra.mxu3 %v842_v0  ;;  %v1044_v52 = vld [vmem:[#allocation10 + $0x2e0] sm:$0xff]  ;;  %v1041_v0 = vld [vmem:[#allocation10 + $0x2c8] sm:$0xff] }
  0xc8   :  { %925 = vmatpush.msra.mxu0 %v890_v9  ;;  %945 = vmatpush.msra.mxu1 %v891_v44 }
  0xc9   :  { %961 = vmatpush.msra.mxu2 %v843_v56  ;;  %983 = vmatpush.msra.mxu3 %v840_v4  ;;  %v1042_v56 = vld [vmem:[#allocation10 + $0x2d0] sm:$0xff] }
  0xca   :  { %926 = vmatpush.msra.mxu0 %v888_v19  ;;  %946 = vmatpush.msra.mxu1 %v889_v20  ;;  %v1132_v19 = vld [vmem:[#allocation10 + $0x3a0] sm:$0xff] }
  0xcb   :  { %v2772_v16 = vpop.f32.mrf.mxu2  ;;  %v2774_v18 = vpop.f32.mrf.mxu3  ;;  %962 = vmatpush.msra.mxu2 %v841_v61  ;;  %984 = vmatpush.msra.mxu3 %v838_v8  ;;  %v1040_v61 = vld [vmem:[#allocation10 + $0x2c0] sm:$0xff]  ;;  %v1135_v8 = vld [vmem:[#allocation10 + $0x3b8] sm:$0xff] }
  0xcc   :  { %927 = vmatpush.msra.mxu0 %v886_v37  ;;  %947 = vmatpush.msra.mxu1 %v887_v26  ;;  %v1034_v37 = vld [vmem:[#allocation10 + $0x290] sm:$0xff]  ;;  %v1035_v26 = vld [vmem:[#allocation10 + $0x298] sm:$0xff] }
  0xcd   :  { %963 = vmatpush.msra.mxu2 %v839_v3  ;;  %985 = vmatpush.msra.mxu3 %v836_v13  ;;  %v1037_v13 = vld [vmem:[#allocation10 + $0x2a8] sm:$0xff] }
  0xce   :  { %v2776_v24 = vpop.f32.mrf.mxu0  ;;  %v2778_v25 = vpop.f32.mrf.mxu1  ;;  %928 = vmatpush.msra.mxu0 %v884_v29  ;;  %948 = vmatpush.msra.mxu1 %v885_v30  ;;  %v1032_v29 = vld [vmem:[#allocation10 + $0x280] sm:$0xff]  ;;  %v1033_v30 = vld [vmem:[#allocation10 + $0x288] sm:$0xff] }
  0xcf   :  { %964 = vmatpush.msra.mxu2 %v837_v7  ;;  %986 = vmatpush.msra.mxu3 %v834_v23  ;;  %v1134_v7 = vld [vmem:[#allocation10 + $0x3b0] sm:$0xff]  ;;  %v1133_v23 = vld [vmem:[#allocation10 + $0x3a8] sm:$0xff] }
  0xd0   :  { %929 = vmatpush.msra.mxu0 %v882_v34  ;;  %949 = vmatpush.msra.mxu1 %v883_v35 }
  0xd1   :  { %965 = vmatpush.msra.mxu2 %v835_v10  ;;  %987 = vmatpush.msra.mxu3 %v832_v28  ;;  %v1036_v10 = vld [vmem:[#allocation10 + $0x2a0] sm:$0xff]  ;;  %v1131_v28 = vld [vmem:[#allocation10 + $0x398] sm:$0xff] }
  0xd2   :  { %1048 = vmatpush.msrb.mxu0 %v1046_v42  ;;  %1068 = vmatpush.msrb.mxu1 %v1047_v43 }
  0xd3   :  { %966 = vmatpush.msra.mxu2 %v833_v21  ;;  %988 = vmatpush.msra.mxu3 %v830_v33 }
  0xd4   :  { %1049 = vmatpush.msrb.mxu0 %v1044_v52  ;;  %1069 = vmatpush.msrb.mxu1 %v1045_v53  ;;  %v1030_v53 = vld [vmem:[#allocation10 + $0x270] sm:$0xff] }
  0xd5   :  { %v2780_v36 = vpop.f32.mrf.mxu2  ;;  %v2782_v38 = vpop.f32.mrf.mxu3  ;;  %967 = vmatpush.msra.mxu2 %v831_v27  ;;  %989 = vmatpush.msra.mxu3 %v828_v32  ;;  %v1130_v27 = vld [vmem:[#allocation10 + $0x390] sm:$0xff] }
  0xd6   :  { %1050 = vmatpush.msrb.mxu0 %v1042_v56  ;;  %1070 = vmatpush.msrb.mxu1 %v1043_v57 }
  0xd7   :  { %968 = vmatpush.msra.mxu2 %v829_v31  ;;  %1164 = vmatpush.msrb.mxu3 %v1143_v48  ;;  %v1128_v31 = vld [vmem:[#allocation10 + $0x380] sm:$0xff] }
  0xd8   :  { %v2784_v45 = vpop.f32.mrf.mxu0  ;;  %v2786_v46 = vpop.f32.mrf.mxu1  ;;  %1051 = vmatpush.msrb.mxu0 %v1040_v61  ;;  %1071 = vmatpush.msrb.mxu1 %v1041_v0 }
  0xd9   :  { %969 = vmatpush.msra.mxu2 %v827_v39  ;;  %1165 = vmatpush.msrb.mxu3 %v1141_v55  ;;  %v1126_v55 = vld [vmem:[#allocation10 + $0x370] sm:$0xff] }
  0xda   :  { %1052 = vmatpush.msrb.mxu0 %v1038_v5  ;;  %1072 = vmatpush.msrb.mxu1 %v1039_v6  ;;  %v1029_v5 = vld [vmem:[#allocation10 + $0x268] sm:$0xff] }
  0xdb   :  { %1144 = vmatpush.msrb.mxu2 %v1142_v47  ;;  %1166 = vmatpush.msrb.mxu3 %v1139_v60 }
  0xdc   :  { %1053 = vmatpush.msrb.mxu0 %v1036_v10  ;;  %1073 = vmatpush.msrb.mxu1 %v1037_v13  ;;  %v1124_v13 = vld [vmem:[#allocation10 + $0x360] sm:$0xff] }
  0xdd   :  { %1145 = vmatpush.msrb.mxu2 %v1140_v54  ;;  %1167 = vmatpush.msrb.mxu3 %v1137_v2  ;;  %v1031_v54 = vld [vmem:[#allocation10 + $0x278] sm:$0xff]  ;;  %v1028_v2 = vld [vmem:[#allocation10 + $0x260] sm:$0xff] }
  0xde   :  { %1054 = vmatpush.msrb.mxu0 %v1034_v37  ;;  %1074 = vmatpush.msrb.mxu1 %v1035_v26  ;;  %v1123_v26 = vld [vmem:[#allocation10 + $0x358] sm:$0xff] }
  0xdf   :  { %v2788_v58 = vpop.f32.mrf.mxu2  ;;  %v2790_v51 = vpop.f32.mrf.mxu3  ;;  %1146 = vmatpush.msrb.mxu2 %v1138_v59  ;;  %1168 = vmatpush.msrb.mxu3 %v1135_v8 }
  0xe0   :  { %1055 = vmatpush.msrb.mxu0 %v1032_v29  ;;  %1075 = vmatpush.msrb.mxu1 %v1033_v30 }
  0xe1   :  { %1147 = vmatpush.msrb.mxu2 %v1136_v1  ;;  %1169 = vmatpush.msrb.mxu3 %v1133_v23  ;;  %v1127_v1 = vld [vmem:[#allocation10 + $0x378] sm:$0xff]  ;;  %v1026_v23 = vld [vmem:[#allocation10 + $0x250] sm:$0xff] }
  0xe2   :  { %1056 = vmatpush.msrb.mxu0 %v1030_v53  ;;  %1076 = vmatpush.msrb.mxu1 %v1031_v54 }
  0xe3   :  { %1148 = vmatpush.msrb.mxu2 %v1134_v7  ;;  %1170 = vmatpush.msrb.mxu3 %v1131_v28 }
  0xe4   :  { %v2792_v62 = vpop.f32.mrf.mxu0  ;;  %v2794_v63 = vpop.f32.mrf.mxu1  ;;  %1057 = vmatpush.msrb.mxu0 %v1028_v2  ;;  %1077 = vmatpush.msrb.mxu1 %v1029_v5  ;;  %v1119_v2 = vld [vmem:[#allocation10 + $0x338] sm:$0xff]  ;;  %v1020_v5 = vld [vmem:[#allocation10 + $0x220] sm:$0xff] }
  0xe5   :  { %1149 = vmatpush.msrb.mxu2 %v1132_v19  ;;  %v1125_v19 = vld [vmem:[#allocation10 + $0x368] sm:$0xff] }
  0xe6   :  { %1058 = vmatpush.msrb.mxu0 %v1026_v23  ;;  %v1018_v23 = vld [vmem:[#allocation10 + $0x210] sm:$0xff] }
  0xe7   :  { %1150 = vmatpush.msrb.mxu2 %v1130_v27 }
  0xe9   :  { %1151 = vmatpush.msrb.mxu2 %v1128_v31 }
  0xeb   :  { %v2796_v11 = vpop.f32.mrf.mxu2  ;;  %v2798_v12 = vpop.f32.mrf.mxu3  ;;  %1152 = vmatpush.msrb.mxu2 %v1126_v55 }
  0xed   :  { %1153 = vmatpush.msrb.mxu2 %v1124_v13  ;;  %v1116_v13 = vld [vmem:[#allocation10 + $0x320] sm:$0xff] }
  0xee   :  { %v2800_v17 = vpop.f32.mrf.mxu0  ;;  %v2802_v22 = vpop.f32.mrf.mxu1 }
  0xf5   :  { %v2804_v40 = vpop.f32.mrf.mxu2  ;;  %v2806_v41 = vpop.f32.mrf.mxu3 }
  0xf8   :  { %v2808_v49 = vpop.f32.mrf.mxu0  ;;  %v2810_v50 = vpop.f32.mrf.mxu1 }
  0xff   :  { %v2812_v3 = vpop.f32.mrf.mxu2  ;;  %v2814_v4 = vpop.f32.mrf.mxu3 }
 0x102   :  { %v601_v9 = vpop.f32.mrf.mxu0  ;;  %v627_v44 = vpop.f32.mrf.mxu1 }
 0x103   :  { %v2817_v20 = vadd.f32 %v601_v9, %v2768_v14  ;;  %v2820_v21 = vadd.f32 %v627_v44, %v2770_v15  ;;  %v1129_v14 = vld [vmem:[#allocation10 + $0x388] sm:$0xff] }
 0x104   :  { %1171 = vmatpush.msrb.mxu3 %v1129_v14 }
 0x105   :  { %v860_v33 = vrot.slane %v2817_v20, 1  ;;  %v793_v15 = vrot.slane %v2820_v21, 7  ;;  %v994_v34 = vrot.slane %v2817_v20, 2  ;;  %v996_v35 = vrot.slane %v2820_v21, 1 }
 0x106   :  { %v1090_v39 = vrot.slane %v2817_v20, 3  ;;  %v1092_v32 = vrot.slane %v2820_v21, 2  ;;  %v1186_v42 = vrot.slane %v2817_v20, 4  ;;  %v1188_v48 = vrot.slane %v2820_v21, 3  ;;  %1172 = vmatpush.msrb.mxu3 %v1127_v1 }
 0x107   :  { %v874_v43 = vsel %vm813_vm1, %v860_v33, %v2820_v21  ;;  %v814_v47 = vsel %vm813_vm1, %v2817_v20, %v793_v15  ;;  %v1282_v52 = vrot.slane %v2817_v20, 5  ;;  %v1008_v56 = vsel %vm813_vm1, %v994_v34, %v996_v35  ;;  %v1024_v35 = vld [vmem:[#allocation10 + $0x240] sm:$0xff] }
 0x108   :  { %v2837_v57 = vsel %vm813_vm1, %v1090_v39, %v1092_v32  ;;  %v1284_v59 = vrot.slane %v2820_v21, 4  ;;  %v1378_v60 = vrot.slane %v2817_v20, 6  ;;  %v2842_v6 = vsel %vm813_vm1, %v1186_v42, %v1188_v48  ;;  %1173 = vmatpush.msrb.mxu3 %v1125_v19  ;;  %v1025_v39 = vld [vmem:[#allocation10 + $0x248] sm:$0xff]  ;;  %v1120_v32 = vld [vmem:[#allocation10 + $0x340] sm:$0xff]  ;;  %1059 = vmatpush.msrb.mxu0 %v1024_v35 }
 0x109   :  { %v653_v61 = vpop.f32.mrf.mxu2  ;;  %v679_v0 = vpop.f32.mrf.mxu3  ;;  %v1380_v7 = vrot.slane %v2820_v21, 5  ;;  %v1474_v8 = vrot.slane %v2817_v20, 7  ;;  %v1476_v9 = vrot.slane %v2820_v21, 6  ;;  %v1027_v20 = vld [vmem:[#allocation10 + $0x258] sm:$0xff]  ;;  %v1122_v21 = vld [vmem:[#allocation10 + $0x350] sm:$0xff]  ;;  %v1117_v19 = vld [vmem:[#allocation10 + $0x328] sm:$0xff] }
 0x10a   :  { %v2848_v44 = vadd.f32 %v653_v61, %v2772_v16  ;;  %v2851_v10 = vadd.f32 %v679_v0, %v2774_v18  ;;  %v2854_v37 = vsel %vm813_vm1, %v1282_v52, %v1284_v59  ;;  %1078 = vmatpush.msrb.mxu1 %v1027_v20  ;;  %1154 = vmatpush.msrb.mxu2 %v1122_v21  ;;  %v1118_v59 = vld [vmem:[#allocation10 + $0x330] sm:$0xff] }
 0x10b   :  { %v2857_v16 = vsel %vm813_vm1, %v1378_v60, %v1380_v7  ;;  %v2860_v18 = vsel %vm813_vm1, %v1474_v8, %v1476_v9  ;;  %1174 = vmatpush.msrb.mxu3 %v1123_v26  ;;  %v1021_v7 = vld [vmem:[#allocation10 + $0x228] sm:$0xff] }
 0x10c   :  { %v604_v27 = vpop.f32.mrf.mxu0  ;;  %v630_v28 = vpop.f32.mrf.mxu1  ;;  %v862_v29 = vrot.slane %v2848_v44, 7  ;;  %v864_v30 = vrot.slane %v2851_v10, 6  ;;  %v796_v31 = vrot.slane %v2848_v44, 6  ;;  %v799_v14 = vrot.slane %v2851_v10, 5  ;;  %1079 = vmatpush.msrb.mxu1 %v1025_v39  ;;  %1155 = vmatpush.msrb.mxu2 %v1120_v32 }
 0x10d   :  { %v2867_v33 = vadd.f32 %v604_v27, %v2776_v24  ;;  %v2870_v15 = vadd.f32 %v630_v28, %v2778_v25  ;;  %v998_v34 = vrot.slane %v2851_v10, 7  ;;  %v1009_v24 = vsel %vm815_vm2, %v1008_v56, %v2848_v44  ;;  %v1121_v25 = vld [vmem:[#allocation10 + $0x348] sm:$0xff]  ;;  %v1023_v56 = vld [vmem:[#allocation10 + $0x238] sm:$0xff] }
 0x10e   :  { %v875_v42 = vsel %vm815_vm2, %v874_v43, %v862_v29  ;;  %v816_v48 = vsel %vm815_vm2, %v814_v47, %v796_v31  ;;  %v1094_v52 = vrot.slane %v2848_v44, 1  ;;  %v1190_v43 = vrot.slane %v2848_v44, 2  ;;  %1175 = vmatpush.msrb.mxu3 %v1121_v25  ;;  %v1022_v47 = vld [vmem:[#allocation10 + $0x230] sm:$0xff]  ;;  %1080 = vmatpush.msrb.mxu1 %v1023_v56  ;;  %v1115_v31 = vld [vmem:[#allocation10 + $0x318] sm:$0xff]  ;;  %v1017_v25 = vld [vmem:[#allocation10 + $0x208] sm:$0xff] }
 0x10f   :  { %v2879_v53 = vsel %vm817_vm3, %v875_v42, %v864_v30  ;;  %v2882_v54 = vsel %vm817_vm3, %v816_v48, %v799_v14  ;;  %v2885_v55 = vsel %vm817_vm3, %v1009_v24, %v998_v34  ;;  %v1192_v61 = vrot.slane %v2851_v10, 1  ;;  %1060 = vmatpush.msrb.mxu0 %v1022_v47  ;;  %1156 = vmatpush.msrb.mxu2 %v1118_v59  ;;  %v1114_v30 = vld [vmem:[#allocation10 + $0x310] sm:$0xff] }
 0x110   :  { %v1105_v60 = vsel %vm815_vm2, %v2837_v57, %v1094_v52  ;;  %v1286_v0 = vrot.slane %v2848_v44, 3  ;;  %v1288_v1 = vrot.slane %v2851_v10, 2  ;;  %v1201_v9 = vsel %vm815_vm2, %v2842_v6, %v1190_v43  ;;  %1176 = vmatpush.msrb.mxu3 %v1119_v2  ;;  %1081 = vmatpush.msrb.mxu1 %v1021_v7  ;;  %v1019_v6 = vld [vmem:[#allocation10 + $0x218] sm:$0xff]  ;;  %v1016_v52 = vld [vmem:[#allocation10 + $0x200] sm:$0xff] }
 0x111   :  { %v2895_v8 = vsel %vm817_vm3, %v1105_v60, %v2851_v10  ;;  %v1382_v57 = vrot.slane %v2848_v44, 4  ;;  %v2901_v20 = vsel %vm817_vm3, %v1201_v9, %v1192_v61  ;;  %v1384_v26 = vrot.slane %v2851_v10, 3  ;;  %1061 = vmatpush.msrb.mxu0 %v1020_v5  ;;  %1157 = vmatpush.msrb.mxu2 %v1116_v13  ;;  %v1112_v43 = vld [vmem:[#allocation10 + $0x300] sm:$0xff] }
 0x112   :  { %v1297_v21 = vsel %vm815_vm2, %v2854_v37, %v1286_v0  ;;  %v1478_v27 = vrot.slane %v2848_v44, 5  ;;  %v1480_v35 = vrot.slane %v2851_v10, 4  ;;  %v1571_v37 = vrot.slane %v2870_v15, 7  ;;  %1177 = vmatpush.msrb.mxu3 %v1117_v19  ;;  %1082 = vmatpush.msrb.mxu1 %v1019_v6  ;;  %v1113_v0 = vld [vmem:[#allocation10 + $0x308] sm:$0xff] }
 0x113   :  { %v656_v28 = vpop.f32.mrf.mxu2  ;;  %v682_v29 = vpop.f32.mrf.mxu3  ;;  %v2908_v14 = vsel %vm817_vm3, %v1297_v21, %v1288_v1  ;;  %v1393_v34 = vsel %vm815_vm2, %v2857_v16, %v1382_v57  ;;  %v1674_v42 = vrot.slane %v2867_v33, 1  ;;  %1062 = vmatpush.msrb.mxu0 %v1018_v23  ;;  %1158 = vmatpush.msrb.mxu2 %v1114_v30  ;;  %v1866_v21 = vrot.slane %v2867_v33, 3 }
 0x114   :  { %v2915_v39 = vadd.f32 %v656_v28, %v2780_v36  ;;  %v2918_v44 = vadd.f32 %v682_v29, %v2782_v38  ;;  %v2921_v32 = vsel %vm817_vm3, %v1393_v34, %v1384_v26  ;;  %v1489_v10 = vsel %vm815_vm2, %v2860_v18, %v1478_v27  ;;  %1178 = vmatpush.msrb.mxu3 %v1115_v31 }
 0x115   :  { %v1591_v16 = vsel %vm813_vm1, %v2867_v33, %v1571_v37  ;;  %v1770_v36 = vrot.slane %v2867_v33, 2  ;;  %v1772_v38 = vrot.slane %v2870_v15, 1  ;;  %v2931_v47 = vsel %vm817_vm3, %v1489_v10, %v1480_v35  ;;  %1063 = vmatpush.msrb.mxu0 %v1016_v52  ;;  %1083 = vmatpush.msrb.mxu1 %v1017_v25 }
 0x116   :  { %v607_v48 = vpop.f32.mrf.mxu0  ;;  %v633_v24 = vpop.f32.mrf.mxu1  ;;  %v1574_v56 = vrot.slane %v2915_v39, 6  ;;  %v1577_v18 = vrot.slane %v2918_v44, 5  ;;  %v1676_v59 = vrot.slane %v2915_v39, 7  ;;  %v1678_v1 = vrot.slane %v2918_v44, 6  ;;  %1159 = vmatpush.msrb.mxu2 %v1112_v43  ;;  %1179 = vmatpush.msrb.mxu3 %v1113_v0 }
 0x117   :  { %v608_v60 = vadd.f32 %v607_v48, %v2784_v45  ;;  %v634_v61 = vadd.f32 %v633_v24, %v2786_v46  ;;  %v1688_v2 = vsel %vm813_vm1, %v1674_v42, %v2870_v15  ;;  %v1774_v9 = vrot.slane %v2918_v44, 7 }
 0x118   :  { %v1592_v5 = vsel %vm815_vm2, %v1591_v16, %v1574_v56  ;;  %v1689_v7 = vsel %vm815_vm2, %v1688_v2, %v1676_v59  ;;  %v1784_v45 = vsel %vm813_vm1, %v1770_v36, %v1772_v38  ;;  %v1868_v26 = vrot.slane %v2870_v15, 2 }
 0x119   :  { %v2347_v57 = vrot.slane %v634_v61, 7  ;;  %v2946_v46 = vsel %vm817_vm3, %v1592_v5, %v1577_v18  ;;  %v2949_v13 = vsel %vm817_vm3, %v1689_v7, %v1678_v1  ;;  %v1785_v19 = vsel %vm815_vm2, %v1784_v45, %v2915_v39 }
 0x11a   :  { %v2954_v23 = vsel %vm817_vm3, %v1785_v19, %v1774_v9  ;;  %v1870_v27 = vrot.slane %v2915_v39, 1  ;;  %v1962_v29 = vrot.slane %v2867_v33, 4  ;;  %v1964_v6 = vrot.slane %v2870_v15, 3 }
 0x11b   :  { %v2367_v28 = vsel %vm813_vm1, %v608_v60, %v2347_v57  ;;  %v1966_v30 = vrot.slane %v2915_v39, 2  ;;  %v1880_v31 = vsel %vm813_vm1, %v1866_v21, %v1868_v26  ;;  %v1968_v34 = vrot.slane %v2918_v44, 1 }
 0x11c   :  { %v2058_v35 = vrot.slane %v2867_v33, 5  ;;  %v2060_v37 = vrot.slane %v2870_v15, 4  ;;  %v1881_v16 = vsel %vm815_vm2, %v1880_v31, %v1870_v27  ;;  %v1976_v36 = vsel %vm813_vm1, %v1962_v29, %v1964_v6 }
 0x11d   :  { %v659_v42 = vpop.f32.mrf.mxu2  ;;  %v685_v10 = vpop.f32.mrf.mxu3  ;;  %v2062_v38 = vrot.slane %v2915_v39, 3  ;;  %v2064_v48 = vrot.slane %v2918_v44, 2  ;;  %v2975_v25 = vsel %vm817_vm3, %v1881_v16, %v2918_v44  ;;  %v1977_v43 = vsel %vm815_vm2, %v1976_v36, %v1966_v30 }
 0x11e   :  { %v660_v24 = vadd.f32 %v659_v42, %v2788_v58  ;;  %v686_v52 = vadd.f32 %v685_v10, %v2790_v51  ;;  %v2979_v56 = vsel %vm817_vm3, %v1977_v43, %v1968_v34  ;;  %v2072_v18 = vsel %vm813_vm1, %v2058_v35, %v2060_v37 }
 0x11f   :  { %v2154_v59 = vrot.slane %v2867_v33, 6  ;;  %v2156_v60 = vrot.slane %v2870_v15, 5  ;;  %v2073_v58 = vsel %vm815_vm2, %v2072_v18, %v2062_v38  ;;  %v2158_v51 = vrot.slane %v2915_v39, 4 }
 0x120   :  { %v2350_v61 = vrot.slane %v660_v24, 6  ;;  %v2353_v0 = vrot.slane %v686_v52, 5  ;;  %v2987_v1 = vsel %vm817_vm3, %v2073_v58, %v2064_v48  ;;  %v2160_v2 = vrot.slane %v2918_v44, 3 }
 0x121   :  { %v2168_v5 = vsel %vm813_vm1, %v2154_v59, %v2156_v60  ;;  %v2250_v7 = vrot.slane %v2867_v33, 7  ;;  %v2252_v57 = vrot.slane %v2870_v15, 6  ;;  %v2254_v19 = vrot.slane %v2915_v39, 5 }
 0x122   :  { %v2368_v9 = vsel %vm815_vm2, %v2367_v28, %v2350_v61  ;;  %v2169_v45 = vsel %vm815_vm2, %v2168_v5, %v2158_v51  ;;  %v2256_v27 = vrot.slane %v2918_v44, 4 }
 0x123   :  { %v2997_v21 = vsel %vm817_vm3, %v2368_v9, %v2353_v0  ;;  %v3000_v26 = vsel %vm817_vm3, %v2169_v45, %v2160_v2  ;;  %v2264_v29 = vsel %vm813_vm1, %v2250_v7, %v2252_v57 }
 0x124   :  { %v2265_v33 = vsel %vm815_vm2, %v2264_v29, %v2254_v19 }
 0x125   :  { %v3006_v28 = vsel %vm817_vm3, %v2265_v33, %v2256_v27 }
 0x128   :  { %v705_v6 = vpop.f32.mrf.mxu0  ;;  %v731_v30 = vpop.f32.mrf.mxu1 }
 0x129   :  { %v3009_v15 = vadd.f32 %v705_v6, %v2792_v62  ;;  %v3012_v39 = vadd.f32 %v731_v30, %v2794_v63  ;;  %v1239_v30 = vld [vmem:[#allocation10 + $0x4f8] sm:$0xff] }
 0x12b   :  { %v866_v31 = vrot.slane %v3009_v15, 5  ;;  %v802_v34 = vrot.slane %v3009_v15, 4  ;;  %v1000_v44 = vrot.slane %v3009_v15, 6  ;;  %v868_v42 = vrot.slane %v3012_v39, 4 }
 0x12c   :  { %v805_v10 = vrot.slane %v3012_v39, 3  ;;  %v1096_v62 = vrot.slane %v3009_v15, 7  ;;  %v1002_v52 = vrot.slane %v3012_v39, 5  ;;  %v1098_v61 = vrot.slane %v3012_v39, 6 }
 0x12d   :  { %v877_v48 = vsel %vm819_vm4, %v2879_v53, %v866_v31  ;;  %v820_v24 = vsel %vm819_vm4, %v2882_v54, %v802_v34  ;;  %v1011_v43 = vsel %vm819_vm4, %v2885_v55, %v1000_v44  ;;  %v1386_v27 = vrot.slane %v3009_v15, 2 }
 0x12e   :  { %v878_v60 = vsel %vm821_vm5, %v877_v48, %v868_v42  ;;  %v822_v53 = vsel %vm821_vm5, %v820_v24, %v805_v10  ;;  %v1107_v51 = vsel %vm819_vm4, %v2895_v8, %v1096_v62  ;;  %v1012_v9 = vsel %vm821_vm5, %v1011_v43, %v1002_v52  ;;  %v1238_v8 = vld [vmem:[#allocation10 + $0x4f0] sm:$0xff] }
 0x12f   :  { %v757_v35 = vpop.f32.mrf.mxu2  ;;  %v783_v37 = vpop.f32.mrf.mxu3  ;;  %v1108_v31 = vsel %vm821_vm5, %v1107_v51, %v1098_v61  ;;  %v1388_v34 = vrot.slane %v3012_v39, 1  ;;  %v1235_v61 = vld [vmem:[#allocation10 + $0x4d8] sm:$0xff] }
 0x130   :  { %v3021_v16 = vadd.f32 %v757_v35, %v2796_v11  ;;  %v3024_v63 = vadd.f32 %v783_v37, %v2798_v12  ;;  %v708_v36 = vpop.f32.mrf.mxu0  ;;  %v734_v38 = vpop.f32.mrf.mxu1  ;;  %v1334_v35 = vld [vmem:[#allocation10 + $0x5f0] sm:$0xff]  ;;  %v1335_v37 = vld [vmem:[#allocation10 + $0x5f8] sm:$0xff] }
 0x131   :  { %v3053_v29 = vadd.f32 %v708_v36, %v2800_v17  ;;  %v3058_v44 = vadd.f32 %v734_v38, %v2802_v22  ;;  %v1482_v36 = vrot.slane %v3009_v15, 3  ;;  %v1236_v22 = vld [vmem:[#allocation10 + $0x4e0] sm:$0xff]  ;;  %v1237_v38 = vld [vmem:[#allocation10 + $0x4e8] sm:$0xff] }
 0x132   :  { %v870_v11 = vrot.slane %v3021_v16, 3  ;;  %v872_v18 = vrot.slane %v3024_v63, 2  ;;  %v808_v12 = vrot.slane %v3021_v16, 2  ;;  %v811_v59 = vrot.slane %v3024_v63, 1 }
 0x133   :  { %v1004_v54 = vrot.slane %v3021_v16, 4  ;;  %v1100_v58 = vrot.slane %v3021_v16, 5  ;;  %v1006_v7 = vrot.slane %v3024_v63, 3  ;;  %v1102_v17 = vrot.slane %v3024_v63, 4 }
 0x134   :  { %v879_v0 = vsel %vm823_vm6, %v878_v60, %v870_v11  ;;  %v824_v55 = vsel %vm823_vm6, %v822_v53, %v808_v12  ;;  %v1390_v43 = vrot.slane %v3024_v63, 7  ;;  %v1332_v12 = vld [vmem:[#allocation10 + $0x5e0] sm:$0xff]  ;;  %v1580_v51 = vrot.slane %v3053_v29, 4 }
 0x135   :  { %v880_v2 = vsel %vm367_vm0, %v879_v0, %v872_v18  ;;  %v825_v5 = vsel %vm367_vm0, %v824_v55, %v811_v59  ;;  %v1013_v19 = vsel %vm823_vm6, %v1012_v9, %v1004_v54  ;;  %v1109_v62 = vsel %vm823_vm6, %v1108_v31, %v1100_v58  ;;  %v1333_v59 = vld [vmem:[#allocation10 + $0x5e8] sm:$0xff]  ;;  %v1234_v54 = vld [vmem:[#allocation10 + $0x4d0] sm:$0xff]  ;;  %v1331_v55 = vld [vmem:[#allocation10 + $0x5d8] sm:$0xff] }
 0x136   :  { %v881_v45 = vmul.f32 %v880_v2, %v880_v2  ;;  %v826_v57 = vmul.f32 %v825_v5, %v825_v5  ;;  %v1014_v52 = vsel %vm367_vm0, %v1013_v19, %v1006_v7  ;;  %v1330_v0 = vld [vmem:[#allocation10 + $0x5d0] sm:$0xff]  ;;  %v1232_v5 = vld [vmem:[#allocation10 + $0x4c0] sm:$0xff]  ;;  %v1233_v7 = vld [vmem:[#allocation10 + $0x4c8] sm:$0xff]  ;;  %v1110_v9 = vsel %vm367_vm0, %v1109_v62, %v1102_v17 }
 0x137   :  { %v760_v33 = vpop.f32.mrf.mxu2  ;;  %v786_v6 = vpop.f32.mrf.mxu3  ;;  %v1682_v62 = vrot.slane %v3058_v44, 4 }
 0x138   :  { %930 = vmatmul.f32.vlgmr.msra.gmra.mxu0 %v881_v45  ;;  %950 = vmatmul.f32.vlgmr.msra.gmra.mxu1 %v881_v45  ;;  %v711_v42 = vpop.f32.mrf.mxu0  ;;  %v737_v10 = vpop.f32.mrf.mxu1  ;;  %v3068_v11 = vadd.f32 %v760_v33, %v2804_v40  ;;  %v3071_v18 = vadd.f32 %v786_v6, %v2806_v41  ;;  %v1486_v41 = vrot.slane %v3021_v16, 1  ;;  %v1015_v33 = vmul.f32 %v1014_v52, %v1014_v52 }
 0x139   :  { %970 = vmatmul.f32.vlgmr.msra.gmra.mxu2 %v826_v57  ;;  %990 = vmatmul.f32.vlgmr.msra.gmra.mxu3 %v826_v57  ;;  %v712_v48 = vadd.f32 %v711_v42, %v2808_v49  ;;  %v738_v24 = vadd.f32 %v737_v10, %v2810_v50  ;;  %v1395_v49 = vsel %vm819_vm4, %v2921_v32, %v1386_v27  ;;  %v1484_v50 = vrot.slane %v3012_v39, 2  ;;  %v1329_v27 = vld [vmem:[#allocation10 + $0x5c8] sm:$0xff] }
 0x13a   :  { %1240 = vmatpush.msra.mxu0 %v1238_v8  ;;  %1260 = vmatpush.msra.mxu1 %v1239_v30  ;;  %v1396_v40 = vsel %vm821_vm5, %v1395_v49, %v1388_v34  ;;  %v1491_v32 = vsel %vm819_vm4, %v2931_v47, %v1482_v36  ;;  %v1583_v57 = vrot.slane %v3058_v44, 3  ;;  %v1328_v47 = vld [vmem:[#allocation10 + $0x5c0] sm:$0xff]  ;;  %v1586_v6 = vrot.slane %v3068_v11, 2 }
 0x13b   :  { %1336 = vmatpush.msra.mxu2 %v1334_v35  ;;  %1356 = vmatpush.msra.mxu3 %v1335_v37  ;;  %v2356_v60 = vrot.slane %v712_v48, 4  ;;  %v2359_v53 = vrot.slane %v738_v24, 3  ;;  %v1397_v58 = vsel %vm823_vm6, %v1396_v40, %v3021_v16  ;;  %v1589_v34 = vrot.slane %v3071_v18, 1  ;;  %v1230_v48 = vld [vmem:[#allocation10 + $0x4b0] sm:$0xff]  ;;  %v1231_v24 = vld [vmem:[#allocation10 + $0x4b8] sm:$0xff]  ;;  %v1228_v49 = vld [vmem:[#allocation10 + $0x4a0] sm:$0xff] }
 0x13c   :  { %1241 = vmatpush.msra.mxu0 %v1236_v22  ;;  %1261 = vmatpush.msra.mxu1 %v1237_v38  ;;  %v3087_v45 = vsel %vm367_vm0, %v1397_v58, %v1390_v43  ;;  %v1594_v35 = vsel %vm819_vm4, %v2946_v46, %v1580_v51  ;;  %v1680_v37 = vrot.slane %v3053_v29, 5  ;;  %v1111_v36 = vmul.f32 %v1110_v9, %v1110_v9  ;;  %v1327_v43 = vld [vmem:[#allocation10 + $0x5b8] sm:$0xff]  ;;  %v1322_v9 = vld [vmem:[#allocation10 + $0x590] sm:$0xff] }
 0x13d   :  { %v2370_v2 = vsel %vm819_vm4, %v2997_v21, %v2356_v60  ;;  %1337 = vmatpush.msra.mxu2 %v1332_v12  ;;  %1357 = vmatpush.msra.mxu3 %v1333_v59  ;;  %v1492_v21 = vsel %vm821_vm5, %v1491_v32, %v1484_v50  ;;  %v1595_v46 = vsel %vm821_vm5, %v1594_v35, %v1583_v57  ;;  %v1684_v22 = vrot.slane %v3068_v11, 3  ;;  %v1229_v50 = vld [vmem:[#allocation10 + $0x4a8] sm:$0xff]  ;;  %v1226_v32 = vld [vmem:[#allocation10 + $0x490] sm:$0xff]  ;;  %v1227_v51 = vld [vmem:[#allocation10 + $0x498] sm:$0xff] }
 0x13e   :  { %v2371_v19 = vsel %vm821_vm5, %v2370_v2, %v2359_v53  ;;  %1242 = vmatpush.msra.mxu0 %v1234_v54  ;;  %1262 = vmatpush.msra.mxu1 %v1235_v61  ;;  %v1493_v31 = vsel %vm823_vm6, %v1492_v21, %v1486_v41  ;;  %v1686_v38 = vrot.slane %v3071_v18, 2  ;;  %v1596_v12 = vsel %vm823_vm6, %v1595_v46, %v1586_v6  ;;  %v1324_v41 = vld [vmem:[#allocation10 + $0x5a0] sm:$0xff]  ;;  %v1323_v57 = vld [vmem:[#allocation10 + $0x598] sm:$0xff]  ;;  %v1318_v46 = vld [vmem:[#allocation10 + $0x570] sm:$0xff] }
 0x13f   :  { %1338 = vmatpush.msra.mxu2 %v1330_v0  ;;  %1358 = vmatpush.msra.mxu3 %v1331_v55  ;;  %v763_v8 = vpop.f32.mrf.mxu2  ;;  %v789_v30 = vpop.f32.mrf.mxu3  ;;  %v3102_v17 = vsel %vm367_vm0, %v1493_v31, %v3024_v63  ;;  %v1691_v59 = vsel %vm819_vm4, %v2949_v13, %v1680_v37  ;;  %v3112_v60 = vsel %vm367_vm0, %v1596_v12, %v1589_v34  ;;  %v1776_v54 = vrot.slane %v3053_v29, 6  ;;  %v1325_v0 = vld [vmem:[#allocation10 + $0x5a8] sm:$0xff] }
 0x140   :  { %1243 = vmatpush.msra.mxu0 %v1232_v5  ;;  %1263 = vmatpush.msra.mxu1 %v1233_v7  ;;  %v764_v42 = vadd.f32 %v763_v8, %v2812_v3  ;;  %v790_v10 = vadd.f32 %v789_v30, %v2814_v4  ;;  %v1326_v4 = vld [vmem:[#allocation10 + $0x5b0] sm:$0xff]  ;;  %v1692_v53 = vsel %vm821_vm5, %v1691_v59, %v1682_v62  ;;  %v1778_v61 = vrot.slane %v3058_v44, 5  ;;  %v1320_v30 = vld [vmem:[#allocation10 + $0x580] sm:$0xff]  ;;  %v1321_v31 = vld [vmem:[#allocation10 + $0x588] sm:$0xff] }
 0x141   :  { %1339 = vmatpush.msra.mxu2 %v1328_v47  ;;  %1359 = vmatpush.msra.mxu3 %v1329_v27  ;;  %v1693_v13 = vsel %vm823_vm6, %v1692_v53, %v1684_v22  ;;  %v1780_v55 = vrot.slane %v3068_v11, 4  ;;  %v1782_v5 = vrot.slane %v3071_v18, 3  ;;  %v1787_v7 = vsel %vm819_vm4, %v2954_v23, %v1776_v54  ;;  %v1224_v27 = vld [vmem:[#allocation10 + $0x480] sm:$0xff]  ;;  %v1223_v62 = vld [vmem:[#allocation10 + $0x478] sm:$0xff]  ;;  %v1317_v53 = vld [vmem:[#allocation10 + $0x568] sm:$0xff] }
 0x142   :  { %v2362_v3 = vrot.slane %v764_v42, 2  ;;  %v2365_v52 = vrot.slane %v790_v10, 1  ;;  %1064 = vmatmul.f32.vlgmr.msrb.gmra.mxu0 %v1015_v33  ;;  %1084 = vmatmul.f32.vlgmr.msrb.gmra.mxu1 %v1015_v33  ;;  %v3124_v2 = vsel %vm367_vm0, %v1693_v13, %v1686_v38  ;;  %v1872_v47 = vrot.slane %v3053_v29, 7  ;;  %v1225_v33 = vld [vmem:[#allocation10 + $0x488] sm:$0xff]  ;;  %v1222_v10 = vld [vmem:[#allocation10 + $0x470] sm:$0xff] }
 0x143   :  { %1160 = vmatmul.f32.vlgmr.msrb.gmra.mxu2 %v1111_v36  ;;  %1180 = vmatmul.f32.vlgmr.msrb.gmra.mxu3 %v1111_v36  ;;  %v1874_v6 = vrot.slane %v3058_v44, 6  ;;  %v1876_v8 = vrot.slane %v3068_v11, 5  ;;  %v1878_v23 = vrot.slane %v3071_v18, 4  ;;  %v1970_v37 = vrot.slane %v3058_v44, 7 }
 0x144   :  { %v2372_v40 = vsel %vm823_vm6, %v2371_v19, %v2362_v3  ;;  %1244 = vmatpush.msra.mxu0 %v1230_v48  ;;  %1264 = vmatpush.msra.mxu1 %v1231_v24  ;;  %v1788_v19 = vsel %vm821_vm5, %v1787_v7, %v1778_v61  ;;  %v1883_v35 = vsel %vm819_vm4, %v2975_v25, %v1872_v47  ;;  %v1972_v42 = vrot.slane %v3068_v11, 6  ;;  %v1319_v25 = vld [vmem:[#allocation10 + $0x578] sm:$0xff]  ;;  %v1216_v47 = vld [vmem:[#allocation10 + $0x440] sm:$0xff] }
 0x145   :  { %v3121_v58 = vsel %vm367_vm0, %v2372_v40, %v2365_v52  ;;  %1340 = vmatpush.msra.mxu2 %v1326_v4  ;;  %1360 = vmatpush.msra.mxu3 %v1327_v43  ;;  %v1789_v21 = vsel %vm823_vm6, %v1788_v19, %v1780_v55  ;;  %v1884_v36 = vsel %vm821_vm5, %v1883_v35, %v1874_v6  ;;  %v1974_v48 = vrot.slane %v3071_v18, 5  ;;  %v1220_v4 = vld [vmem:[#allocation10 + $0x460] sm:$0xff]  ;;  %v1221_v43 = vld [vmem:[#allocation10 + $0x468] sm:$0xff]  ;;  %v1214_v35 = vld [vmem:[#allocation10 + $0x430] sm:$0xff] }
 0x146   :  { %1245 = vmatpush.msra.mxu0 %v1228_v49  ;;  %1265 = vmatpush.msra.mxu1 %v1229_v50  ;;  %v3136_v34 = vsel %vm367_vm0, %v1789_v21, %v1782_v5  ;;  %v1979_v24 = vsel %vm819_vm4, %v2979_v56, %v3053_v29  ;;  %v1885_v22 = vsel %vm823_vm6, %v1884_v36, %v1876_v8  ;;  %v2066_v3 = vrot.slane %v3053_v29, 1  ;;  %v1316_v50 = vld [vmem:[#allocation10 + $0x560] sm:$0xff]  ;;  %v1314_v5 = vld [vmem:[#allocation10 + $0x550] sm:$0xff]  ;;  %v1213_v36 = vld [vmem:[#allocation10 + $0x428] sm:$0xff] }
 0x147   :  { %1341 = vmatpush.msra.mxu2 %v1324_v41  ;;  %1361 = vmatpush.msra.mxu3 %v1325_v0  ;;  %v1980_v38 = vsel %vm821_vm5, %v1979_v24, %v1970_v37  ;;  %v2068_v52 = vrot.slane %v3068_v11, 7  ;;  %v3152_v12 = vsel %vm367_vm0, %v1885_v22, %v1878_v23  ;;  %v2070_v59 = vrot.slane %v3071_v18, 6  ;;  %v1218_v41 = vld [vmem:[#allocation10 + $0x450] sm:$0xff]  ;;  %v1219_v0 = vld [vmem:[#allocation10 + $0x458] sm:$0xff]  ;;  %v1312_v8 = vld [vmem:[#allocation10 + $0x540] sm:$0xff] }
 0x148   :  { %1246 = vmatpush.msra.mxu0 %v1226_v32  ;;  %1266 = vmatpush.msra.mxu1 %v1227_v51  ;;  %v1981_v56 = vsel %vm823_vm6, %v1980_v38, %v1972_v42  ;;  %v2162_v49 = vrot.slane %v3053_v29, 2  ;;  %v2075_v61 = vsel %vm819_vm4, %v2987_v1, %v2066_v3  ;;  %v2164_v40 = vrot.slane %v3058_v44, 1  ;;  %v1315_v1 = vld [vmem:[#allocation10 + $0x558] sm:$0xff]  ;;  %v1210_v3 = vld [vmem:[#allocation10 + $0x410] sm:$0xff] }
 0x149   :  { %1342 = vmatpush.msra.mxu2 %v1322_v9  ;;  %1362 = vmatpush.msra.mxu3 %v1323_v57  ;;  %v3158_v54 = vsel %vm367_vm0, %v1981_v56, %v1974_v48  ;;  %v1290_v13 = vrot.slane %v3009_v15, 1  ;;  %v2076_v55 = vsel %vm821_vm5, %v2075_v61, %v3058_v44  ;;  %v2166_v32 = vrot.slane %v3071_v18, 7  ;;  %v1208_v56 = vld [vmem:[#allocation10 + $0x400] sm:$0xff] }
 0x14a   :  { %1247 = vmatpush.msra.mxu0 %v1224_v27  ;;  %1267 = vmatpush.msra.mxu1 %v1225_v33  ;;  %v2171_v51 = vsel %vm819_vm4, %v3000_v26, %v2162_v49  ;;  %v2077_v7 = vsel %vm823_vm6, %v2076_v55, %v2068_v52  ;;  %v2258_v57 = vrot.slane %v3053_v29, 3  ;;  %v2260_v19 = vrot.slane %v3058_v44, 2  ;;  %v1217_v27 = vld [vmem:[#allocation10 + $0x448] sm:$0xff]  ;;  %v1211_v52 = vld [vmem:[#allocation10 + $0x418] sm:$0xff]  ;;  %v1428_v55 = vld [vmem:[#allocation10 + $0x6e0] sm:$0xff] }
 0x14b   :  { %1343 = vmatpush.msra.mxu2 %v1320_v30  ;;  %1363 = vmatpush.msra.mxu3 %v1321_v31  ;;  %v2172_v9 = vsel %vm821_vm5, %v2171_v51, %v2164_v40  ;;  %v1194_v33 = vrot.slane %v3012_v39, 7  ;;  %v3175_v26 = vsel %vm367_vm0, %v2077_v7, %v2070_v59  ;;  %v2262_v6 = vrot.slane %v3068_v11, 1  ;;  %v1313_v29 = vld [vmem:[#allocation10 + $0x548] sm:$0xff]  ;;  %v1430_v40 = vld [vmem:[#allocation10 + $0x6f0] sm:$0xff]  ;;  %v1524_v51 = vld [vmem:[#allocation10 + $0x7e0] sm:$0xff] }
 0x14c   :  { %1248 = vmatpush.msra.mxu0 %v1222_v10  ;;  %1268 = vmatpush.msra.mxu1 %v1223_v62  ;;  %v2173_v21 = vsel %vm823_vm6, %v2172_v9, %v3068_v11  ;;  %v1196_v44 = vrot.slane %v3021_v16, 6  ;;  %v1203_v23 = vsel %vm819_vm4, %v2901_v20, %v3009_v15  ;;  %v2267_v31 = vsel %vm819_vm4, %v3006_v28, %v2258_v57  ;;  %v1215_v11 = vld [vmem:[#allocation10 + $0x438] sm:$0xff]  ;;  %v1310_v20 = vld [vmem:[#allocation10 + $0x530] sm:$0xff]  ;;  %v1212_v28 = vld [vmem:[#allocation10 + $0x420] sm:$0xff] }
 0x14d   :  { %1344 = vmatpush.msra.mxu2 %v1318_v46  ;;  %1364 = vmatpush.msra.mxu3 %v1319_v25  ;;  %v3185_v30 = vsel %vm367_vm0, %v2173_v21, %v2166_v32  ;;  %v1292_v37 = vrot.slane %v3021_v16, 7  ;;  %v1299_v42 = vsel %vm819_vm4, %v2908_v14, %v1290_v13  ;;  %v2268_v10 = vsel %vm821_vm5, %v2267_v31, %v2260_v19  ;;  %v1311_v15 = vld [vmem:[#allocation10 + $0x538] sm:$0xff]  ;;  %v1308_v14 = vld [vmem:[#allocation10 + $0x520] sm:$0xff]  ;;  %v1309_v46 = vld [vmem:[#allocation10 + $0x528] sm:$0xff] }
 0x14e   :  { %1249 = vmatpush.msra.mxu0 %v1220_v4  ;;  %1269 = vmatpush.msra.mxu1 %v1221_v43  ;;  %v2269_v62 = vsel %vm823_vm6, %v2268_v10, %v2262_v6  ;;  %v1198_v48 = vrot.slane %v3024_v63, 5  ;;  %v1204_v24 = vsel %vm821_vm5, %v1203_v23, %v1194_v33  ;;  %v1294_v22 = vrot.slane %v3024_v63, 6  ;;  %v1307_v43 = vld [vmem:[#allocation10 + $0x518] sm:$0xff]  ;;  %v1209_v59 = vld [vmem:[#allocation10 + $0x408] sm:$0xff]  ;;  %v1304_v63 = vld [vmem:[#allocation10 + $0x500] sm:$0xff] }
 0x14f   :  { %1345 = vmatpush.msra.mxu2 %v1316_v50  ;;  %1365 = vmatpush.msra.mxu3 %v1317_v53  ;;  %v3198_v16 = vsel %vm367_vm0, %v2269_v62, %v3071_v18  ;;  %v1205_v25 = vsel %vm823_vm6, %v1204_v24, %v1196_v44  ;;  %v1300_v38 = vsel %vm821_vm5, %v1299_v42, %v3012_v39  ;;  %v1306_v18 = vld [vmem:[#allocation10 + $0x510] sm:$0xff]  ;;  %v1305_v39 = vld [vmem:[#allocation10 + $0x508] sm:$0xff]  ;;  %v1527_v13 = vld [vmem:[#allocation10 + $0x7f8] sm:$0xff] }
 0x150   :  { %1250 = vmatpush.msra.mxu0 %v1218_v41  ;;  %1270 = vmatpush.msra.mxu1 %v1219_v0  ;;  %v1301_v4 = vsel %vm823_vm6, %v1300_v38, %v1292_v37  ;;  %v1206_v49 = vsel %vm367_vm0, %v1205_v25, %v1198_v48  ;;  %v1431_v41 = vld [vmem:[#allocation10 + $0x6f8] sm:$0xff]  ;;  %v1526_v0 = vld [vmem:[#allocation10 + $0x7f0] sm:$0xff]  ;;  %v1429_v32 = vld [vmem:[#allocation10 + $0x6e8] sm:$0xff] }
 0x151   :  { %1346 = vmatpush.msra.mxu2 %v1314_v5  ;;  %1366 = vmatpush.msra.mxu3 %v1315_v1  ;;  %v1302_v50 = vsel %vm367_vm0, %v1301_v4, %v1294_v22  ;;  %v1207_v53 = vmul.f32 %v1206_v49, %v1206_v49  ;;  %v1525_v5 = vld [vmem:[#allocation10 + $0x7e8] sm:$0xff]  ;;  %v1426_v1 = vld [vmem:[#allocation10 + $0x6d0] sm:$0xff]  ;;  %v1427_v7 = vld [vmem:[#allocation10 + $0x6d8] sm:$0xff] }
 0x152   :  { %1251 = vmatpush.msra.mxu0 %v1216_v47  ;;  %1271 = vmatpush.msra.mxu1 %v1217_v27  ;;  %v1303_v61 = vmul.f32 %v1302_v50, %v1302_v50  ;;  %v1522_v9 = vld [vmem:[#allocation10 + $0x7d0] sm:$0xff]  ;;  %v1523_v57 = vld [vmem:[#allocation10 + $0x7d8] sm:$0xff]  ;;  %v1424_v19 = vld [vmem:[#allocation10 + $0x6c0] sm:$0xff] }
 0x153   :  { %1347 = vmatpush.msra.mxu2 %v1312_v8  ;;  %1367 = vmatpush.msra.mxu3 %v1313_v29  ;;  %v1425_v47 = vld [vmem:[#allocation10 + $0x6c8] sm:$0xff]  ;;  %v1520_v27 = vld [vmem:[#allocation10 + $0x7c0] sm:$0xff]  ;;  %v1422_v21 = vld [vmem:[#allocation10 + $0x6b0] sm:$0xff] }
 0x154   :  { %1252 = vmatpush.msra.mxu0 %v1214_v35  ;;  %1272 = vmatpush.msra.mxu1 %v1215_v11  ;;  %v1521_v33 = vld [vmem:[#allocation10 + $0x7c8] sm:$0xff]  ;;  %v1423_v6 = vld [vmem:[#allocation10 + $0x6b8] sm:$0xff]  ;;  %v1518_v8 = vld [vmem:[#allocation10 + $0x7b0] sm:$0xff] }
 0x155   :  { %1348 = vmatpush.msra.mxu2 %v1310_v20  ;;  %1368 = vmatpush.msra.mxu3 %v1311_v15  ;;  %v1519_v29 = vld [vmem:[#allocation10 + $0x7b8] sm:$0xff]  ;;  %v1420_v44 = vld [vmem:[#allocation10 + $0x6a0] sm:$0xff]  ;;  %v1421_v23 = vld [vmem:[#allocation10 + $0x6a8] sm:$0xff] }
 0x156   :  { %1253 = vmatpush.msra.mxu0 %v1212_v28  ;;  %1273 = vmatpush.msra.mxu1 %v1213_v36  ;;  %v1516_v31 = vld [vmem:[#allocation10 + $0x7a0] sm:$0xff]  ;;  %v1517_v35 = vld [vmem:[#allocation10 + $0x7a8] sm:$0xff]  ;;  %v1418_v11 = vld [vmem:[#allocation10 + $0x690] sm:$0xff] }
 0x157   :  { %1349 = vmatpush.msra.mxu2 %v1308_v14  ;;  %1369 = vmatpush.msra.mxu3 %v1309_v46  ;;  %v1419_v37 = vld [vmem:[#allocation10 + $0x698] sm:$0xff]  ;;  %v1514_v42 = vld [vmem:[#allocation10 + $0x790] sm:$0xff]  ;;  %v1416_v20 = vld [vmem:[#allocation10 + $0x680] sm:$0xff] }
 0x158   :  { %1254 = vmatpush.msra.mxu0 %v1210_v3  ;;  %1274 = vmatpush.msra.mxu1 %v1211_v52  ;;  %v1515_v10 = vld [vmem:[#allocation10 + $0x798] sm:$0xff]  ;;  %v1417_v15 = vld [vmem:[#allocation10 + $0x688] sm:$0xff]  ;;  %v1512_v62 = vld [vmem:[#allocation10 + $0x780] sm:$0xff] }
 0x159   :  { %1350 = vmatpush.msra.mxu2 %v1306_v18  ;;  %1370 = vmatpush.msra.mxu3 %v1307_v43  ;;  %v1513_v28 = vld [vmem:[#allocation10 + $0x788] sm:$0xff]  ;;  %v1414_v36 = vld [vmem:[#allocation10 + $0x670] sm:$0xff]  ;;  %v1415_v48 = vld [vmem:[#allocation10 + $0x678] sm:$0xff] }
 0x15a   :  { %1255 = vmatpush.msra.mxu0 %v1208_v56  ;;  %1275 = vmatpush.msra.mxu1 %v1209_v59  ;;  %v1510_v24 = vld [vmem:[#allocation10 + $0x770] sm:$0xff]  ;;  %v1511_v14 = vld [vmem:[#allocation10 + $0x778] sm:$0xff]  ;;  %v1412_v46 = vld [vmem:[#allocation10 + $0x660] sm:$0xff] }
 0x15b   :  { %1351 = vmatpush.msra.mxu2 %v1304_v63  ;;  %1371 = vmatpush.msra.mxu3 %v1305_v39  ;;  %v1413_v25 = vld [vmem:[#allocation10 + $0x668] sm:$0xff]  ;;  %v1508_v22 = vld [vmem:[#allocation10 + $0x760] sm:$0xff]  ;;  %v1410_v3 = vld [vmem:[#allocation10 + $0x650] sm:$0xff] }
 0x15c   :  { %1256 = vmatmul.f32.vlgmr.msra.gmra.mxu0 %v1207_v53  ;;  %1276 = vmatmul.f32.vlgmr.msra.gmra.mxu1 %v1207_v53  ;;  %v1509_v38 = vld [vmem:[#allocation10 + $0x768] sm:$0xff]  ;;  %v1411_v52 = vld [vmem:[#allocation10 + $0x658] sm:$0xff]  ;;  %v1506_v4 = vld [vmem:[#allocation10 + $0x750] sm:$0xff] }
 0x15d   :  { %1352 = vmatmul.f32.vlgmr.msra.gmra.mxu2 %v1303_v61  ;;  %1372 = vmatmul.f32.vlgmr.msra.gmra.mxu3 %v1303_v61  ;;  %v1507_v18 = vld [vmem:[#allocation10 + $0x758] sm:$0xff]  ;;  %v1408_v43 = vld [vmem:[#allocation10 + $0x640] sm:$0xff]  ;;  %v1409_v56 = vld [vmem:[#allocation10 + $0x648] sm:$0xff] }
 0x15e   :  { %1432 = vmatpush.msrb.mxu0 %v1430_v40  ;;  %1452 = vmatpush.msrb.mxu1 %v1431_v41  ;;  %v1504_v59 = vld [vmem:[#allocation10 + $0x740] sm:$0xff]  ;;  %v1505_v49 = vld [vmem:[#allocation10 + $0x748] sm:$0xff]  ;;  %v1406_v63 = vld [vmem:[#allocation10 + $0x630] sm:$0xff] }
 0x15f   :  { %1528 = vmatpush.msrb.mxu2 %v1526_v0  ;;  %1548 = vmatpush.msrb.mxu3 %v1527_v13  ;;  %v1407_v39 = vld [vmem:[#allocation10 + $0x638] sm:$0xff]  ;;  %v1502_v50 = vld [vmem:[#allocation10 + $0x730] sm:$0xff]  ;;  %v1404_v61 = vld [vmem:[#allocation10 + $0x620] sm:$0xff] }
 0x160   :  { %1433 = vmatpush.msrb.mxu0 %v1428_v55  ;;  %1453 = vmatpush.msrb.mxu1 %v1429_v32  ;;  %v1503_v53 = vld [vmem:[#allocation10 + $0x738] sm:$0xff]  ;;  %v1405_v40 = vld [vmem:[#allocation10 + $0x628] sm:$0xff]  ;;  %v1500_v41 = vld [vmem:[#allocation10 + $0x720] sm:$0xff] }
 0x161   :  { %1529 = vmatpush.msrb.mxu2 %v1524_v51  ;;  %1549 = vmatpush.msrb.mxu3 %v1525_v5  ;;  %v1501_v0 = vld [vmem:[#allocation10 + $0x728] sm:$0xff]  ;;  %v1402_v13 = vld [vmem:[#allocation10 + $0x610] sm:$0xff]  ;;  %v1403_v55 = vld [vmem:[#allocation10 + $0x618] sm:$0xff] }
 0x162   :  { %1434 = vmatpush.msrb.mxu0 %v1426_v1  ;;  %1454 = vmatpush.msrb.mxu1 %v1427_v7  ;;  %v1498_v32 = vld [vmem:[#allocation10 + $0x710] sm:$0xff]  ;;  %v1499_v51 = vld [vmem:[#allocation10 + $0x718] sm:$0xff]  ;;  %v1400_v5 = vld [vmem:[#allocation10 + $0x600] sm:$0xff] }
 0x163   :  { %1530 = vmatpush.msrb.mxu2 %v1522_v9  ;;  %1550 = vmatpush.msrb.mxu3 %v1523_v57  ;;  %v1401_v1 = vld [vmem:[#allocation10 + $0x608] sm:$0xff]  ;;  %v1496_v7 = vld [vmem:[#allocation10 + $0x700] sm:$0xff]  ;;  %v1399_v57 = vmul.f32 %v3087_v45, %v3087_v45  ;;  %v1625_v45 = vld [vmem:[#allocation10 + $0x8d0] sm:$0xff] }
 0x164   :  { %1435 = vmatpush.msrb.mxu0 %v1424_v19  ;;  %1455 = vmatpush.msrb.mxu1 %v1425_v47  ;;  %v1497_v9 = vld [vmem:[#allocation10 + $0x708] sm:$0xff]  ;;  %v1495_v19 = vmul.f32 %v3102_v17, %v3102_v17  ;;  %v1629_v47 = vld [vmem:[#allocation10 + $0x8f0] sm:$0xff] }
 0x165   :  { %1531 = vmatpush.msrb.mxu2 %v1520_v27  ;;  %1551 = vmatpush.msrb.mxu3 %v1521_v33  ;;  %v1630_v27 = vld [vmem:[#allocation10 + $0x8f8] sm:$0xff]  ;;  %v1726_v33 = vld [vmem:[#allocation10 + $0x9f0] sm:$0xff] }
 0x166   :  { %1436 = vmatpush.msrb.mxu0 %v1422_v21  ;;  %1456 = vmatpush.msrb.mxu1 %v1423_v6  ;;  %v1727_v21 = vld [vmem:[#allocation10 + $0x9f8] sm:$0xff]  ;;  %v1627_v6 = vld [vmem:[#allocation10 + $0x8e0] sm:$0xff]  ;;  %v1722_v17 = vld [vmem:[#allocation10 + $0x9d0] sm:$0xff] }
 0x167   :  { %1532 = vmatpush.msrb.mxu2 %v1518_v8  ;;  %1552 = vmatpush.msrb.mxu3 %v1519_v29  ;;  %v1628_v8 = vld [vmem:[#allocation10 + $0x8e8] sm:$0xff]  ;;  %v1724_v29 = vld [vmem:[#allocation10 + $0x9e0] sm:$0xff] }
 0x168   :  { %1437 = vmatpush.msrb.mxu0 %v1420_v44  ;;  %1457 = vmatpush.msrb.mxu1 %v1421_v23  ;;  %v1725_v44 = vld [vmem:[#allocation10 + $0x9e8] sm:$0xff]  ;;  %v1626_v23 = vld [vmem:[#allocation10 + $0x8d8] sm:$0xff] }
 0x169   :  { %1533 = vmatpush.msrb.mxu2 %v1516_v31  ;;  %1553 = vmatpush.msrb.mxu3 %v1517_v35  ;;  %v1723_v31 = vld [vmem:[#allocation10 + $0x9d8] sm:$0xff]  ;;  %v1623_v35 = vld [vmem:[#allocation10 + $0x8c0] sm:$0xff] }
 0x16a   :  { %1438 = vmatpush.msrb.mxu0 %v1418_v11  ;;  %1458 = vmatpush.msrb.mxu1 %v1419_v37  ;;  %v1624_v11 = vld [vmem:[#allocation10 + $0x8c8] sm:$0xff]  ;;  %v1720_v37 = vld [vmem:[#allocation10 + $0x9c0] sm:$0xff] }
 0x16b   :  { %1534 = vmatpush.msrb.mxu2 %v1514_v42  ;;  %1554 = vmatpush.msrb.mxu3 %v1515_v10  ;;  %v1721_v42 = vld [vmem:[#allocation10 + $0x9c8] sm:$0xff]  ;;  %v1621_v10 = vld [vmem:[#allocation10 + $0x8b0] sm:$0xff] }
 0x16c   :  { %1439 = vmatpush.msrb.mxu0 %v1416_v20  ;;  %1459 = vmatpush.msrb.mxu1 %v1417_v15  ;;  %v1622_v20 = vld [vmem:[#allocation10 + $0x8b8] sm:$0xff]  ;;  %v1718_v15 = vld [vmem:[#allocation10 + $0x9b0] sm:$0xff] }
 0x16d   :  { %1535 = vmatpush.msrb.mxu2 %v1512_v62  ;;  %1555 = vmatpush.msrb.mxu3 %v1513_v28  ;;  %v1719_v62 = vld [vmem:[#allocation10 + $0x9b8] sm:$0xff]  ;;  %v1619_v28 = vld [vmem:[#allocation10 + $0x8a0] sm:$0xff] }
 0x16e   :  { %1440 = vmatpush.msrb.mxu0 %v1414_v36  ;;  %1460 = vmatpush.msrb.mxu1 %v1415_v48  ;;  %v1620_v36 = vld [vmem:[#allocation10 + $0x8a8] sm:$0xff]  ;;  %v1716_v48 = vld [vmem:[#allocation10 + $0x9a0] sm:$0xff] }
 0x16f   :  { %1536 = vmatpush.msrb.mxu2 %v1510_v24  ;;  %1556 = vmatpush.msrb.mxu3 %v1511_v14  ;;  %v1717_v24 = vld [vmem:[#allocation10 + $0x9a8] sm:$0xff]  ;;  %v1617_v14 = vld [vmem:[#allocation10 + $0x890] sm:$0xff] }
 0x170   :  { %1441 = vmatpush.msrb.mxu0 %v1412_v46  ;;  %1461 = vmatpush.msrb.mxu1 %v1413_v25  ;;  %v1618_v46 = vld [vmem:[#allocation10 + $0x898] sm:$0xff]  ;;  %v1714_v25 = vld [vmem:[#allocation10 + $0x990] sm:$0xff] }
 0x171   :  { %1537 = vmatpush.msrb.mxu2 %v1508_v22  ;;  %1557 = vmatpush.msrb.mxu3 %v1509_v38  ;;  %v1715_v22 = vld [vmem:[#allocation10 + $0x998] sm:$0xff]  ;;  %v1615_v38 = vld [vmem:[#allocation10 + $0x880] sm:$0xff] }
 0x172   :  { %1442 = vmatpush.msrb.mxu0 %v1410_v3  ;;  %1462 = vmatpush.msrb.mxu1 %v1411_v52  ;;  %v1616_v3 = vld [vmem:[#allocation10 + $0x888] sm:$0xff]  ;;  %v1712_v52 = vld [vmem:[#allocation10 + $0x980] sm:$0xff] }
 0x173   :  { %1538 = vmatpush.msrb.mxu2 %v1506_v4  ;;  %1558 = vmatpush.msrb.mxu3 %v1507_v18  ;;  %v1713_v4 = vld [vmem:[#allocation10 + $0x988] sm:$0xff]  ;;  %v1613_v18 = vld [vmem:[#allocation10 + $0x870] sm:$0xff] }
 0x174   :  { %1443 = vmatpush.msrb.mxu0 %v1408_v43  ;;  %1463 = vmatpush.msrb.mxu1 %v1409_v56  ;;  %v1614_v43 = vld [vmem:[#allocation10 + $0x878] sm:$0xff]  ;;  %v1710_v56 = vld [vmem:[#allocation10 + $0x970] sm:$0xff] }
 0x175   :  { %1539 = vmatpush.msrb.mxu2 %v1504_v59  ;;  %1559 = vmatpush.msrb.mxu3 %v1505_v49  ;;  %v1711_v59 = vld [vmem:[#allocation10 + $0x978] sm:$0xff]  ;;  %v1611_v49 = vld [vmem:[#allocation10 + $0x860] sm:$0xff] }
 0x176   :  { %1444 = vmatpush.msrb.mxu0 %v1406_v63  ;;  %1464 = vmatpush.msrb.mxu1 %v1407_v39  ;;  %v1612_v63 = vld [vmem:[#allocation10 + $0x868] sm:$0xff]  ;;  %v1708_v39 = vld [vmem:[#allocation10 + $0x960] sm:$0xff] }
 0x177   :  { %1540 = vmatpush.msrb.mxu2 %v1502_v50  ;;  %1560 = vmatpush.msrb.mxu3 %v1503_v53  ;;  %v1709_v50 = vld [vmem:[#allocation10 + $0x968] sm:$0xff]  ;;  %v1609_v53 = vld [vmem:[#allocation10 + $0x850] sm:$0xff] }
 0x178   :  { %1445 = vmatpush.msrb.mxu0 %v1404_v61  ;;  %1465 = vmatpush.msrb.mxu1 %v1405_v40  ;;  %v1610_v61 = vld [vmem:[#allocation10 + $0x858] sm:$0xff]  ;;  %v1706_v40 = vld [vmem:[#allocation10 + $0x950] sm:$0xff] }
 0x179   :  { %1541 = vmatpush.msrb.mxu2 %v1500_v41  ;;  %1561 = vmatpush.msrb.mxu3 %v1501_v0  ;;  %v1707_v41 = vld [vmem:[#allocation10 + $0x958] sm:$0xff]  ;;  %v1607_v0 = vld [vmem:[#allocation10 + $0x840] sm:$0xff] }
 0x17a   :  { %1446 = vmatpush.msrb.mxu0 %v1402_v13  ;;  %1466 = vmatpush.msrb.mxu1 %v1403_v55  ;;  %v1608_v13 = vld [vmem:[#allocation10 + $0x848] sm:$0xff]  ;;  %v1704_v55 = vld [vmem:[#allocation10 + $0x940] sm:$0xff] }
 0x17b   :  { %1542 = vmatpush.msrb.mxu2 %v1498_v32  ;;  %1562 = vmatpush.msrb.mxu3 %v1499_v51  ;;  %v1705_v32 = vld [vmem:[#allocation10 + $0x948] sm:$0xff]  ;;  %v1605_v51 = vld [vmem:[#allocation10 + $0x830] sm:$0xff] }
 0x17c   :  { %1447 = vmatpush.msrb.mxu0 %v1400_v5  ;;  %1467 = vmatpush.msrb.mxu1 %v1401_v1  ;;  %v1606_v5 = vld [vmem:[#allocation10 + $0x838] sm:$0xff]  ;;  %v1702_v1 = vld [vmem:[#allocation10 + $0x930] sm:$0xff] }
 0x17d   :  { %1543 = vmatpush.msrb.mxu2 %v1496_v7  ;;  %1563 = vmatpush.msrb.mxu3 %v1497_v9  ;;  %v1703_v7 = vld [vmem:[#allocation10 + $0x938] sm:$0xff]  ;;  %v1603_v9 = vld [vmem:[#allocation10 + $0x820] sm:$0xff] }
 0x17e   :  { %1448 = vmatmul.f32.vlgmr.msrb.gmra.mxu0 %v1399_v57  ;;  %1468 = vmatmul.f32.vlgmr.msrb.gmra.mxu1 %v1399_v57  ;;  %v1604_v57 = vld [vmem:[#allocation10 + $0x828] sm:$0xff] }
 0x17f   :  { %1544 = vmatmul.f32.vlgmr.msrb.gmra.mxu2 %v1495_v19  ;;  %1564 = vmatmul.f32.vlgmr.msrb.gmra.mxu3 %v1495_v19  ;;  %v1700_v19 = vld [vmem:[#allocation10 + $0x920] sm:$0xff] }
 0x180   :  { %1631 = vmatpush.msra.mxu0 %v1629_v47  ;;  %1651 = vmatpush.msra.mxu1 %v1630_v27  ;;  %v1701_v47 = vld [vmem:[#allocation10 + $0x928] sm:$0xff]  ;;  %v1601_v27 = vld [vmem:[#allocation10 + $0x810] sm:$0xff] }
 0x181   :  { %1728 = vmatpush.msra.mxu2 %v1726_v33  ;;  %1748 = vmatpush.msra.mxu3 %v1727_v21  ;;  %v1602_v33 = vld [vmem:[#allocation10 + $0x818] sm:$0xff]  ;;  %v1698_v21 = vld [vmem:[#allocation10 + $0x910] sm:$0xff] }
 0x182   :  { %1632 = vmatpush.msra.mxu0 %v1627_v6  ;;  %1652 = vmatpush.msra.mxu1 %v1628_v8  ;;  %v1699_v6 = vld [vmem:[#allocation10 + $0x918] sm:$0xff]  ;;  %v1599_v8 = vld [vmem:[#allocation10 + $0x800] sm:$0xff] }
 0x183   :  { %1729 = vmatpush.msra.mxu2 %v1724_v29  ;;  %1749 = vmatpush.msra.mxu3 %v1725_v44  ;;  %v1600_v29 = vld [vmem:[#allocation10 + $0x808] sm:$0xff]  ;;  %v1696_v44 = vld [vmem:[#allocation10 + $0x900] sm:$0xff] }
 0x184   :  { %1633 = vmatpush.msra.mxu0 %v1625_v45  ;;  %1653 = vmatpush.msra.mxu1 %v1626_v23  ;;  %v1697_v45 = vld [vmem:[#allocation10 + $0x908] sm:$0xff]  ;;  %v1598_v23 = vmul.f32 %v3112_v60, %v3112_v60  ;;  %v1818_v60 = vld [vmem:[#allocation10 + $0xad0] sm:$0xff] }
 0x185   :  { %1730 = vmatpush.msra.mxu2 %v1722_v17  ;;  %1750 = vmatpush.msra.mxu3 %v1723_v31  ;;  %v1695_v17 = vmul.f32 %v3124_v2, %v3124_v2  ;;  %v1822_v31 = vld [vmem:[#allocation10 + $0xaf0] sm:$0xff] }
 0x186   :  { %1634 = vmatpush.msra.mxu0 %v1623_v35  ;;  %1654 = vmatpush.msra.mxu1 %v1624_v11  ;;  %v1823_v35 = vld [vmem:[#allocation10 + $0xaf8] sm:$0xff]  ;;  %v1918_v11 = vld [vmem:[#allocation10 + $0xbf0] sm:$0xff] }
 0x187   :  { %1731 = vmatpush.msra.mxu2 %v1720_v37  ;;  %1751 = vmatpush.msra.mxu3 %v1721_v42  ;;  %v1919_v37 = vld [vmem:[#allocation10 + $0xbf8] sm:$0xff]  ;;  %v1820_v42 = vld [vmem:[#allocation10 + $0xae0] sm:$0xff]  ;;  %v1914_v2 = vld [vmem:[#allocation10 + $0xbd0] sm:$0xff] }
 0x188   :  { %1635 = vmatpush.msra.mxu0 %v1621_v10  ;;  %1655 = vmatpush.msra.mxu1 %v1622_v20  ;;  %v1821_v10 = vld [vmem:[#allocation10 + $0xae8] sm:$0xff]  ;;  %v1916_v20 = vld [vmem:[#allocation10 + $0xbe0] sm:$0xff] }
 0x189   :  { %1732 = vmatpush.msra.mxu2 %v1718_v15  ;;  %1752 = vmatpush.msra.mxu3 %v1719_v62  ;;  %v1917_v15 = vld [vmem:[#allocation10 + $0xbe8] sm:$0xff]  ;;  %v1819_v62 = vld [vmem:[#allocation10 + $0xad8] sm:$0xff] }
 0x18a   :  { %1636 = vmatpush.msra.mxu0 %v1619_v28  ;;  %1656 = vmatpush.msra.mxu1 %v1620_v36  ;;  %v1915_v28 = vld [vmem:[#allocation10 + $0xbd8] sm:$0xff]  ;;  %v1816_v36 = vld [vmem:[#allocation10 + $0xac0] sm:$0xff] }
 0x18b   :  { %1733 = vmatpush.msra.mxu2 %v1716_v48  ;;  %1753 = vmatpush.msra.mxu3 %v1717_v24  ;;  %v1817_v48 = vld [vmem:[#allocation10 + $0xac8] sm:$0xff]  ;;  %v1912_v24 = vld [vmem:[#allocation10 + $0xbc0] sm:$0xff] }
 0x18c   :  { %1637 = vmatpush.msra.mxu0 %v1617_v14  ;;  %1657 = vmatpush.msra.mxu1 %v1618_v46  ;;  %v1913_v14 = vld [vmem:[#allocation10 + $0xbc8] sm:$0xff]  ;;  %v1814_v46 = vld [vmem:[#allocation10 + $0xab0] sm:$0xff] }
 0x18d   :  { %1734 = vmatpush.msra.mxu2 %v1714_v25  ;;  %1754 = vmatpush.msra.mxu3 %v1715_v22  ;;  %v1815_v25 = vld [vmem:[#allocation10 + $0xab8] sm:$0xff]  ;;  %v1910_v22 = vld [vmem:[#allocation10 + $0xbb0] sm:$0xff] }
 0x18e   :  { %1638 = vmatpush.msra.mxu0 %v1615_v38  ;;  %1658 = vmatpush.msra.mxu1 %v1616_v3  ;;  %v1911_v38 = vld [vmem:[#allocation10 + $0xbb8] sm:$0xff]  ;;  %v1812_v3 = vld [vmem:[#allocation10 + $0xaa0] sm:$0xff] }
 0x18f   :  { %1735 = vmatpush.msra.mxu2 %v1712_v52  ;;  %1755 = vmatpush.msra.mxu3 %v1713_v4  ;;  %v1813_v52 = vld [vmem:[#allocation10 + $0xaa8] sm:$0xff]  ;;  %v1908_v4 = vld [vmem:[#allocation10 + $0xba0] sm:$0xff] }
 0x190   :  { %1639 = vmatpush.msra.mxu0 %v1613_v18  ;;  %1659 = vmatpush.msra.mxu1 %v1614_v43  ;;  %v1909_v18 = vld [vmem:[#allocation10 + $0xba8] sm:$0xff]  ;;  %v1810_v43 = vld [vmem:[#allocation10 + $0xa90] sm:$0xff] }
 0x191   :  { %1736 = vmatpush.msra.mxu2 %v1710_v56  ;;  %1756 = vmatpush.msra.mxu3 %v1711_v59  ;;  %v1811_v56 = vld [vmem:[#allocation10 + $0xa98] sm:$0xff]  ;;  %v1906_v59 = vld [vmem:[#allocation10 + $0xb90] sm:$0xff] }
 0x192   :  { %1640 = vmatpush.msra.mxu0 %v1611_v49  ;;  %1660 = vmatpush.msra.mxu1 %v1612_v63  ;;  %v1907_v49 = vld [vmem:[#allocation10 + $0xb98] sm:$0xff]  ;;  %v1808_v63 = vld [vmem:[#allocation10 + $0xa80] sm:$0xff] }
 0x193   :  { %1737 = vmatpush.msra.mxu2 %v1708_v39  ;;  %1757 = vmatpush.msra.mxu3 %v1709_v50  ;;  %v1809_v39 = vld [vmem:[#allocation10 + $0xa88] sm:$0xff]  ;;  %v1904_v50 = vld [vmem:[#allocation10 + $0xb80] sm:$0xff] }
 0x194   :  { %1641 = vmatpush.msra.mxu0 %v1609_v53  ;;  %1661 = vmatpush.msra.mxu1 %v1610_v61  ;;  %v1905_v53 = vld [vmem:[#allocation10 + $0xb88] sm:$0xff]  ;;  %v1806_v61 = vld [vmem:[#allocation10 + $0xa70] sm:$0xff] }
 0x195   :  { %1738 = vmatpush.msra.mxu2 %v1706_v40  ;;  %1758 = vmatpush.msra.mxu3 %v1707_v41  ;;  %v1807_v40 = vld [vmem:[#allocation10 + $0xa78] sm:$0xff]  ;;  %v1902_v41 = vld [vmem:[#allocation10 + $0xb70] sm:$0xff] }
 0x196   :  { %1642 = vmatpush.msra.mxu0 %v1607_v0  ;;  %1662 = vmatpush.msra.mxu1 %v1608_v13  ;;  %v1903_v0 = vld [vmem:[#allocation10 + $0xb78] sm:$0xff]  ;;  %v1804_v13 = vld [vmem:[#allocation10 + $0xa60] sm:$0xff] }
 0x197   :  { %1739 = vmatpush.msra.mxu2 %v1704_v55  ;;  %1759 = vmatpush.msra.mxu3 %v1705_v32  ;;  %v1805_v55 = vld [vmem:[#allocation10 + $0xa68] sm:$0xff]  ;;  %v1900_v32 = vld [vmem:[#allocation10 + $0xb60] sm:$0xff] }
 0x198   :  { %1643 = vmatpush.msra.mxu0 %v1605_v51  ;;  %1663 = vmatpush.msra.mxu1 %v1606_v5  ;;  %v1901_v51 = vld [vmem:[#allocation10 + $0xb68] sm:$0xff]  ;;  %v1802_v5 = vld [vmem:[#allocation10 + $0xa50] sm:$0xff] }
 0x199   :  { %1740 = vmatpush.msra.mxu2 %v1702_v1  ;;  %1760 = vmatpush.msra.mxu3 %v1703_v7  ;;  %v1803_v1 = vld [vmem:[#allocation10 + $0xa58] sm:$0xff]  ;;  %v1898_v7 = vld [vmem:[#allocation10 + $0xb50] sm:$0xff] }
 0x19a   :  { %1644 = vmatpush.msra.mxu0 %v1603_v9  ;;  %1664 = vmatpush.msra.mxu1 %v1604_v57  ;;  %v1899_v9 = vld [vmem:[#allocation10 + $0xb58] sm:$0xff]  ;;  %v1800_v57 = vld [vmem:[#allocation10 + $0xa40] sm:$0xff] }
 0x19b   :  { %1741 = vmatpush.msra.mxu2 %v1700_v19  ;;  %1761 = vmatpush.msra.mxu3 %v1701_v47  ;;  %v1801_v19 = vld [vmem:[#allocation10 + $0xa48] sm:$0xff]  ;;  %v1896_v47 = vld [vmem:[#allocation10 + $0xb40] sm:$0xff] }
 0x19c   :  { %1645 = vmatpush.msra.mxu0 %v1601_v27  ;;  %1665 = vmatpush.msra.mxu1 %v1602_v33  ;;  %v1897_v27 = vld [vmem:[#allocation10 + $0xb48] sm:$0xff]  ;;  %v1798_v33 = vld [vmem:[#allocation10 + $0xa30] sm:$0xff] }
 0x19d   :  { %1742 = vmatpush.msra.mxu2 %v1698_v21  ;;  %1762 = vmatpush.msra.mxu3 %v1699_v6  ;;  %v1799_v21 = vld [vmem:[#allocation10 + $0xa38] sm:$0xff]  ;;  %v1894_v6 = vld [vmem:[#allocation10 + $0xb30] sm:$0xff] }
 0x19e   :  { %1646 = vmatpush.msra.mxu0 %v1599_v8  ;;  %1666 = vmatpush.msra.mxu1 %v1600_v29  ;;  %v1895_v8 = vld [vmem:[#allocation10 + $0xb38] sm:$0xff]  ;;  %v1796_v29 = vld [vmem:[#allocation10 + $0xa20] sm:$0xff] }
 0x19f   :  { %1743 = vmatpush.msra.mxu2 %v1696_v44  ;;  %1763 = vmatpush.msra.mxu3 %v1697_v45  ;;  %v1797_v44 = vld [vmem:[#allocation10 + $0xa28] sm:$0xff]  ;;  %v1892_v45 = vld [vmem:[#allocation10 + $0xb20] sm:$0xff] }
 0x1a0   :  { %1647 = vmatmul.f32.vlgmr.msra.gmra.mxu0 %v1598_v23  ;;  %1667 = vmatmul.f32.vlgmr.msra.gmra.mxu1 %v1598_v23  ;;  %v1893_v23 = vld [vmem:[#allocation10 + $0xb28] sm:$0xff] }
 0x1a1   :  { %1744 = vmatmul.f32.vlgmr.msra.gmra.mxu2 %v1695_v17  ;;  %1764 = vmatmul.f32.vlgmr.msra.gmra.mxu3 %v1695_v17  ;;  %v1794_v17 = vld [vmem:[#allocation10 + $0xa10] sm:$0xff] }
 0x1a2   :  { %1824 = vmatpush.msrb.mxu0 %v1822_v31  ;;  %1844 = vmatpush.msrb.mxu1 %v1823_v35  ;;  %v1795_v31 = vld [vmem:[#allocation10 + $0xa18] sm:$0xff]  ;;  %v1890_v35 = vld [vmem:[#allocation10 + $0xb10] sm:$0xff] }
 0x1a3   :  { %1920 = vmatpush.msrb.mxu2 %v1918_v11  ;;  %1940 = vmatpush.msrb.mxu3 %v1919_v37  ;;  %v1891_v11 = vld [vmem:[#allocation10 + $0xb18] sm:$0xff]  ;;  %v1792_v37 = vld [vmem:[#allocation10 + $0xa00] sm:$0xff] }
 0x1a4   :  { %1825 = vmatpush.msrb.mxu0 %v1820_v42  ;;  %1845 = vmatpush.msrb.mxu1 %v1821_v10  ;;  %v1793_v42 = vld [vmem:[#allocation10 + $0xa08] sm:$0xff]  ;;  %v1888_v10 = vld [vmem:[#allocation10 + $0xb00] sm:$0xff] }
 0x1a5   :  { %1921 = vmatpush.msrb.mxu2 %v1916_v20  ;;  %1941 = vmatpush.msrb.mxu3 %v1917_v15  ;;  %v1889_v20 = vld [vmem:[#allocation10 + $0xb08] sm:$0xff]  ;;  %v1791_v15 = vmul.f32 %v3136_v34, %v3136_v34  ;;  %v2010_v34 = vld [vmem:[#allocation10 + $0xcd0] sm:$0xff] }
 0x1a6   :  { %1826 = vmatpush.msrb.mxu0 %v1818_v60  ;;  %1846 = vmatpush.msrb.mxu1 %v1819_v62  ;;  %v1887_v60 = vmul.f32 %v3152_v12, %v3152_v12  ;;  %v2014_v62 = vld [vmem:[#allocation10 + $0xcf0] sm:$0xff] }
 0x1a7   :  { %1922 = vmatpush.msrb.mxu2 %v1914_v2  ;;  %1942 = vmatpush.msrb.mxu3 %v1915_v28  ;;  %v2015_v2 = vld [vmem:[#allocation10 + $0xcf8] sm:$0xff]  ;;  %v2110_v28 = vld [vmem:[#allocation10 + $0xdf0] sm:$0xff] }
 0x1a8   :  { %1827 = vmatpush.msrb.mxu0 %v1816_v36  ;;  %1847 = vmatpush.msrb.mxu1 %v1817_v48  ;;  %v2111_v36 = vld [vmem:[#allocation10 + $0xdf8] sm:$0xff]  ;;  %v2012_v48 = vld [vmem:[#allocation10 + $0xce0] sm:$0xff]  ;;  %v2106_v12 = vld [vmem:[#allocation10 + $0xdd0] sm:$0xff] }
 0x1a9   :  { %1923 = vmatpush.msrb.mxu2 %v1912_v24  ;;  %1943 = vmatpush.msrb.mxu3 %v1913_v14  ;;  %v2013_v24 = vld [vmem:[#allocation10 + $0xce8] sm:$0xff]  ;;  %v2108_v14 = vld [vmem:[#allocation10 + $0xde0] sm:$0xff] }
 0x1aa   :  { %1828 = vmatpush.msrb.mxu0 %v1814_v46  ;;  %1848 = vmatpush.msrb.mxu1 %v1815_v25  ;;  %v2109_v46 = vld [vmem:[#allocation10 + $0xde8] sm:$0xff]  ;;  %v2011_v25 = vld [vmem:[#allocation10 + $0xcd8] sm:$0xff] }
 0x1ab   :  { %1924 = vmatpush.msrb.mxu2 %v1910_v22  ;;  %1944 = vmatpush.msrb.mxu3 %v1911_v38  ;;  %v2107_v22 = vld [vmem:[#allocation10 + $0xdd8] sm:$0xff]  ;;  %v2008_v38 = vld [vmem:[#allocation10 + $0xcc0] sm:$0xff] }
 0x1ac   :  { %1829 = vmatpush.msrb.mxu0 %v1812_v3  ;;  %1849 = vmatpush.msrb.mxu1 %v1813_v52  ;;  %v2009_v3 = vld [vmem:[#allocation10 + $0xcc8] sm:$0xff]  ;;  %v2104_v52 = vld [vmem:[#allocation10 + $0xdc0] sm:$0xff] }
 0x1ad   :  { %1925 = vmatpush.msrb.mxu2 %v1908_v4  ;;  %1945 = vmatpush.msrb.mxu3 %v1909_v18  ;;  %v2105_v4 = vld [vmem:[#allocation10 + $0xdc8] sm:$0xff]  ;;  %v2006_v18 = vld [vmem:[#allocation10 + $0xcb0] sm:$0xff] }
 0x1ae   :  { %1830 = vmatpush.msrb.mxu0 %v1810_v43  ;;  %1850 = vmatpush.msrb.mxu1 %v1811_v56  ;;  %v2007_v43 = vld [vmem:[#allocation10 + $0xcb8] sm:$0xff]  ;;  %v2102_v56 = vld [vmem:[#allocation10 + $0xdb0] sm:$0xff] }
 0x1af   :  { %1926 = vmatpush.msrb.mxu2 %v1906_v59  ;;  %1946 = vmatpush.msrb.mxu3 %v1907_v49  ;;  %v2103_v59 = vld [vmem:[#allocation10 + $0xdb8] sm:$0xff]  ;;  %v2004_v49 = vld [vmem:[#allocation10 + $0xca0] sm:$0xff] }
 0x1b0   :  { %1831 = vmatpush.msrb.mxu0 %v1808_v63  ;;  %1851 = vmatpush.msrb.mxu1 %v1809_v39  ;;  %v2005_v63 = vld [vmem:[#allocation10 + $0xca8] sm:$0xff]  ;;  %v2100_v39 = vld [vmem:[#allocation10 + $0xda0] sm:$0xff] }
 0x1b1   :  { %1927 = vmatpush.msrb.mxu2 %v1904_v50  ;;  %1947 = vmatpush.msrb.mxu3 %v1905_v53  ;;  %v2101_v50 = vld [vmem:[#allocation10 + $0xda8] sm:$0xff]  ;;  %v2002_v53 = vld [vmem:[#allocation10 + $0xc90] sm:$0xff] }
 0x1b2   :  { %1832 = vmatpush.msrb.mxu0 %v1806_v61  ;;  %1852 = vmatpush.msrb.mxu1 %v1807_v40  ;;  %v2003_v61 = vld [vmem:[#allocation10 + $0xc98] sm:$0xff]  ;;  %v2098_v40 = vld [vmem:[#allocation10 + $0xd90] sm:$0xff] }
 0x1b3   :  { %1928 = vmatpush.msrb.mxu2 %v1902_v41  ;;  %1948 = vmatpush.msrb.mxu3 %v1903_v0  ;;  %v2099_v41 = vld [vmem:[#allocation10 + $0xd98] sm:$0xff]  ;;  %v2000_v0 = vld [vmem:[#allocation10 + $0xc80] sm:$0xff] }
 0x1b4   :  { %1833 = vmatpush.msrb.mxu0 %v1804_v13  ;;  %1853 = vmatpush.msrb.mxu1 %v1805_v55  ;;  %v2001_v13 = vld [vmem:[#allocation10 + $0xc88] sm:$0xff]  ;;  %v2096_v55 = vld [vmem:[#allocation10 + $0xd80] sm:$0xff] }
 0x1b5   :  { %1929 = vmatpush.msrb.mxu2 %v1900_v32  ;;  %1949 = vmatpush.msrb.mxu3 %v1901_v51  ;;  %v2097_v32 = vld [vmem:[#allocation10 + $0xd88] sm:$0xff]  ;;  %v1998_v51 = vld [vmem:[#allocation10 + $0xc70] sm:$0xff] }
 0x1b6   :  { %1834 = vmatpush.msrb.mxu0 %v1802_v5  ;;  %1854 = vmatpush.msrb.mxu1 %v1803_v1  ;;  %v1999_v5 = vld [vmem:[#allocation10 + $0xc78] sm:$0xff]  ;;  %v2094_v1 = vld [vmem:[#allocation10 + $0xd70] sm:$0xff] }
 0x1b7   :  { %1930 = vmatpush.msrb.mxu2 %v1898_v7  ;;  %1950 = vmatpush.msrb.mxu3 %v1899_v9  ;;  %v2095_v7 = vld [vmem:[#allocation10 + $0xd78] sm:$0xff]  ;;  %v1996_v9 = vld [vmem:[#allocation10 + $0xc60] sm:$0xff] }
 0x1b8   :  { %1835 = vmatpush.msrb.mxu0 %v1800_v57  ;;  %1855 = vmatpush.msrb.mxu1 %v1801_v19  ;;  %v1997_v57 = vld [vmem:[#allocation10 + $0xc68] sm:$0xff]  ;;  %v2092_v19 = vld [vmem:[#allocation10 + $0xd60] sm:$0xff] }
 0x1b9   :  { %1931 = vmatpush.msrb.mxu2 %v1896_v47  ;;  %1951 = vmatpush.msrb.mxu3 %v1897_v27  ;;  %v2093_v47 = vld [vmem:[#allocation10 + $0xd68] sm:$0xff]  ;;  %v1994_v27 = vld [vmem:[#allocation10 + $0xc50] sm:$0xff] }
 0x1ba   :  { %1836 = vmatpush.msrb.mxu0 %v1798_v33  ;;  %1856 = vmatpush.msrb.mxu1 %v1799_v21  ;;  %v1995_v33 = vld [vmem:[#allocation10 + $0xc58] sm:$0xff]  ;;  %v2090_v21 = vld [vmem:[#allocation10 + $0xd50] sm:$0xff] }
 0x1bb   :  { %1932 = vmatpush.msrb.mxu2 %v1894_v6  ;;  %1952 = vmatpush.msrb.mxu3 %v1895_v8  ;;  %v2091_v6 = vld [vmem:[#allocation10 + $0xd58] sm:$0xff]  ;;  %v1992_v8 = vld [vmem:[#allocation10 + $0xc40] sm:$0xff] }
 0x1bc   :  { %1837 = vmatpush.msrb.mxu0 %v1796_v29  ;;  %1857 = vmatpush.msrb.mxu1 %v1797_v44  ;;  %v1993_v29 = vld [vmem:[#allocation10 + $0xc48] sm:$0xff]  ;;  %v2088_v44 = vld [vmem:[#allocation10 + $0xd40] sm:$0xff] }
 0x1bd   :  { %1933 = vmatpush.msrb.mxu2 %v1892_v45  ;;  %1953 = vmatpush.msrb.mxu3 %v1893_v23  ;;  %v2089_v45 = vld [vmem:[#allocation10 + $0xd48] sm:$0xff]  ;;  %v1990_v23 = vld [vmem:[#allocation10 + $0xc30] sm:$0xff] }
 0x1be   :  { %1838 = vmatpush.msrb.mxu0 %v1794_v17  ;;  %1858 = vmatpush.msrb.mxu1 %v1795_v31  ;;  %v1991_v17 = vld [vmem:[#allocation10 + $0xc38] sm:$0xff]  ;;  %v2086_v31 = vld [vmem:[#allocation10 + $0xd30] sm:$0xff] }
 0x1bf   :  { %1934 = vmatpush.msrb.mxu2 %v1890_v35  ;;  %1954 = vmatpush.msrb.mxu3 %v1891_v11  ;;  %v2087_v35 = vld [vmem:[#allocation10 + $0xd38] sm:$0xff]  ;;  %v1988_v11 = vld [vmem:[#allocation10 + $0xc20] sm:$0xff] }
 0x1c0   :  { %1839 = vmatpush.msrb.mxu0 %v1792_v37  ;;  %1859 = vmatpush.msrb.mxu1 %v1793_v42  ;;  %v1989_v37 = vld [vmem:[#allocation10 + $0xc28] sm:$0xff]  ;;  %v2084_v42 = vld [vmem:[#allocation10 + $0xd20] sm:$0xff] }
 0x1c1   :  { %1935 = vmatpush.msrb.mxu2 %v1888_v10  ;;  %1955 = vmatpush.msrb.mxu3 %v1889_v20  ;;  %v2085_v10 = vld [vmem:[#allocation10 + $0xd28] sm:$0xff]  ;;  %v1986_v20 = vld [vmem:[#allocation10 + $0xc10] sm:$0xff] }
 0x1c2   :  { %1840 = vmatmul.f32.vlgmr.msrb.gmra.mxu0 %v1791_v15  ;;  %1860 = vmatmul.f32.vlgmr.msrb.gmra.mxu1 %v1791_v15  ;;  %v1987_v15 = vld [vmem:[#allocation10 + $0xc18] sm:$0xff] }
 0x1c3   :  { %1936 = vmatmul.f32.vlgmr.msrb.gmra.mxu2 %v1887_v60  ;;  %1956 = vmatmul.f32.vlgmr.msrb.gmra.mxu3 %v1887_v60  ;;  %v2082_v60 = vld [vmem:[#allocation10 + $0xd10] sm:$0xff] }
 0x1c4   :  { %2016 = vmatpush.msra.mxu0 %v2014_v62  ;;  %2036 = vmatpush.msra.mxu1 %v2015_v2  ;;  %v2083_v62 = vld [vmem:[#allocation10 + $0xd18] sm:$0xff]  ;;  %v1984_v2 = vld [vmem:[#allocation10 + $0xc00] sm:$0xff] }
 0x1c5   :  { %2112 = vmatpush.msra.mxu2 %v2110_v28  ;;  %2132 = vmatpush.msra.mxu3 %v2111_v36  ;;  %v1985_v28 = vld [vmem:[#allocation10 + $0xc08] sm:$0xff]  ;;  %v2080_v36 = vld [vmem:[#allocation10 + $0xd00] sm:$0xff] }
 0x1c6   :  { %2017 = vmatpush.msra.mxu0 %v2012_v48  ;;  %2037 = vmatpush.msra.mxu1 %v2013_v24  ;;  %v2081_v48 = vld [vmem:[#allocation10 + $0xd08] sm:$0xff]  ;;  %v1983_v24 = vmul.f32 %v3158_v54, %v3158_v54  ;;  %v2202_v54 = vld [vmem:[#allocation10 + $0xed0] sm:$0xff] }
 0x1c7   :  { %2113 = vmatpush.msra.mxu2 %v2108_v14  ;;  %2133 = vmatpush.msra.mxu3 %v2109_v46  ;;  %v2079_v14 = vmul.f32 %v3175_v26, %v3175_v26  ;;  %v2206_v46 = vld [vmem:[#allocation10 + $0xef0] sm:$0xff] }
 0x1c8   :  { %2018 = vmatpush.msra.mxu0 %v2010_v34  ;;  %2038 = vmatpush.msra.mxu1 %v2011_v25  ;;  %v2207_v34 = vld [vmem:[#allocation10 + $0xef8] sm:$0xff]  ;;  %v2302_v25 = vld [vmem:[#allocation10 + $0xff0] sm:$0xff] }
 0x1c9   :  { %2114 = vmatpush.msra.mxu2 %v2106_v12  ;;  %2134 = vmatpush.msra.mxu3 %v2107_v22  ;;  %v2303_v12 = vld [vmem:[#allocation10 + $0xff8] sm:$0xff]  ;;  %v2204_v22 = vld [vmem:[#allocation10 + $0xee0] sm:$0xff]  ;;  %v2298_v26 = vld [vmem:[#allocation10 + $0xfd0] sm:$0xff] }
 0x1ca   :  { %2019 = vmatpush.msra.mxu0 %v2008_v38  ;;  %2039 = vmatpush.msra.mxu1 %v2009_v3  ;;  %v2205_v38 = vld [vmem:[#allocation10 + $0xee8] sm:$0xff]  ;;  %v2300_v3 = vld [vmem:[#allocation10 + $0xfe0] sm:$0xff] }
 0x1cb   :  { %2115 = vmatpush.msra.mxu2 %v2104_v52  ;;  %2135 = vmatpush.msra.mxu3 %v2105_v4  ;;  %v2301_v52 = vld [vmem:[#allocation10 + $0xfe8] sm:$0xff]  ;;  %v2203_v4 = vld [vmem:[#allocation10 + $0xed8] sm:$0xff] }
 0x1cc   :  { %2020 = vmatpush.msra.mxu0 %v2006_v18  ;;  %2040 = vmatpush.msra.mxu1 %v2007_v43  ;;  %v2299_v18 = vld [vmem:[#allocation10 + $0xfd8] sm:$0xff]  ;;  %v2200_v43 = vld [vmem:[#allocation10 + $0xec0] sm:$0xff] }
 0x1cd   :  { %2116 = vmatpush.msra.mxu2 %v2102_v56  ;;  %2136 = vmatpush.msra.mxu3 %v2103_v59  ;;  %v2201_v56 = vld [vmem:[#allocation10 + $0xec8] sm:$0xff]  ;;  %v2296_v59 = vld [vmem:[#allocation10 + $0xfc0] sm:$0xff] }
 0x1ce   :  { %2021 = vmatpush.msra.mxu0 %v2004_v49  ;;  %2041 = vmatpush.msra.mxu1 %v2005_v63  ;;  %v2297_v49 = vld [vmem:[#allocation10 + $0xfc8] sm:$0xff]  ;;  %v2198_v63 = vld [vmem:[#allocation10 + $0xeb0] sm:$0xff] }
 0x1cf   :  { %2117 = vmatpush.msra.mxu2 %v2100_v39  ;;  %2137 = vmatpush.msra.mxu3 %v2101_v50  ;;  %v2199_v39 = vld [vmem:[#allocation10 + $0xeb8] sm:$0xff]  ;;  %v2294_v50 = vld [vmem:[#allocation10 + $0xfb0] sm:$0xff] }
 0x1d0   :  { %2022 = vmatpush.msra.mxu0 %v2002_v53  ;;  %2042 = vmatpush.msra.mxu1 %v2003_v61  ;;  %v2295_v53 = vld [vmem:[#allocation10 + $0xfb8] sm:$0xff]  ;;  %v2196_v61 = vld [vmem:[#allocation10 + $0xea0] sm:$0xff] }
 0x1d1   :  { %2118 = vmatpush.msra.mxu2 %v2098_v40  ;;  %2138 = vmatpush.msra.mxu3 %v2099_v41  ;;  %v2197_v40 = vld [vmem:[#allocation10 + $0xea8] sm:$0xff]  ;;  %v2292_v41 = vld [vmem:[#allocation10 + $0xfa0] sm:$0xff] }
 0x1d2   :  { %2023 = vmatpush.msra.mxu0 %v2000_v0  ;;  %2043 = vmatpush.msra.mxu1 %v2001_v13  ;;  %v2293_v0 = vld [vmem:[#allocation10 + $0xfa8] sm:$0xff]  ;;  %v2194_v13 = vld [vmem:[#allocation10 + $0xe90] sm:$0xff] }
 0x1d3   :  { %2119 = vmatpush.msra.mxu2 %v2096_v55  ;;  %2139 = vmatpush.msra.mxu3 %v2097_v32  ;;  %v2195_v55 = vld [vmem:[#allocation10 + $0xe98] sm:$0xff]  ;;  %v2290_v32 = vld [vmem:[#allocation10 + $0xf90] sm:$0xff] }
 0x1d4   :  { %2024 = vmatpush.msra.mxu0 %v1998_v51  ;;  %2044 = vmatpush.msra.mxu1 %v1999_v5  ;;  %v2291_v51 = vld [vmem:[#allocation10 + $0xf98] sm:$0xff]  ;;  %v2192_v5 = vld [vmem:[#allocation10 + $0xe80] sm:$0xff] }
 0x1d5   :  { %2120 = vmatpush.msra.mxu2 %v2094_v1  ;;  %2140 = vmatpush.msra.mxu3 %v2095_v7  ;;  %v2193_v1 = vld [vmem:[#allocation10 + $0xe88] sm:$0xff]  ;;  %v2288_v7 = vld [vmem:[#allocation10 + $0xf80] sm:$0xff] }
 0x1d6   :  { %2025 = vmatpush.msra.mxu0 %v1996_v9  ;;  %2045 = vmatpush.msra.mxu1 %v1997_v57  ;;  %v2289_v9 = vld [vmem:[#allocation10 + $0xf88] sm:$0xff]  ;;  %v2190_v57 = vld [vmem:[#allocation10 + $0xe70] sm:$0xff] }
 0x1d7   :  { %2121 = vmatpush.msra.mxu2 %v2092_v19  ;;  %2141 = vmatpush.msra.mxu3 %v2093_v47  ;;  %v2191_v19 = vld [vmem:[#allocation10 + $0xe78] sm:$0xff]  ;;  %v2286_v47 = vld [vmem:[#allocation10 + $0xf70] sm:$0xff] }
 0x1d8   :  { %2026 = vmatpush.msra.mxu0 %v1994_v27  ;;  %2046 = vmatpush.msra.mxu1 %v1995_v33  ;;  %v2287_v27 = vld [vmem:[#allocation10 + $0xf78] sm:$0xff]  ;;  %v2188_v33 = vld [vmem:[#allocation10 + $0xe60] sm:$0xff] }
 0x1d9   :  { %2122 = vmatpush.msra.mxu2 %v2090_v21  ;;  %2142 = vmatpush.msra.mxu3 %v2091_v6  ;;  %v2189_v21 = vld [vmem:[#allocation10 + $0xe68] sm:$0xff]  ;;  %v2284_v6 = vld [vmem:[#allocation10 + $0xf60] sm:$0xff] }
 0x1da   :  { %2027 = vmatpush.msra.mxu0 %v1992_v8  ;;  %2047 = vmatpush.msra.mxu1 %v1993_v29  ;;  %v2285_v8 = vld [vmem:[#allocation10 + $0xf68] sm:$0xff]  ;;  %v2186_v29 = vld [vmem:[#allocation10 + $0xe50] sm:$0xff] }
 0x1db   :  { %2123 = vmatpush.msra.mxu2 %v2088_v44  ;;  %2143 = vmatpush.msra.mxu3 %v2089_v45  ;;  %v2187_v44 = vld [vmem:[#allocation10 + $0xe58] sm:$0xff]  ;;  %v2282_v45 = vld [vmem:[#allocation10 + $0xf50] sm:$0xff] }
 0x1dc   :  { %2028 = vmatpush.msra.mxu0 %v1990_v23  ;;  %2048 = vmatpush.msra.mxu1 %v1991_v17  ;;  %v2283_v23 = vld [vmem:[#allocation10 + $0xf58] sm:$0xff]  ;;  %v2184_v17 = vld [vmem:[#allocation10 + $0xe40] sm:$0xff] }
 0x1dd   :  { %2124 = vmatpush.msra.mxu2 %v2086_v31  ;;  %2144 = vmatpush.msra.mxu3 %v2087_v35  ;;  %v2185_v31 = vld [vmem:[#allocation10 + $0xe48] sm:$0xff]  ;;  %v2280_v35 = vld [vmem:[#allocation10 + $0xf40] sm:$0xff] }
 0x1de   :  { %2029 = vmatpush.msra.mxu0 %v1988_v11  ;;  %2049 = vmatpush.msra.mxu1 %v1989_v37  ;;  %v2281_v11 = vld [vmem:[#allocation10 + $0xf48] sm:$0xff]  ;;  %v2182_v37 = vld [vmem:[#allocation10 + $0xe30] sm:$0xff] }
 0x1df   :  { %2125 = vmatpush.msra.mxu2 %v2084_v42  ;;  %2145 = vmatpush.msra.mxu3 %v2085_v10  ;;  %v2183_v42 = vld [vmem:[#allocation10 + $0xe38] sm:$0xff]  ;;  %v2278_v10 = vld [vmem:[#allocation10 + $0xf30] sm:$0xff] }
 0x1e0   :  { %2030 = vmatpush.msra.mxu0 %v1986_v20  ;;  %2050 = vmatpush.msra.mxu1 %v1987_v15  ;;  %v2279_v20 = vld [vmem:[#allocation10 + $0xf38] sm:$0xff]  ;;  %v2180_v15 = vld [vmem:[#allocation10 + $0xe20] sm:$0xff] }
 0x1e1   :  { %2126 = vmatpush.msra.mxu2 %v2082_v60  ;;  %2146 = vmatpush.msra.mxu3 %v2083_v62  ;;  %v2181_v60 = vld [vmem:[#allocation10 + $0xe28] sm:$0xff]  ;;  %v2276_v62 = vld [vmem:[#allocation10 + $0xf20] sm:$0xff] }
 0x1e2   :  { %2031 = vmatpush.msra.mxu0 %v1984_v2  ;;  %2051 = vmatpush.msra.mxu1 %v1985_v28  ;;  %v2277_v2 = vld [vmem:[#allocation10 + $0xf28] sm:$0xff]  ;;  %v2178_v28 = vld [vmem:[#allocation10 + $0xe10] sm:$0xff] }
 0x1e3   :  { %2127 = vmatpush.msra.mxu2 %v2080_v36  ;;  %2147 = vmatpush.msra.mxu3 %v2081_v48  ;;  %v2179_v36 = vld [vmem:[#allocation10 + $0xe18] sm:$0xff]  ;;  %v2274_v48 = vld [vmem:[#allocation10 + $0xf10] sm:$0xff] }
 0x1e4   :  { %2032 = vmatmul.f32.vlgmr.msra.gmra.mxu0 %v1983_v24  ;;  %2052 = vmatmul.f32.vlgmr.msra.gmra.mxu1 %v1983_v24  ;;  %v2275_v24 = vld [vmem:[#allocation10 + $0xf18] sm:$0xff] }
 0x1e5   :  { %2128 = vmatmul.f32.vlgmr.msra.gmra.mxu2 %v2079_v14  ;;  %2148 = vmatmul.f32.vlgmr.msra.gmra.mxu3 %v2079_v14  ;;  %v2176_v14 = vld [vmem:[#allocation10 + $0xe00] sm:$0xff] }
 0x1e6   :  { %2208 = vmatpush.msrb.mxu0 %v2206_v46  ;;  %2228 = vmatpush.msrb.mxu1 %v2207_v34  ;;  %v2177_v46 = vld [vmem:[#allocation10 + $0xe08] sm:$0xff]  ;;  %v2272_v34 = vld [vmem:[#allocation10 + $0xf00] sm:$0xff] }
 0x1e7   :  { %2304 = vmatpush.msrb.mxu2 %v2302_v25  ;;  %2324 = vmatpush.msrb.mxu3 %v2303_v12  ;;  %v2273_v25 = vld [vmem:[#allocation10 + $0xf08] sm:$0xff]  ;;  %v2175_v12 = vmul.f32 %v3185_v30, %v3185_v30  ;;  %v2399_v30 = vld [vmem:[#allocation10 + $0x10c0] sm:$0xff] }
 0x1e8   :  { %2209 = vmatpush.msrb.mxu0 %v2204_v22  ;;  %2229 = vmatpush.msrb.mxu1 %v2205_v38  ;;  %v2271_v22 = vmul.f32 %v3198_v16, %v3198_v16  ;;  %v2405_v38 = vld [vmem:[#allocation10 + $0x10f0] sm:$0xff]  ;;  %v2398_v16 = vld [vmem:[#allocation10 + $0x10b8] sm:$0xff] }
 0x1e9   :  { %2305 = vmatpush.msrb.mxu2 %v2300_v3  ;;  %2325 = vmatpush.msrb.mxu3 %v2301_v52  ;;  %v2406_v3 = vld [vmem:[#allocation10 + $0x10f8] sm:$0xff]  ;;  %v2403_v52 = vld [vmem:[#allocation10 + $0x10e0] sm:$0xff] }
 0x1ea   :  { %2210 = vmatpush.msrb.mxu0 %v2202_v54  ;;  %2230 = vmatpush.msrb.mxu1 %v2203_v4  ;;  %v2404_v54 = vld [vmem:[#allocation10 + $0x10e8] sm:$0xff]  ;;  %v2401_v4 = vld [vmem:[#allocation10 + $0x10d0] sm:$0xff] }
 0x1eb   :  { %2306 = vmatpush.msrb.mxu2 %v2298_v26  ;;  %2326 = vmatpush.msrb.mxu3 %v2299_v18  ;;  %v2402_v26 = vld [vmem:[#allocation10 + $0x10d8] sm:$0xff]  ;;  %v2400_v18 = vld [vmem:[#allocation10 + $0x10c8] sm:$0xff] }
 0x1ec   :  { %2211 = vmatpush.msrb.mxu0 %v2200_v43  ;;  %2231 = vmatpush.msrb.mxu1 %v2201_v56  ;;  %v2397_v43 = vld [vmem:[#allocation10 + $0x10b0] sm:$0xff]  ;;  %v2395_v56 = vld [vmem:[#allocation10 + $0x10a0] sm:$0xff] }
 0x1ed   :  { %2307 = vmatpush.msrb.mxu2 %v2296_v59  ;;  %2327 = vmatpush.msrb.mxu3 %v2297_v49  ;;  %v2396_v59 = vld [vmem:[#allocation10 + $0x10a8] sm:$0xff]  ;;  %v2393_v49 = vld [vmem:[#allocation10 + $0x1090] sm:$0xff] }
 0x1ee   :  { %2212 = vmatpush.msrb.mxu0 %v2198_v63  ;;  %2232 = vmatpush.msrb.mxu1 %v2199_v39  ;;  %v2394_v63 = vld [vmem:[#allocation10 + $0x1098] sm:$0xff]  ;;  %v2391_v39 = vld [vmem:[#allocation10 + $0x1080] sm:$0xff] }
 0x1ef   :  { %2308 = vmatpush.msrb.mxu2 %v2294_v50  ;;  %2328 = vmatpush.msrb.mxu3 %v2295_v53  ;;  %v2392_v50 = vld [vmem:[#allocation10 + $0x1088] sm:$0xff]  ;;  %v2389_v53 = vld [vmem:[#allocation10 + $0x1070] sm:$0xff] }
 0x1f0   :  { %2213 = vmatpush.msrb.mxu0 %v2196_v61  ;;  %2233 = vmatpush.msrb.mxu1 %v2197_v40  ;;  %v2390_v61 = vld [vmem:[#allocation10 + $0x1078] sm:$0xff]  ;;  %v2387_v40 = vld [vmem:[#allocation10 + $0x1060] sm:$0xff] }
 0x1f1   :  { %2309 = vmatpush.msrb.mxu2 %v2292_v41  ;;  %2329 = vmatpush.msrb.mxu3 %v2293_v0  ;;  %v2388_v41 = vld [vmem:[#allocation10 + $0x1068] sm:$0xff]  ;;  %v2385_v0 = vld [vmem:[#allocation10 + $0x1050] sm:$0xff] }
 0x1f2   :  { %2214 = vmatpush.msrb.mxu0 %v2194_v13  ;;  %2234 = vmatpush.msrb.mxu1 %v2195_v55  ;;  %v2386_v13 = vld [vmem:[#allocation10 + $0x1058] sm:$0xff]  ;;  %v2383_v55 = vld [vmem:[#allocation10 + $0x1040] sm:$0xff] }
 0x1f3   :  { %2310 = vmatpush.msrb.mxu2 %v2290_v32  ;;  %2330 = vmatpush.msrb.mxu3 %v2291_v51  ;;  %v2384_v32 = vld [vmem:[#allocation10 + $0x1048] sm:$0xff]  ;;  %v2381_v51 = vld [vmem:[#allocation10 + $0x1030] sm:$0xff] }
 0x1f4   :  { %2215 = vmatpush.msrb.mxu0 %v2192_v5  ;;  %2235 = vmatpush.msrb.mxu1 %v2193_v1  ;;  %v2382_v5 = vld [vmem:[#allocation10 + $0x1038] sm:$0xff]  ;;  %v2379_v1 = vld [vmem:[#allocation10 + $0x1020] sm:$0xff] }
 0x1f5   :  { %2311 = vmatpush.msrb.mxu2 %v2288_v7  ;;  %2331 = vmatpush.msrb.mxu3 %v2289_v9  ;;  %v2380_v7 = vld [vmem:[#allocation10 + $0x1028] sm:$0xff]  ;;  %v2377_v9 = vld [vmem:[#allocation10 + $0x1010] sm:$0xff] }
 0x1f6   :  { %2216 = vmatpush.msrb.mxu0 %v2190_v57  ;;  %2236 = vmatpush.msrb.mxu1 %v2191_v19  ;;  %v2378_v57 = vld [vmem:[#allocation10 + $0x1018] sm:$0xff]  ;;  %v2375_v19 = vld [vmem:[#allocation10 + $0x1000] sm:$0xff] }
 0x1f7   :  { %2312 = vmatpush.msrb.mxu2 %v2286_v47  ;;  %2332 = vmatpush.msrb.mxu3 %v2287_v27  ;;  %v2376_v47 = vld [vmem:[#allocation10 + $0x1008] sm:$0xff]  ;;  %v2374_v27 = vmul.f32 %v3121_v58, %v3121_v58 }
 0x1f8   :  { %2217 = vmatpush.msrb.mxu0 %v2188_v33  ;;  %2237 = vmatpush.msrb.mxu1 %v2189_v21  ;;  %v931_v33 = vpop.f32.mrf.mxu0  ;;  %v951_v21 = vpop.f32.mrf.mxu1 }
 0x1f9   :  { %2313 = vmatpush.msrb.mxu2 %v2284_v6  ;;  %2333 = vmatpush.msrb.mxu3 %v2285_v8  ;;  %v971_v6 = vpop.f32.mrf.mxu2  ;;  %v991_v8 = vpop.f32.mrf.mxu3 }
 0x1fa   :  { %2218 = vmatpush.msrb.mxu0 %v2186_v29  ;;  %2238 = vmatpush.msrb.mxu1 %v2187_v44 }
 0x1fb   :  { %2314 = vmatpush.msrb.mxu2 %v2282_v45  ;;  %2334 = vmatpush.msrb.mxu3 %v2283_v23 }
 0x1fc   :  { %2219 = vmatpush.msrb.mxu0 %v2184_v17  ;;  %2239 = vmatpush.msrb.mxu1 %v2185_v31 }
 0x1fd   :  { %2315 = vmatpush.msrb.mxu2 %v2280_v35  ;;  %2335 = vmatpush.msrb.mxu3 %v2281_v11 }
 0x1fe   :  { %2220 = vmatpush.msrb.mxu0 %v2182_v37  ;;  %2240 = vmatpush.msrb.mxu1 %v2183_v42 }
 0x1ff   :  { %2316 = vmatpush.msrb.mxu2 %v2278_v10  ;;  %2336 = vmatpush.msrb.mxu3 %v2279_v20 }
 0x200   :  { %2221 = vmatpush.msrb.mxu0 %v2180_v15  ;;  %2241 = vmatpush.msrb.mxu1 %v2181_v60  ;;  %v1065_v29 = vpop.f32.mrf.mxu0  ;;  %v1085_v44 = vpop.f32.mrf.mxu1  ;;  %v972_v60 = vadd.f32 %v971_v6, %v931_v33 }
 0x201   :  { %2317 = vmatpush.msrb.mxu2 %v2276_v62  ;;  %2337 = vmatpush.msrb.mxu3 %v2277_v2  ;;  %v1161_v45 = vpop.f32.mrf.mxu2  ;;  %v1181_v23 = vpop.f32.mrf.mxu3  ;;  %v992_v62 = vadd.f32 %v991_v8, %v951_v21 }
 0x202   :  { %2222 = vmatpush.msrb.mxu0 %v2178_v28  ;;  %2242 = vmatpush.msrb.mxu1 %v2179_v36  ;;  %v1088_v36 = vadd.f32 %v1065_v29, %v972_v60 }
 0x203   :  { %2318 = vmatpush.msrb.mxu2 %v2274_v48  ;;  %2338 = vmatpush.msrb.mxu3 %v2275_v24  ;;  %v1089_v48 = vadd.f32 %v1085_v44, %v992_v62 }
 0x204   :  { %2223 = vmatpush.msrb.mxu0 %v2176_v14  ;;  %2243 = vmatpush.msrb.mxu1 %v2177_v46  ;;  %v1184_v24 = vadd.f32 %v1161_v45, %v1088_v36 }
 0x205   :  { %2319 = vmatpush.msrb.mxu2 %v2272_v34  ;;  %2339 = vmatpush.msrb.mxu3 %v2273_v25  ;;  %v1185_v14 = vadd.f32 %v1181_v23, %v1089_v48 }
 0x206   :  { %2224 = vmatmul.f32.vlgmr.msrb.gmra.mxu0 %v2175_v12  ;;  %2244 = vmatmul.f32.vlgmr.msrb.gmra.mxu1 %v2175_v12 }
 0x207   :  { %2320 = vmatmul.f32.vlgmr.msrb.gmra.mxu2 %v2271_v22  ;;  %2340 = vmatmul.f32.vlgmr.msrb.gmra.mxu3 %v2271_v22 }
 0x208   :  { %2407 = vmatpush.msra.mxu0 %v2405_v38  ;;  %2427 = vmatpush.msra.mxu1 %v2406_v3  ;;  %v1257_v17 = vpop.f32.mrf.mxu0  ;;  %v1277_v31 = vpop.f32.mrf.mxu1 }
 0x209   :  { %v1353_v35 = vpop.f32.mrf.mxu2  ;;  %v1373_v11 = vpop.f32.mrf.mxu3  ;;  %v1280_v25 = vadd.f32 %v1257_v17, %v1184_v24  ;;  %v1281_v12 = vadd.f32 %v1277_v31, %v1185_v14 }
 0x20a   :  { %2408 = vmatpush.msra.mxu0 %v2403_v52  ;;  %2428 = vmatpush.msra.mxu1 %v2404_v54 }
 0x20b   :  { %v1376_v22 = vadd.f32 %v1353_v35, %v1280_v25  ;;  %v1377_v38 = vadd.f32 %v1373_v11, %v1281_v12 }
 0x20c   :  { %2409 = vmatpush.msra.mxu0 %v2401_v4  ;;  %2429 = vmatpush.msra.mxu1 %v2402_v26 }
 0x20e   :  { %2410 = vmatpush.msra.mxu0 %v2399_v30  ;;  %2430 = vmatpush.msra.mxu1 %v2400_v18 }
 0x210   :  { %2411 = vmatpush.msra.mxu0 %v2397_v43  ;;  %2431 = vmatpush.msra.mxu1 %v2398_v16  ;;  %v1449_v37 = vpop.f32.mrf.mxu0  ;;  %v1469_v42 = vpop.f32.mrf.mxu1 }
 0x211   :  { %v1545_v10 = vpop.f32.mrf.mxu2  ;;  %v1565_v58 = vpop.f32.mrf.mxu3  ;;  %v1472_v54 = vadd.f32 %v1449_v37, %v1376_v22  ;;  %v1473_v4 = vadd.f32 %v1469_v42, %v1377_v38 }
 0x212   :  { %2412 = vmatpush.msra.mxu0 %v2395_v56  ;;  %2432 = vmatpush.msra.mxu1 %v2396_v59 }
 0x213   :  { %v1568_v26 = vadd.f32 %v1545_v10, %v1472_v54  ;;  %v1569_v30 = vadd.f32 %v1565_v58, %v1473_v4 }
 0x214   :  { %2413 = vmatpush.msra.mxu0 %v2393_v49  ;;  %2433 = vmatpush.msra.mxu1 %v2394_v63 }
 0x216   :  { %2414 = vmatpush.msra.mxu0 %v2391_v39  ;;  %2434 = vmatpush.msra.mxu1 %v2392_v50 }
 0x218   :  { %2415 = vmatpush.msra.mxu0 %v2389_v53  ;;  %2435 = vmatpush.msra.mxu1 %v2390_v61 }
 0x21a   :  { %2416 = vmatpush.msra.mxu0 %v2387_v40  ;;  %2436 = vmatpush.msra.mxu1 %v2388_v41 }
 0x21c   :  { %2417 = vmatpush.msra.mxu0 %v2385_v0  ;;  %2437 = vmatpush.msra.mxu1 %v2386_v13 }
 0x21d   :  { %v1648_v20 = vpop.f32.mrf.mxu0  ;;  %v1668_v15 = vpop.f32.mrf.mxu1 }
 0x21e   :  { %2418 = vmatpush.msra.mxu0 %v2383_v55  ;;  %2438 = vmatpush.msra.mxu1 %v2384_v32  ;;  %v1671_v16 = vadd.f32 %v1648_v20, %v1568_v26  ;;  %v1672_v56 = vadd.f32 %v1668_v15, %v1569_v30 }
 0x220   :  { %2419 = vmatpush.msra.mxu0 %v2381_v51  ;;  %2439 = vmatpush.msra.mxu1 %v2382_v5 }
 0x222   :  { %2420 = vmatpush.msra.mxu0 %v2379_v1  ;;  %2440 = vmatpush.msra.mxu1 %v2380_v7 }
 0x224   :  { %2421 = vmatpush.msra.mxu0 %v2377_v9  ;;  %2441 = vmatpush.msra.mxu1 %v2378_v57  ;;  %v1745_v2 = vpop.f32.mrf.mxu2  ;;  %v1765_v28 = vpop.f32.mrf.mxu3 }
 0x225   :  { %v1768_v59 = vadd.f32 %v1745_v2, %v1671_v16  ;;  %v1769_v49 = vadd.f32 %v1765_v28, %v1672_v56 }
 0x226   :  { %2422 = vmatpush.msra.mxu0 %v2375_v19  ;;  %2442 = vmatpush.msra.mxu1 %v2376_v47 }
 0x227   :  { %2423 = vmatmul.f32.vlgmr.msra.gmra.mxu0 %v2374_v27  ;;  %2443 = vmatmul.f32.vlgmr.msra.gmra.mxu1 %v2374_v27 }
 0x23f   :  { %v1841_v46 = vpop.f32.mrf.mxu0  ;;  %v1861_v34 = vpop.f32.mrf.mxu1 }
 0x240   :  { %v1864_v50 = vadd.f32 %v1841_v46, %v1768_v59  ;;  %v1865_v53 = vadd.f32 %v1861_v34, %v1769_v49 }
 0x246   :  { %v1937_v3 = vpop.f32.mrf.mxu2  ;;  %v1957_v52 = vpop.f32.mrf.mxu3 }
 0x247   :  { %v1960_v61 = vadd.f32 %v1937_v3, %v1864_v50  ;;  %v1961_v40 = vadd.f32 %v1957_v52, %v1865_v53 }
 0x261   :  { %v2033_v18 = vpop.f32.mrf.mxu0  ;;  %v2053_v43 = vpop.f32.mrf.mxu1 }
 0x262   :  { %v2056_v13 = vadd.f32 %v2033_v18, %v1960_v61  ;;  %v2057_v55 = vadd.f32 %v2053_v43, %v1961_v40 }
 0x268   :  { %v2129_v63 = vpop.f32.mrf.mxu2  ;;  %v2149_v39 = vpop.f32.mrf.mxu3 }
 0x269   :  { %v2152_v32 = vadd.f32 %v2129_v63, %v2056_v13  ;;  %v2153_v51 = vadd.f32 %v2149_v39, %v2057_v55 }
 0x283   :  { %v2225_v41 = vpop.f32.mrf.mxu0  ;;  %v2245_v0 = vpop.f32.mrf.mxu1 }
 0x284   :  { %v2248_v7 = vadd.f32 %v2225_v41, %v2152_v32  ;;  %v2249_v9 = vadd.f32 %v2245_v0, %v2153_v51 }
 0x28a   :  { %v2321_v5 = vpop.f32.mrf.mxu2  ;;  %v2341_v1 = vpop.f32.mrf.mxu3 }
 0x28b   :  { %v2344_v57 = vadd.f32 %v2321_v5, %v2248_v7  ;;  %v2345_v19 = vadd.f32 %v2341_v1, %v2249_v9 }
 0x2a4   :  { %v2424_v47 = vpop.f32.mrf.mxu0  ;;  %v2444_v27 = vpop.f32.mrf.mxu1 }
 0x2a5   :  { %v2447_v33 = vadd.f32 %v2424_v47, %v2344_v57  ;;  %v2448_v21 = vadd.f32 %v2444_v27, %v2345_v19 }
 0x2a7   :  { %v2449_v6 = vadd.f32 1e-06, %v2447_v33  ;;  %v2450_v8 = vadd.f32 1e-06, %v2448_v21 }
 0x2a9   :  { %2489 = vlog2.f32 %v2449_v6 }
 0x2aa   :  { %2491 = vlog2.f32 %v2450_v8 }
 0x2af   :  { %v2490_v29 = vpop.eup %2489 }
 0x2b0   :  { %v2492_v44 = vpop.eup %2491  ;;  %v2452_v45 = vmul.f32 0.6931472, %v2490_v29 }
 0x2b1   :  { %v2454_v23 = vmul.f32 0.6931472, %v2492_v44 }
 0x2b2   :  { %2455 = vst [vmem:[#allocation11] sm:$0xff] %v2452_v45 }
 0x2b3   :  { %2456 = vst [vmem:[#allocation11 + $0x8] sm:$0xff] %v2454_v23 }
 0x2b4   :  { %2467 = dma.vmem_to_hbm [thread:$0]  %s2463_s4, 256, %s2465_s24, [#allocation4]  }
 0x2b5   :  { %2643 = dma.done.wait [#allocation4], 256  }
 0x2b6   :  { %2644 = vsyncadd [#allocation4], 4294967040 }
 0x2b7   :  { %2472 = vsyncpa [#allocation3], 1 }
 0x2b8   :  { %2473 = vsyncpa [#allocation6], 1 }
 0x2b9   :  { %2474 = vsyncpa [#allocation9], 1 }
 0x2ba   :  { %2475 = vsyncpa [#allocation4], 1 }

</bundles_post_ra>
